<compile_context>
chip_gen: v7x
topology: tpu7x:2x2x1
jax: 0.10.0
libtpu: 0.0.40
codegen_flags: <defaults>
</compile_context>

<pallas_src>
import functools

import jax
import jax.numpy as jnp
from jax import lax
from jax.experimental import pallas as pl
from jax.experimental.pallas import tpu as pltpu

NEG_SLOPE = 0.2   # LeakyReLU negative slope of the DIP-style Up block
_LANES = 128


def _rup(x, m=_LANES):
    return ((x + m - 1) // m) * m


def _pick_tile_rows(hf):
    """Largest even divisor of hf that is <= max(2, min(64, hf // 2))."""
    cap = max(2, min(64, hf // 2))
    th = 2
    for cand in range(2, cap + 1, 2):
        if hf % cand == 0:
            th = cand
    return th


def _fused_up_block_kernel(*refs, th, w_coarse, skip, neg_slope):
    if skip:
        (x1_ref, x2_ref, wsk_ref, bsk_ref, w1a_ref, w1b_ref,
         b1_ref, w2_ref, b2_ref, o_ref, up_ref, s_ref) = refs
    else:
        (x1_ref, w1a_ref, b1_ref, w2_ref, b2_ref, o_ref, up_ref) = refs
        x2_ref = wsk_ref = bsk_ref = w1b_ref = s_ref = None

    TH = th
    W = w_coarse
    _, _, Wf, Cop = o_ref.shape
    C1p = up_ref.shape[-1]
    mxu = jnp.bfloat16

    t = pl.program_id(1)
    nt = pl.num_programs(1)
    r0 = t * TH                 # first fine (output) row of this tile
    c0 = t * (TH // 2)          # first coarse x1 row of this tile

    def lrelu(v):
        return jnp.where(v >= 0, v, neg_slope * v)

    # Zero the padded scratches; their 1-element borders implement the 3x3
    # conv's zero padding (left/right columns always, top/bottom rows at the
    # image edges where the pl.when halo writes below stay disabled).
    up_ref[...] = jnp.zeros(up_ref.shape, up_ref.dtype)
    if skip:
        s_ref[...] = jnp.zeros(s_ref.shape, s_ref.dtype)

    # ---- block.up : nearest-neighbour 2x upsample of x1, built in VMEM ------
    def put_upsampled(dst_row, coarse_row, n_coarse, row_repeat):
        src = x1_ref[0, pl.ds(coarse_row, n_coarse), :, :]        # (n, W, C1p)
        if row_repeat:
            src = jnp.broadcast_to(
                src[:, None, :, :], (n_coarse, 2, W, C1p)
            ).reshape(2 * n_coarse, W, C1p)
        nf = src.shape[0]
        # column repeat = two stride-2 stores (even / odd fine columns)
        up_ref[pl.ds(dst_row, nf), pl.ds(1, W, 2), :] = src
        up_ref[pl.ds(dst_row, nf), pl.ds(2, W, 2), :] = src

    put_upsampled(1, c0, TH // 2, True)          # tile interior rows

    @pl.when(t > 0)
    def _():                                     # top halo (fine row r0 - 1)
        put_upsampled(0, c0 - 1, 1, False)

    @pl.when(t < nt - 1)
    def _():                                     # bottom halo (fine row r0 + TH)
        put_upsampled(TH + 1, c0 + TH // 2, 1, False)

    # ---- block.skip_conv : 1x1 conv + LeakyReLU on the skip path ------------
    if skip:
        Csp = s_ref.shape[-1]
        C2p = x2_ref.shape[-1]
        wsk = wsk_ref[...]                        # (C2p, Csp) bf16
        bsk = bsk_ref[...]                        # (1, Csp)  f32

        def put_skip(dst_row, fine_row, n_rows):
            xs = x2_ref[0, pl.ds(fine_row, n_rows), :, :]          # (n, Wf, C2p)
            xs = xs.reshape(n_rows * Wf, C2p).astype(mxu)
            sv = jnp.dot(xs, wsk, preferred_element_type=jnp.float32)
            sv = lrelu(sv + bsk)
            s_ref[pl.ds(dst_row, n_rows), pl.ds(1, Wf), :] = (
                sv.reshape(n_rows, Wf, Csp))

        put_skip(1, r0, TH)

        @pl.when(t > 0)
        def _():
            put_skip(0, r0 - 1, 1)

        @pl.when(t < nt - 1)
        def _():
            put_skip(TH + 1, r0 + TH, 1)

    # ---- block.conv[0] : 3x3 conv (pad=1) over the *implicit* concat --------
    # w1 was split in the wrapper, so each source contributes a partial-im2col
    # matmul with contraction depth K = 3 * C (3 column taps folded together).
    def conv3x3_contrib(src_ref, w_ref):
        cp = src_ref.shape[-1]
        slab = jnp.concatenate(
            [src_ref[:, pl.ds(dx, Wf), :] for dx in range(3)],
            axis=-1).astype(mxu)                                   # (TH+2, Wf, 3*cp)
        part = jnp.zeros((TH * Wf, Cop), jnp.float32)
        for dy in range(3):
            lhs = slab[dy:dy + TH].reshape(TH * Wf, 3 * cp)
            part = part + jnp.dot(lhs, w_ref[dy],
                                  preferred_element_type=jnp.float32)
        return part

    acc = conv3x3_contrib(up_ref, w1a_ref)
    if skip:
        acc = acc + conv3x3_contrib(s_ref, w1b_ref)
    y1 = lrelu(acc + b1_ref[...])                                  # (TH*Wf, Cop) f32

    # ---- block.conv[1] : 1x1 conv + LeakyReLU --------------------------------
    y2 = jnp.dot(y1.astype(mxu), w2_ref[...],
                 preferred_element_type=jnp.float32)
    y2 = lrelu(y2 + b2_ref[...])
    o_ref[...] = y2.reshape(1, TH, Wf, Cop).astype(o_ref.dtype)


def bayesianise_block_up_forward(params, x1_nchw, x2_nchw, *, skip=True):
    """Forward of BayesianiseBlockUp. Inputs/outputs are NCHW (PyTorch layout)."""
    f32, bf16 = jnp.float32, jnp.bfloat16

    x1 = jnp.transpose(x1_nchw, (0, 2, 3, 1)).astype(f32)          # NHWC coarse
    N, H, W, C1 = x1.shape
    Hf, Wf = 2 * H, 2 * W

    w1 = params["w1"]                      # (3, 3, C1 + Cs, Co), HWIO
    w2 = params["w2"]                      # (1, 1, Co, Co)
    Co = w1.shape[-1]
    Cs = w1.shape[2] - C1

    C1p, Cop = _rup(C1), _rup(Co)
    TH = _pick_tile_rows(Hf)
    grid = (N, Hf // TH)

    # pad channel dims to the 128-lane width; split w1 at the concat boundary
    x1p = jnp.pad(x1, ((0, 0), (0, 0), (0, 0), (0, C1p - C1)))
    w1a = jnp.pad(w1[:, :, :C1, :],
                  ((0, 0), (0, 0), (0, C1p - C1), (0, Cop - Co)))
    w1a = w1a.reshape(3, 3 * C1p, Cop).astype(bf16)
    b1 = jnp.pad(params["b1"], (0, Cop - Co)).reshape(1, Cop).astype(f32)
    w2m = jnp.pad(w2[0, 0], ((0, Cop - Co), (0, Cop - Co))).astype(bf16)
    b2 = jnp.pad(params["b2"], (0, Cop - Co)).reshape(1, Cop).astype(f32)

    if skip:
        x2 = jnp.transpose(x2_nchw, (0, 2, 3, 1)).astype(f32)
        C2 = x2.shape[-1]
        C2p, Csp = _rup(C2), _rup(Cs)
        x2p = jnp.pad(x2, ((0, 0), (0, 0), (0, 0), (0, C2p - C2)))
        wsk = jnp.pad(params["w_skip"][0, 0],
                      ((0, C2p - C2), (0, Csp - Cs))).astype(bf16)
        bsk = jnp.pad(params["b_skip"],
                      (0, Csp - Cs)).reshape(1, Csp).astype(f32)
        w1b = jnp.pad(w1[:, :, C1:, :],
                      ((0, 0), (0, 0), (0, Csp - Cs), (0, Cop - Co)))
        w1b = w1b.reshape(3, 3 * Csp, Cop).astype(bf16)

        inputs = [x1p, x2p, wsk, bsk, w1a, w1b, b1, w2m, b2]
        in_specs = [
            pl.BlockSpec((1, H, W, C1p), lambda n, t: (n, 0, 0, 0)),
            pl.BlockSpec((1, Hf, Wf, C2p), lambda n, t: (n, 0, 0, 0)),
            pl.BlockSpec((C2p, Csp), lambda n, t: (0, 0)),
            pl.BlockSpec((1, Csp), lambda n, t: (0, 0)),
            pl.BlockSpec((3, 3 * C1p, Cop), lambda n, t: (0, 0, 0)),
            pl.BlockSpec((3, 3 * Csp, Cop), lambda n, t: (0, 0, 0)),
            pl.BlockSpec((1, Cop), lambda n, t: (0, 0)),
            pl.BlockSpec((Cop, Cop), lambda n, t: (0, 0)),
            pl.BlockSpec((1, Cop), lambda n, t: (0, 0)),
        ]
        scratch = [pltpu.VMEM((TH + 2, Wf + 2, C1p), f32),
                   pltpu.VMEM((TH + 2, Wf + 2, Csp), f32)]
    else:
        # skip path dropped entirely at trace time (it would be multiplied by 0)
        inputs = [x1p, w1a, b1, w2m, b2]
        in_specs = [
            pl.BlockSpec((1, H, W, C1p), lambda n, t: (n, 0, 0, 0)),
            pl.BlockSpec((3, 3 * C1p, Cop), lambda n, t: (0, 0, 0)),
            pl.BlockSpec((1, Cop), lambda n, t: (0, 0)),
            pl.BlockSpec((Cop, Cop), lambda n, t: (0, 0)),
            pl.BlockSpec((1, Cop), lambda n, t: (0, 0)),
        ]
        scratch = [pltpu.VMEM((TH + 2, Wf + 2, C1p), f32)]

    kernel = functools.partial(_fused_up_block_kernel, th=TH, w_coarse=W,
                               skip=skip, neg_slope=NEG_SLOPE)

    out = pl.pallas_call(
        kernel,
        out_shape=jax.ShapeDtypeStruct((N, Hf, Wf, Cop), f32),
        grid_spec=pltpu.PrefetchScalarGridSpec(
            num_scalar_prefetch=0,
            grid=grid,
            in_specs=in_specs,
            out_specs=pl.BlockSpec((1, TH, Wf, Cop), lambda n, t: (n, t, 0, 0)),
            scratch_shapes=scratch,
        ),
        compiler_params=pltpu.CompilerParams(
            dimension_semantics=("parallel", "parallel")),
    )(*inputs)

    out = out[..., :Co]                        # drop lane padding
    return jnp.transpose(out, (0, 3, 1, 2))    # NHWC -> NCHW


# --------------------------- pure-JAX reference -------------------------------
def _ref_conv_lrelu(x, w, b, padding):
    # Mirror the kernel's MXU operand dtype (bf16) with f32 accumulation.
    y = lax.conv_general_dilated(
        x.astype(jnp.bfloat16), w.astype(jnp.bfloat16),
        window_strides=(1, 1),
        padding=[(padding, padding), (padding, padding)],
        dimension_numbers=("NHWC", "HWIO", "NHWC"),
        preferred_element_type=jnp.float32)
    y = y + b.astype(jnp.float32)
    return jnp.where(y >= 0, y, NEG_SLOPE * y)


def _reference_forward(params, x1_nchw, x2_nchw, *, skip=True):
    x1 = jnp.transpose(x1_nchw, (0, 2, 3, 1))
    x2 = jnp.transpose(x2_nchw, (0, 2, 3, 1))
    x1 = jnp.repeat(jnp.repeat(x1, 2, axis=1), 2, axis=2)
    s = _ref_conv_lrelu(x2, params["w_skip"], params["b_skip"], 0)
    if not skip:
        s = s * 0.0
    x = jnp.concatenate([x1, s], axis=-1)
    x = _ref_conv_lrelu(x, params["w1"], params["b1"], 1)
    x = _ref_conv_lrelu(x, params["w2"], params["b2"], 0)
    return jnp.transpose(x, (0, 3, 1, 2))


if __name__ == "__main__":
    key = jax.random.PRNGKey(0)
    k = jax.random.split(key, 8)

    # small shapes: coarse features x1 (N, C1, H, W), skip features x2 at 2H x 2W
    N, C1, H, W = 2, 4, 8, 8
    C2, Cs = 6, 4                 # skip-path in / out channels
    Cc, Co = C1 + Cs, 8           # channels after concat / block output channels

    x1 = jax.random.normal(k[0], (N, C1, H, W), jnp.float32)
    x2 = jax.random.normal(k[1], (N, C2, 2 * H, 2 * W), jnp.float32)

    params = {
        "w_skip": 0.3 * jax.random.normal(k[2], (1, 1, C2, Cs), jnp.float32),
        "b_skip": 0.1 * jax.random.normal(k[3], (Cs,), jnp.float32),
        "w1":     0.1 * jax.random.normal(k[4], (3, 3, Cc, Co), jnp.float32),
        "b1":     0.1 * jax.random.normal(k[5], (Co,), jnp.float32),
        "w2":     0.3 * jax.random.normal(k[6], (1, 1, Co, Co), jnp.float32),
        "b2":     0.1 * jax.random.normal(k[7], (Co,), jnp.float32),
    }

    out = jax.block_until_ready(
        bayesianise_block_up_forward(params, x1, x2, skip=True))
    assert out.shape == (N, Co, 2 * H, 2 * W), out.shape
    ref = jax.block_until_ready(_reference_forward(params, x1, x2, skip=True))
    err = float(jnp.max(jnp.abs(out - ref)))
    assert err < 1e-2, err

    out_ns = jax.block_until_ready(
        bayesianise_block_up_forward(params, x1, x2, skip=False))
    ref_ns = jax.block_until_ready(
        _reference_forward(params, x1, x2, skip=False))
    err_ns = float(jnp.max(jnp.abs(out_ns - ref_ns)))
    assert err_ns < 1e-2, err_ns

    print("KERNEL_OK")
</pallas_src>

<mosaic_0001>
module attributes {stable_mosaic.version = 11 : i64} {
  func.func @_fused_up_block_kernel(%arg0: i32, %arg1: i32, %arg2: memref<1x8x8x128xf32, #tpu.memory_space<vmem>>, %arg3: memref<1x16x16x128xf32, #tpu.memory_space<vmem>>, %arg4: memref<128x128xbf16, #tpu.memory_space<vmem>>, %arg5: memref<1x128xf32, #tpu.memory_space<vmem>>, %arg6: memref<3x384x128xbf16, #tpu.memory_space<vmem>>, %arg7: memref<3x384x128xbf16, #tpu.memory_space<vmem>>, %arg8: memref<1x128xf32, #tpu.memory_space<vmem>>, %arg9: memref<128x128xbf16, #tpu.memory_space<vmem>>, %arg10: memref<1x128xf32, #tpu.memory_space<vmem>>, %arg11: memref<1x8x16x128xf32, #tpu.memory_space<vmem>>, %arg12: memref<10x18x128xf32, #tpu.memory_space<vmem>>, %arg13: memref<10x18x128xf32, #tpu.memory_space<vmem>>) attributes {dimension_semantics = [#tpu.dimension_semantics<parallel>, #tpu.dimension_semantics<parallel>], iteration_bounds = array<i64: 2, 2>, scalar_prefetch = 0 : i64, scratch_operands = 2 : i64, tpu.core_type = #tpu.core_type<tc>, window_params = [{transform_indices = @transform_0, window_bounds = array<i64: 1, 8, 8, 128>}, {transform_indices = @transform_1, window_bounds = array<i64: 1, 16, 16, 128>}, {pipeline_mode = #tpu.pipeline_mode<synchronous>, transform_indices = @transform_2, window_bounds = array<i64: 128, 128>}, {pipeline_mode = #tpu.pipeline_mode<synchronous>, transform_indices = @transform_3, window_bounds = array<i64: 1, 128>}, {pipeline_mode = #tpu.pipeline_mode<synchronous>, transform_indices = @transform_4, window_bounds = array<i64: 3, 384, 128>}, {pipeline_mode = #tpu.pipeline_mode<synchronous>, transform_indices = @transform_5, window_bounds = array<i64: 3, 384, 128>}, {pipeline_mode = #tpu.pipeline_mode<synchronous>, transform_indices = @transform_6, window_bounds = array<i64: 1, 128>}, {pipeline_mode = #tpu.pipeline_mode<synchronous>, transform_indices = @transform_7, window_bounds = array<i64: 128, 128>}, {pipeline_mode = #tpu.pipeline_mode<synchronous>, transform_indices = @transform_8, window_bounds = array<i64: 1, 128>}, {transform_indices = @transform_9, window_bounds = array<i64: 1, 8, 16, 128>}]} {
    %c8_i32 = arith.constant 8 : i32
    %0 = arith.muli %arg1, %c8_i32 : i32
    %c4_i32 = arith.constant 4 : i32
    %1 = arith.muli %arg1, %c4_i32 : i32
    %cst = arith.constant 0.000000e+00 : f32
    %2 = vector.broadcast %cst : f32 to vector<10x18x128xf32>
    %c0 = arith.constant 0 : index
    %c0_0 = arith.constant 0 : index
    %c0_1 = arith.constant 0 : index
    %3 = vector.load %arg12[%c0, %c0_0, %c0_1] : memref<10x18x128xf32, #tpu.memory_space<vmem>>, vector<10x18x128xf32>
    tpu.vector_store %arg12[%c0, %c0_0, %c0_1], %2 {strides = array<i32>} : memref<10x18x128xf32, #tpu.memory_space<vmem>>, vector<10x18x128xf32>,
    %cst_2 = arith.constant 0.000000e+00 : f32
    %4 = vector.broadcast %cst_2 : f32 to vector<10x18x128xf32>
    %c0_3 = arith.constant 0 : index
    %c0_4 = arith.constant 0 : index
    %c0_5 = arith.constant 0 : index
    %5 = vector.load %arg13[%c0_3, %c0_4, %c0_5] : memref<10x18x128xf32, #tpu.memory_space<vmem>>, vector<10x18x128xf32>
    tpu.vector_store %arg13[%c0_3, %c0_4, %c0_5], %4 {strides = array<i32>} : memref<10x18x128xf32, #tpu.memory_space<vmem>>, vector<10x18x128xf32>,
    %c0_6 = arith.constant 0 : index
    %6 = arith.index_cast %1 : i32 to index
    %c0_7 = arith.constant 0 : index
    %c0_8 = arith.constant 0 : index
    %7 = vector.load %arg2[%c0_6, %6, %c0_7, %c0_8] : memref<1x8x8x128xf32, #tpu.memory_space<vmem>>, vector<1x4x8x128xf32>
    %8 = vector.shape_cast %7 : vector<1x4x8x128xf32> to vector<4x8x128xf32>
    %9 = vector.shape_cast %8 : vector<4x8x128xf32> to vector<4x1x8x128xf32>
    %10 = vector.shape_cast %9 : vector<4x1x8x128xf32> to vector<4x1x8x128xf32>
    %11 = vector.broadcast %10 : vector<4x1x8x128xf32> to vector<4x2x8x128xf32>
    %12 = vector.shape_cast %11 : vector<4x2x8x128xf32> to vector<8x8x128xf32>
    %c1 = arith.constant 1 : index
    %c1_9 = arith.constant 1 : index
    %c0_10 = arith.constant 0 : index
    %13 = tpu.strided_load %arg12[%c1, %c1_9, %c0_10] {strides = array<i32: 1, 2, 1>} : memref<10x18x128xf32, #tpu.memory_space<vmem>>, vector<8x8x128xf32>
    tpu.strided_store %arg12[%c1, %c1_9, %c0_10], %12 {strides = array<i32: 1, 2, 1>} : memref<10x18x128xf32, #tpu.memory_space<vmem>>, vector<8x8x128xf32>
    %c1_11 = arith.constant 1 : index
    %c2 = arith.constant 2 : index
    %c0_12 = arith.constant 0 : index
    %14 = tpu.strided_load %arg12[%c1_11, %c2, %c0_12] {strides = array<i32: 1, 2, 1>} : memref<10x18x128xf32, #tpu.memory_space<vmem>>, vector<8x8x128xf32>
    tpu.strided_store %arg12[%c1_11, %c2, %c0_12], %12 {strides = array<i32: 1, 2, 1>} : memref<10x18x128xf32, #tpu.memory_space<vmem>>, vector<8x8x128xf32>
    %c0_i32 = arith.constant 0 : i32
    %15 = arith.cmpi sgt, %arg1, %c0_i32 : i32
    %16 = arith.extui %15 : i1 to i32
    %c0_i32_13 = arith.constant 0 : i32
    %17 = arith.cmpi ne, %16, %c0_i32_13 : i32
    scf.if %17 {
      %c1_i32_91 = arith.constant 1 : i32
      %114 = arith.subi %1, %c1_i32_91 : i32
      %c0_92 = arith.constant 0 : index
      %115 = arith.index_cast %114 : i32 to index
      %c0_93 = arith.constant 0 : index
      %c0_94 = arith.constant 0 : index
      %116 = vector.load %arg2[%c0_92, %115, %c0_93, %c0_94] : memref<1x8x8x128xf32, #tpu.memory_space<vmem>>, vector<1x1x8x128xf32>
      %117 = vector.shape_cast %116 : vector<1x1x8x128xf32> to vector<1x8x128xf32>
      %c0_95 = arith.constant 0 : index
      %c1_96 = arith.constant 1 : index
      %c0_97 = arith.constant 0 : index
      %118 = tpu.strided_load %arg12[%c0_95, %c1_96, %c0_97] {strides = array<i32: 1, 2, 1>} : memref<10x18x128xf32, #tpu.memory_space<vmem>>, vector<1x8x128xf32>
      tpu.strided_store %arg12[%c0_95, %c1_96, %c0_97], %117 {strides = array<i32: 1, 2, 1>} : memref<10x18x128xf32, #tpu.memory_space<vmem>>, vector<1x8x128xf32>
      %c0_98 = arith.constant 0 : index
      %c2_99 = arith.constant 2 : index
      %c0_100 = arith.constant 0 : index
      %119 = tpu.strided_load %arg12[%c0_98, %c2_99, %c0_100] {strides = array<i32: 1, 2, 1>} : memref<10x18x128xf32, #tpu.memory_space<vmem>>, vector<1x8x128xf32>
      tpu.strided_store %arg12[%c0_98, %c2_99, %c0_100], %117 {strides = array<i32: 1, 2, 1>} : memref<10x18x128xf32, #tpu.memory_space<vmem>>, vector<1x8x128xf32>
    } else {
    }
    %c1_i32 = arith.constant 1 : i32
    %18 = arith.cmpi slt, %arg1, %c1_i32 : i32
    %19 = arith.extui %18 : i1 to i32
    %c0_i32_14 = arith.constant 0 : i32
    %20 = arith.cmpi ne, %19, %c0_i32_14 : i32
    scf.if %20 {
      %c4_i32_91 = arith.constant 4 : i32
      %114 = arith.addi %1, %c4_i32_91 : i32
      %c0_92 = arith.constant 0 : index
      %115 = arith.index_cast %114 : i32 to index
      %c0_93 = arith.constant 0 : index
      %c0_94 = arith.constant 0 : index
      %116 = vector.load %arg2[%c0_92, %115, %c0_93, %c0_94] : memref<1x8x8x128xf32, #tpu.memory_space<vmem>>, vector<1x1x8x128xf32>
      %117 = vector.shape_cast %116 : vector<1x1x8x128xf32> to vector<1x8x128xf32>
      %c9 = arith.constant 9 : index
      %c1_95 = arith.constant 1 : index
      %c0_96 = arith.constant 0 : index
      %118 = tpu.strided_load %arg12[%c9, %c1_95, %c0_96] {strides = array<i32: 1, 2, 1>} : memref<10x18x128xf32, #tpu.memory_space<vmem>>, vector<1x8x128xf32>
      tpu.strided_store %arg12[%c9, %c1_95, %c0_96], %117 {strides = array<i32: 1, 2, 1>} : memref<10x18x128xf32, #tpu.memory_space<vmem>>, vector<1x8x128xf32>
      %c9_97 = arith.constant 9 : index
      %c2_98 = arith.constant 2 : index
      %c0_99 = arith.constant 0 : index
      %119 = tpu.strided_load %arg12[%c9_97, %c2_98, %c0_99] {strides = array<i32: 1, 2, 1>} : memref<10x18x128xf32, #tpu.memory_space<vmem>>, vector<1x8x128xf32>
      tpu.strided_store %arg12[%c9_97, %c2_98, %c0_99], %117 {strides = array<i32: 1, 2, 1>} : memref<10x18x128xf32, #tpu.memory_space<vmem>>, vector<1x8x128xf32>
    } else {
    }
    %c0_15 = arith.constant 0 : index
    %c0_16 = arith.constant 0 : index
    %21 = vector.load %arg4[%c0_15, %c0_16] : memref<128x128xbf16, #tpu.memory_space<vmem>>, vector<128x128xbf16>
    %c0_17 = arith.constant 0 : index
    %c0_18 = arith.constant 0 : index
    %22 = vector.load %arg5[%c0_17, %c0_18] : memref<1x128xf32, #tpu.memory_space<vmem>>, vector<1x128xf32>
    %c0_19 = arith.constant 0 : index
    %23 = arith.index_cast %0 : i32 to index
    %c0_20 = arith.constant 0 : index
    %c0_21 = arith.constant 0 : index
    %24 = vector.load %arg3[%c0_19, %23, %c0_20, %c0_21] : memref<1x16x16x128xf32, #tpu.memory_space<vmem>>, vector<1x8x16x128xf32>
    %25 = vector.shape_cast %24 : vector<1x8x16x128xf32> to vector<8x16x128xf32>
    %26 = vector.shape_cast %25 : vector<8x16x128xf32> to vector<128x128xf32>
    %27 = arith.truncf %26 : vector<128x128xf32> to vector<128x128xbf16>
    %cst_22 = arith.constant dense<0.000000e+00> : vector<128x128xf32>
    %28 = tpu.matmul %27, %21, %cst_22 {dimension_numbers = #tpu.dot_dimension_numbers<[1], [0], [0], [1], [0, 0, 1, 1], [], []>} : vector<128x128xbf16>, vector<128x128xbf16>, vector<128x128xf32> -> vector<128x128xf32>
    %29 = vector.broadcast %22 : vector<1x128xf32> to vector<128x128xf32>
    %30 = arith.addf %28, %29 : vector<128x128xf32>
    %cst_23 = arith.constant 0.000000e+00 : f32
    %31 = vector.broadcast %cst_23 : f32 to vector<128x128xf32>
    %32 = arith.cmpf oge, %30, %31 : vector<128x128xf32>
    %cst_24 = arith.constant 2.000000e-01 : f32
    %33 = vector.broadcast %cst_24 : f32 to vector<128x128xf32>
    %34 = arith.mulf %33, %30 : vector<128x128xf32>
    %35 = arith.select %32, %30, %34 : vector<128x128xi1>, vector<128x128xf32>
    %36 = vector.shape_cast %35 : vector<128x128xf32> to vector<8x16x128xf32>
    %c1_25 = arith.constant 1 : index
    %c1_26 = arith.constant 1 : index
    %c0_27 = arith.constant 0 : index
    %37 = vector.load %arg13[%c1_25, %c1_26, %c0_27] : memref<10x18x128xf32, #tpu.memory_space<vmem>>, vector<8x16x128xf32>
    tpu.vector_store %arg13[%c1_25, %c1_26, %c0_27], %36 {strides = array<i32>} : memref<10x18x128xf32, #tpu.memory_space<vmem>>, vector<8x16x128xf32>,
    %c0_i32_28 = arith.constant 0 : i32
    %38 = arith.cmpi sgt, %arg1, %c0_i32_28 : i32
    %39 = arith.extui %38 : i1 to i32
    %c0_i32_29 = arith.constant 0 : i32
    %40 = arith.cmpi ne, %39, %c0_i32_29 : i32
    scf.if %40 {
      %c1_i32_91 = arith.constant 1 : i32
      %114 = arith.subi %0, %c1_i32_91 : i32
      %c0_92 = arith.constant 0 : index
      %115 = arith.index_cast %114 : i32 to index
      %c0_93 = arith.constant 0 : index
      %c0_94 = arith.constant 0 : index
      %116 = vector.load %arg3[%c0_92, %115, %c0_93, %c0_94] : memref<1x16x16x128xf32, #tpu.memory_space<vmem>>, vector<1x1x16x128xf32>
      %117 = vector.shape_cast %116 : vector<1x1x16x128xf32> to vector<1x16x128xf32>
      %118 = vector.shape_cast %117 : vector<1x16x128xf32> to vector<16x128xf32>
      %119 = arith.truncf %118 : vector<16x128xf32> to vector<16x128xbf16>
      %cst_95 = arith.constant dense<0.000000e+00> : vector<16x128xf32>
      %120 = tpu.matmul %119, %21, %cst_95 {dimension_numbers = #tpu.dot_dimension_numbers<[1], [0], [0], [1], [0, 0, 1, 1], [], []>} : vector<16x128xbf16>, vector<128x128xbf16>, vector<16x128xf32> -> vector<16x128xf32>
      %121 = vector.broadcast %22 : vector<1x128xf32> to vector<16x128xf32>
      %122 = arith.addf %120, %121 : vector<16x128xf32>
      %cst_96 = arith.constant 0.000000e+00 : f32
      %123 = vector.broadcast %cst_96 : f32 to vector<16x128xf32>
      %124 = arith.cmpf oge, %122, %123 : vector<16x128xf32>
      %cst_97 = arith.constant 2.000000e-01 : f32
      %125 = vector.broadcast %cst_97 : f32 to vector<16x128xf32>
      %126 = arith.mulf %125, %122 : vector<16x128xf32>
      %127 = arith.select %124, %122, %126 : vector<16x128xi1>, vector<16x128xf32>
      %128 = vector.shape_cast %127 : vector<16x128xf32> to vector<1x16x128xf32>
      %c0_98 = arith.constant 0 : index
      %c1_99 = arith.constant 1 : index
      %c0_100 = arith.constant 0 : index
      %129 = vector.load %arg13[%c0_98, %c1_99, %c0_100] : memref<10x18x128xf32, #tpu.memory_space<vmem>>, vector<1x16x128xf32>
      tpu.vector_store %arg13[%c0_98, %c1_99, %c0_100], %128 {strides = array<i32>} : memref<10x18x128xf32, #tpu.memory_space<vmem>>, vector<1x16x128xf32>,
    } else {
    }
    %c1_i32_30 = arith.constant 1 : i32
    %41 = arith.cmpi slt, %arg1, %c1_i32_30 : i32
    %42 = arith.extui %41 : i1 to i32
    %c0_i32_31 = arith.constant 0 : i32
    %43 = arith.cmpi ne, %42, %c0_i32_31 : i32
    scf.if %43 {
      %c8_i32_91 = arith.constant 8 : i32
      %114 = arith.addi %0, %c8_i32_91 : i32
      %c0_92 = arith.constant 0 : index
      %115 = arith.index_cast %114 : i32 to index
      %c0_93 = arith.constant 0 : index
      %c0_94 = arith.constant 0 : index
      %116 = vector.load %arg3[%c0_92, %115, %c0_93, %c0_94] : memref<1x16x16x128xf32, #tpu.memory_space<vmem>>, vector<1x1x16x128xf32>
      %117 = vector.shape_cast %116 : vector<1x1x16x128xf32> to vector<1x16x128xf32>
      %118 = vector.shape_cast %117 : vector<1x16x128xf32> to vector<16x128xf32>
      %119 = arith.truncf %118 : vector<16x128xf32> to vector<16x128xbf16>
      %cst_95 = arith.constant dense<0.000000e+00> : vector<16x128xf32>
      %120 = tpu.matmul %119, %21, %cst_95 {dimension_numbers = #tpu.dot_dimension_numbers<[1], [0], [0], [1], [0, 0, 1, 1], [], []>} : vector<16x128xbf16>, vector<128x128xbf16>, vector<16x128xf32> -> vector<16x128xf32>
      %121 = vector.broadcast %22 : vector<1x128xf32> to vector<16x128xf32>
      %122 = arith.addf %120, %121 : vector<16x128xf32>
      %cst_96 = arith.constant 0.000000e+00 : f32
      %123 = vector.broadcast %cst_96 : f32 to vector<16x128xf32>
      %124 = arith.cmpf oge, %122, %123 : vector<16x128xf32>
      %cst_97 = arith.constant 2.000000e-01 : f32
      %125 = vector.broadcast %cst_97 : f32 to vector<16x128xf32>
      %126 = arith.mulf %125, %122 : vector<16x128xf32>
      %127 = arith.select %124, %122, %126 : vector<16x128xi1>, vector<16x128xf32>
      %128 = vector.shape_cast %127 : vector<16x128xf32> to vector<1x16x128xf32>
      %c9 = arith.constant 9 : index
      %c1_98 = arith.constant 1 : index
      %c0_99 = arith.constant 0 : index
      %129 = vector.load %arg13[%c9, %c1_98, %c0_99] : memref<10x18x128xf32, #tpu.memory_space<vmem>>, vector<1x16x128xf32>
      tpu.vector_store %arg13[%c9, %c1_98, %c0_99], %128 {strides = array<i32>} : memref<10x18x128xf32, #tpu.memory_space<vmem>>, vector<1x16x128xf32>,
    } else {
    }
    %c0_32 = arith.constant 0 : index
    %c0_33 = arith.constant 0 : index
    %c0_34 = arith.constant 0 : index
    %44 = vector.load %arg12[%c0_32, %c0_33, %c0_34] : memref<10x18x128xf32, #tpu.memory_space<vmem>>, vector<10x16x128xf32>
    %c0_35 = arith.constant 0 : index
    %c1_36 = arith.constant 1 : index
    %c0_37 = arith.constant 0 : index
    %45 = vector.load %arg12[%c0_35, %c1_36, %c0_37] : memref<10x18x128xf32, #tpu.memory_space<vmem>>, vector<10x16x128xf32>
    %c0_38 = arith.constant 0 : index
    %c2_39 = arith.constant 2 : index
    %c0_40 = arith.constant 0 : index
    %46 = vector.load %arg12[%c0_38, %c2_39, %c0_40] : memref<10x18x128xf32, #tpu.memory_space<vmem>>, vector<10x16x128xf32>
    %47 = tpu.concatenate %44, %45, %46 in 2 : vector<10x16x128xf32>, vector<10x16x128xf32>, vector<10x16x128xf32> -> vector<10x16x384xf32>
    %48 = arith.truncf %47 : vector<10x16x384xf32> to vector<10x16x384xbf16>
    %cst_41 = arith.constant 0.000000e+00 : f32
    %49 = vector.broadcast %cst_41 : f32 to vector<128x128xf32>
    %50 = vector.extract_strided_slice %48 {offsets = [0, 0, 0], sizes = [8, 16, 384], strides = [1, 1, 1]} : vector<10x16x384xbf16> to vector<8x16x384xbf16>
    %51 = vector.shape_cast %50 : vector<8x16x384xbf16> to vector<128x384xbf16>
    %c0_42 = arith.constant 0 : index
    %c0_43 = arith.constant 0 : index
    %c0_44 = arith.constant 0 : index
    %52 = vector.load %arg6[%c0_42, %c0_43, %c0_44] : memref<3x384x128xbf16, #tpu.memory_space<vmem>>, vector<1x384x128xbf16>
    %53 = vector.shape_cast %52 : vector<1x384x128xbf16> to vector<384x128xbf16>
    %cst_45 = arith.constant dense<0.000000e+00> : vector<128x128xf32>
    %54 = tpu.matmul %51, %53, %cst_45 {dimension_numbers = #tpu.dot_dimension_numbers<[1], [0], [0], [1], [0, 0, 1, 1], [], []>} : vector<128x384xbf16>, vector<384x128xbf16>, vector<128x128xf32> -> vector<128x128xf32>
    %55 = arith.addf %49, %54 : vector<128x128xf32>
    %56 = vector.extract_strided_slice %48 {offsets = [1, 0, 0], sizes = [8, 16, 384], strides = [1, 1, 1]} : vector<10x16x384xbf16> to vector<8x16x384xbf16>
    %57 = vector.shape_cast %56 : vector<8x16x384xbf16> to vector<128x384xbf16>
    %c1_46 = arith.constant 1 : index
    %c0_47 = arith.constant 0 : index
    %c0_48 = arith.constant 0 : index
    %58 = vector.load %arg6[%c1_46, %c0_47, %c0_48] : memref<3x384x128xbf16, #tpu.memory_space<vmem>>, vector<1x384x128xbf16>
    %59 = vector.shape_cast %58 : vector<1x384x128xbf16> to vector<384x128xbf16>
    %cst_49 = arith.constant dense<0.000000e+00> : vector<128x128xf32>
    %60 = tpu.matmul %57, %59, %cst_49 {dimension_numbers = #tpu.dot_dimension_numbers<[1], [0], [0], [1], [0, 0, 1, 1], [], []>} : vector<128x384xbf16>, vector<384x128xbf16>, vector<128x128xf32> -> vector<128x128xf32>
    %61 = arith.addf %55, %60 : vector<128x128xf32>
    %62 = vector.extract_strided_slice %48 {offsets = [2, 0, 0], sizes = [8, 16, 384], strides = [1, 1, 1]} : vector<10x16x384xbf16> to vector<8x16x384xbf16>
    %63 = vector.shape_cast %62 : vector<8x16x384xbf16> to vector<128x384xbf16>
    %c2_50 = arith.constant 2 : index
    %c0_51 = arith.constant 0 : index
    %c0_52 = arith.constant 0 : index
    %64 = vector.load %arg6[%c2_50, %c0_51, %c0_52] : memref<3x384x128xbf16, #tpu.memory_space<vmem>>, vector<1x384x128xbf16>
    %65 = vector.shape_cast %64 : vector<1x384x128xbf16> to vector<384x128xbf16>
    %cst_53 = arith.constant dense<0.000000e+00> : vector<128x128xf32>
    %66 = tpu.matmul %63, %65, %cst_53 {dimension_numbers = #tpu.dot_dimension_numbers<[1], [0], [0], [1], [0, 0, 1, 1], [], []>} : vector<128x384xbf16>, vector<384x128xbf16>, vector<128x128xf32> -> vector<128x128xf32>
    %67 = arith.addf %61, %66 : vector<128x128xf32>
    %c0_54 = arith.constant 0 : index
    %c0_55 = arith.constant 0 : index
    %c0_56 = arith.constant 0 : index
    %68 = vector.load %arg13[%c0_54, %c0_55, %c0_56] : memref<10x18x128xf32, #tpu.memory_space<vmem>>, vector<10x16x128xf32>
    %c0_57 = arith.constant 0 : index
    %c1_58 = arith.constant 1 : index
    %c0_59 = arith.constant 0 : index
    %69 = vector.load %arg13[%c0_57, %c1_58, %c0_59] : memref<10x18x128xf32, #tpu.memory_space<vmem>>, vector<10x16x128xf32>
    %c0_60 = arith.constant 0 : index
    %c2_61 = arith.constant 2 : index
    %c0_62 = arith.constant 0 : index
    %70 = vector.load %arg13[%c0_60, %c2_61, %c0_62] : memref<10x18x128xf32, #tpu.memory_space<vmem>>, vector<10x16x128xf32>
    %71 = tpu.concatenate %68, %69, %70 in 2 : vector<10x16x128xf32>, vector<10x16x128xf32>, vector<10x16x128xf32> -> vector<10x16x384xf32>
    %72 = arith.truncf %71 : vector<10x16x384xf32> to vector<10x16x384xbf16>
    %cst_63 = arith.constant 0.000000e+00 : f32
    %73 = vector.broadcast %cst_63 : f32 to vector<128x128xf32>
    %74 = vector.extract_strided_slice %72 {offsets = [0, 0, 0], sizes = [8, 16, 384], strides = [1, 1, 1]} : vector<10x16x384xbf16> to vector<8x16x384xbf16>
    %75 = vector.shape_cast %74 : vector<8x16x384xbf16> to vector<128x384xbf16>
    %c0_64 = arith.constant 0 : index
    %c0_65 = arith.constant 0 : index
    %c0_66 = arith.constant 0 : index
    %76 = vector.load %arg7[%c0_64, %c0_65, %c0_66] : memref<3x384x128xbf16, #tpu.memory_space<vmem>>, vector<1x384x128xbf16>
    %77 = vector.shape_cast %76 : vector<1x384x128xbf16> to vector<384x128xbf16>
    %cst_67 = arith.constant dense<0.000000e+00> : vector<128x128xf32>
    %78 = tpu.matmul %75, %77, %cst_67 {dimension_numbers = #tpu.dot_dimension_numbers<[1], [0], [0], [1], [0, 0, 1, 1], [], []>} : vector<128x384xbf16>, vector<384x128xbf16>, vector<128x128xf32> -> vector<128x128xf32>
    %79 = arith.addf %73, %78 : vector<128x128xf32>
    %80 = vector.extract_strided_slice %72 {offsets = [1, 0, 0], sizes = [8, 16, 384], strides = [1, 1, 1]} : vector<10x16x384xbf16> to vector<8x16x384xbf16>
    %81 = vector.shape_cast %80 : vector<8x16x384xbf16> to vector<128x384xbf16>
    %c1_68 = arith.constant 1 : index
    %c0_69 = arith.constant 0 : index
    %c0_70 = arith.constant 0 : index
    %82 = vector.load %arg7[%c1_68, %c0_69, %c0_70] : memref<3x384x128xbf16, #tpu.memory_space<vmem>>, vector<1x384x128xbf16>
    %83 = vector.shape_cast %82 : vector<1x384x128xbf16> to vector<384x128xbf16>
    %cst_71 = arith.constant dense<0.000000e+00> : vector<128x128xf32>
    %84 = tpu.matmul %81, %83, %cst_71 {dimension_numbers = #tpu.dot_dimension_numbers<[1], [0], [0], [1], [0, 0, 1, 1], [], []>} : vector<128x384xbf16>, vector<384x128xbf16>, vector<128x128xf32> -> vector<128x128xf32>
    %85 = arith.addf %79, %84 : vector<128x128xf32>
    %86 = vector.extract_strided_slice %72 {offsets = [2, 0, 0], sizes = [8, 16, 384], strides = [1, 1, 1]} : vector<10x16x384xbf16> to vector<8x16x384xbf16>
    %87 = vector.shape_cast %86 : vector<8x16x384xbf16> to vector<128x384xbf16>
    %c2_72 = arith.constant 2 : index
    %c0_73 = arith.constant 0 : index
    %c0_74 = arith.constant 0 : index
    %88 = vector.load %arg7[%c2_72, %c0_73, %c0_74] : memref<3x384x128xbf16, #tpu.memory_space<vmem>>, vector<1x384x128xbf16>
    %89 = vector.shape_cast %88 : vector<1x384x128xbf16> to vector<384x128xbf16>
    %cst_75 = arith.constant dense<0.000000e+00> : vector<128x128xf32>
    %90 = tpu.matmul %87, %89, %cst_75 {dimension_numbers = #tpu.dot_dimension_numbers<[1], [0], [0], [1], [0, 0, 1, 1], [], []>} : vector<128x384xbf16>, vector<384x128xbf16>, vector<128x128xf32> -> vector<128x128xf32>
    %91 = arith.addf %85, %90 : vector<128x128xf32>
    %92 = arith.addf %67, %91 : vector<128x128xf32>
    %c0_76 = arith.constant 0 : index
    %c0_77 = arith.constant 0 : index
    %93 = vector.load %arg8[%c0_76, %c0_77] : memref<1x128xf32, #tpu.memory_space<vmem>>, vector<1x128xf32>
    %94 = vector.broadcast %93 : vector<1x128xf32> to vector<128x128xf32>
    %95 = arith.addf %92, %94 : vector<128x128xf32>
    %cst_78 = arith.constant 0.000000e+00 : f32
    %96 = vector.broadcast %cst_78 : f32 to vector<128x128xf32>
    %97 = arith.cmpf oge, %95, %96 : vector<128x128xf32>
    %cst_79 = arith.constant 2.000000e-01 : f32
    %98 = vector.broadcast %cst_79 : f32 to vector<128x128xf32>
    %99 = arith.mulf %98, %95 : vector<128x128xf32>
    %100 = arith.select %97, %95, %99 : vector<128x128xi1>, vector<128x128xf32>
    %101 = arith.truncf %100 : vector<128x128xf32> to vector<128x128xbf16>
    %c0_80 = arith.constant 0 : index
    %c0_81 = arith.constant 0 : index
    %102 = vector.load %arg9[%c0_80, %c0_81] : memref<128x128xbf16, #tpu.memory_space<vmem>>, vector<128x128xbf16>
    %cst_82 = arith.constant dense<0.000000e+00> : vector<128x128xf32>
    %103 = tpu.matmul %101, %102, %cst_82 {dimension_numbers = #tpu.dot_dimension_numbers<[1], [0], [0], [1], [0, 0, 1, 1], [], []>} : vector<128x128xbf16>, vector<128x128xbf16>, vector<128x128xf32> -> vector<128x128xf32>
    %c0_83 = arith.constant 0 : index
    %c0_84 = arith.constant 0 : index
    %104 = vector.load %arg10[%c0_83, %c0_84] : memref<1x128xf32, #tpu.memory_space<vmem>>, vector<1x128xf32>
    %105 = vector.broadcast %104 : vector<1x128xf32> to vector<128x128xf32>
    %106 = arith.addf %103, %105 : vector<128x128xf32>
    %cst_85 = arith.constant 0.000000e+00 : f32
    %107 = vector.broadcast %cst_85 : f32 to vector<128x128xf32>
    %108 = arith.cmpf oge, %106, %107 : vector<128x128xf32>
    %cst_86 = arith.constant 2.000000e-01 : f32
    %109 = vector.broadcast %cst_86 : f32 to vector<128x128xf32>
    %110 = arith.mulf %109, %106 : vector<128x128xf32>
    %111 = arith.select %108, %106, %110 : vector<128x128xi1>, vector<128x128xf32>
    %112 = vector.shape_cast %111 : vector<128x128xf32> to vector<1x8x16x128xf32>
    %c0_87 = arith.constant 0 : index
    %c0_88 = arith.constant 0 : index
    %c0_89 = arith.constant 0 : index
    %c0_90 = arith.constant 0 : index
    %113 = vector.load %arg11[%c0_87, %c0_88, %c0_89, %c0_90] : memref<1x8x16x128xf32, #tpu.memory_space<vmem>>, vector<1x8x16x128xf32>
    tpu.vector_store %arg11[%c0_87, %c0_88, %c0_89, %c0_90], %112 {strides = array<i32>} : memref<1x8x16x128xf32, #tpu.memory_space<vmem>>, vector<1x8x16x128xf32>,
    return
  }
  func.func @transform_0(%arg0: i32, %arg1: i32) -> (i32, i32, i32, i32) {
    %c0_i32 = arith.constant 0 : i32
    %c0_i32_0 = arith.constant 0 : i32
    %c0_i32_1 = arith.constant 0 : i32
    %c0_i32_2 = arith.constant 0 : i32
    return %arg0, %c0_i32, %c0_i32_0, %c0_i32_1 : i32, i32, i32, i32
  }
  func.func @transform_1(%arg0: i32, %arg1: i32) -> (i32, i32, i32, i32) {
    %c0_i32 = arith.constant 0 : i32
    %c0_i32_0 = arith.constant 0 : i32
    %c0_i32_1 = arith.constant 0 : i32
    %c0_i32_2 = arith.constant 0 : i32
    return %arg0, %c0_i32, %c0_i32_0, %c0_i32_1 : i32, i32, i32, i32
  }
  func.func @transform_2(%arg0: i32, %arg1: i32) -> (i32, i32) {
    %c0_i32 = arith.constant 0 : i32
    %c0_i32_0 = arith.constant 0 : i32
    %c0_i32_1 = arith.constant 0 : i32
    return %c0_i32, %c0_i32_0 : i32, i32
  }
  func.func @transform_3(%arg0: i32, %arg1: i32) -> (i32, i32) {
    %c0_i32 = arith.constant 0 : i32
    %c0_i32_0 = arith.constant 0 : i32
    %c0_i32_1 = arith.constant 0 : i32
    return %c0_i32, %c0_i32_0 : i32, i32
  }
  func.func @transform_4(%arg0: i32, %arg1: i32) -> (i32, i32, i32) {
    %c0_i32 = arith.constant 0 : i32
    %c0_i32_0 = arith.constant 0 : i32
    %c0_i32_1 = arith.constant 0 : i32
    %c0_i32_2 = arith.constant 0 : i32
    return %c0_i32, %c0_i32_0, %c0_i32_1 : i32, i32, i32
  }
  func.func @transform_5(%arg0: i32, %arg1: i32) -> (i32, i32, i32) {
    %c0_i32 = arith.constant 0 : i32
    %c0_i32_0 = arith.constant 0 : i32
    %c0_i32_1 = arith.constant 0 : i32
    %c0_i32_2 = arith.constant 0 : i32
    return %c0_i32, %c0_i32_0, %c0_i32_1 : i32, i32, i32
  }
  func.func @transform_6(%arg0: i32, %arg1: i32) -> (i32, i32) {
    %c0_i32 = arith.constant 0 : i32
    %c0_i32_0 = arith.constant 0 : i32
    %c0_i32_1 = arith.constant 0 : i32
    return %c0_i32, %c0_i32_0 : i32, i32
  }
  func.func @transform_7(%arg0: i32, %arg1: i32) -> (i32, i32) {
    %c0_i32 = arith.constant 0 : i32
    %c0_i32_0 = arith.constant 0 : i32
    %c0_i32_1 = arith.constant 0 : i32
    return %c0_i32, %c0_i32_0 : i32, i32
  }
  func.func @transform_8(%arg0: i32, %arg1: i32) -> (i32, i32) {
    %c0_i32 = arith.constant 0 : i32
    %c0_i32_0 = arith.constant 0 : i32
    %c0_i32_1 = arith.constant 0 : i32
    return %c0_i32, %c0_i32_0 : i32, i32
  }
  func.func @transform_9(%arg0: i32, %arg1: i32) -> (i32, i32, i32, i32) {
    %c0_i32 = arith.constant 0 : i32
    %c0_i32_0 = arith.constant 0 : i32
    %c0_i32_1 = arith.constant 0 : i32
    return %arg0, %arg1, %c0_i32, %c0_i32_0 : i32, i32, i32, i32
  }
}

</mosaic_0001>

<bundles_post_ra>
// kernel: tpu_custom_call.1
= control target key start
LH: loop header
LB: loop body
LE: loop exit
PB: predicated region body
PF: predicated region fallthrough
CT: control target
= control target key end

     0   :  { %s7031_s0 = inlined_call_operand.hbm [shape: f32[2,8,8,128], index: 0, kind: input, shape index: {}]   ;;  %s7032_s1 = inlined_call_operand.hbm [shape: f32[2,16,16,128], index: 1, kind: input, shape index: {}]   ;;  %s7033_s2 = inlined_call_operand.hbm [shape: bf16[128,128], index: 2, kind: input, shape index: {}]   ;;  %s7034_s3 = inlined_call_operand.vmem [shape: f32[1,128], index: 3, kind: input, shape index: {}]   ;;  %s7035_s4 = inlined_call_operand.hbm [shape: bf16[3,384,128], index: 4, kind: input, shape index: {}]   ;;  %s7036_s5 = inlined_call_operand.hbm [shape: bf16[3,384,128], index: 5, kind: input, shape index: {}]   ;;  %s7037_s6 = inlined_call_operand.vmem [shape: f32[1,128], index: 6, kind: input, shape index: {}]   ;;  %s7038_s7 = inlined_call_operand.hbm [shape: bf16[128,128], index: 7, kind: input, shape index: {}]   ;;  %s7039_s8 = inlined_call_operand.vmem [shape: f32[1,128], index: 8, kind: input, shape index: {}]   ;;  %s7040_s9 = inlined_call_operand.hbm [shape: f32[2,16,16,128], index: 9, kind: output, shape index: {}]  }
   0x1   :  { %7055 = sst [smem:[#allocation28_spill]] %s7031_s0 }
   0x2   :  { %7056 = sst [smem:[#allocation29_spill]] %s7033_s2 }
   0x3   :  { %7057 = sst [smem:[#allocation30_spill]] %s7034_s3 }
   0x4   :  { %7058 = sst [smem:[#allocation31_spill]] %s7035_s4 }
   0x5   :  { %7059 = sst [smem:[#allocation32_spill]] %s7036_s5 }
   0x6   :  { %7060 = sst [smem:[#allocation33_spill]] %s7037_s6 }
   0x7   :  { %7061 = sst [smem:[#allocation34_spill]] %s7038_s7 }
   0x8   :  { %7062 = sst [smem:[#allocation35_spill]] %s7039_s8 }
   0x9   :  { %7063 = sst [smem:[#allocation36_spill]] %s7040_s9 }
   0xa   :  { %14 = vsyncpa [#allocation5], 0 }
   0xb   :  { %16 = vsyncpa [#allocation5 + $0x1], 0 }
   0xc   :  { %17 = vsyncpa [#allocation8], 0 }
   0xd   :  { %19 = vsyncpa [#allocation8 + $0x1], 0 }
   0xe   :  { %20 = vsyncpa [#allocation11], 0 }
   0xf   :  { %21 = vsyncpa [#allocation14], 0 }
  0x10   :  { %22 = vsyncpa [#allocation6], 0 }
  0x11   :  { %24 = vsyncpa [#allocation6 + $0x1], 0  ;;  %s5960_s30 = smov 0   ;;  %s5962_s10 = smov 0  }
  0x12   :  { %s5964_s11 = smov 0   ;;  %s5966_s12 = smov 0  }
  0x13   :  { %s5968_s13 = smov 0   ;;  %s5970_s14 = smov 0  }
  0x14   :  { %s5972_s15 = smov 0   ;;  %s5974_s16 = smov 0  }
  0x15   :  { %s5976_s17 = smov 0   ;;  %s5978_s18 = smov 0  }
  0x16   :  { %s5980_s19 = smov 0  }
  0x17 LB: > { %7064 = sst [smem:[#allocation22_spill]] %s5850_s30  ;;  %s6014_s20 = sadd.s32 4294967295, %s5890_s19   ;;  %s5890_s19 = sphi %s5980_s19, %s30_s19   ;;  %s5886_s18 = sphi %s5978_s18, %s7119_s18   ;;  %s5882_s17 = sphi %s5976_s17, %s7118_s17   ;;  %s5878_s16 = sphi %s5974_s16, %s7117_s16   ;;  %s5874_s15 = sphi %s5972_s15, %s7116_s15   ;;  %s5870_s14 = sphi %s5970_s14, %s7115_s14   ;;  %s5866_s13 = sphi %s5968_s13, %s7114_s13   ;;  %s5862_s12 = sphi %s5966_s12, %s7113_s12   ;;  %s5858_s11 = sphi %s5964_s11, %s7112_s11   ;;  %s5854_s10 = sphi %s5962_s10, %s7111_s10   ;;  %s5850_s30 = sphi %s5960_s30, %s7110_s30  }
  0x18   : > { %7065 = sst [smem:[#allocation23_spill]] %s5854_s10  ;;  %s4026_s21 = sadd.s32 4294967294, %s5890_s19  }
  0x19   : > { %7066 = sst [smem:[#allocation24_spill]] %s5874_s15  ;;  %p62_p0 = scmp.ne.s32.totalorder %s5866_s13, %s5862_s12 }
  0x1a   : > { %7067 = sst [smem:[#allocation25_spill]] %s5878_s16  ;;  %p7046_p1 = scmp.eq.s32.totalorder %s6014_s20, 0 }
  0x1b   : > { %p260_p2 = scmp.ne.s32.totalorder %s5858_s11, %s5854_s10  ;;  %p261_p4 = scmp.eq.s32.totalorder %s6014_s20, 3 }
  0x1c   : > { %p6024_p3 = por %p7046_p1, %p62_p0  ;;  %p266_p5 = scmp.ne.s32.totalorder %s5854_s10, %s5850_s30 }
  0x1d   : > { %p267_p6 = scmp.eq.s32.totalorder %s4026_s21, 3  ;;  %p6031_p7 = por %p261_p4, %p260_p2 }
  0x1e   : > { %s7068_s23 = scalar_select %p6024_p3, 1, 0 }
  0x1f   : > { %s7069_s24 = scalar_select %p6031_p7, 1, 0 }
  0x20   : > { %p4027_p8 = scmp.ge.s32.totalorder %s5890_s19, 1  ;;  %p6036_p9 = por %p267_p6, %p266_p5 }
  0x21   : > { %7070 = sst [smem:[#allocation26_spill]] %s7069_s24  ;;  %p274_p10 = scmp.lt.s32.totalorder %s5890_s19, 5 }
  0x22   : > { %s7071_s25 = scalar_select %p6036_p9, 1, 0 }
  0x23   : > { %p6041_p11 = pnand %p4027_p8, %p274_p10  ;;  %s5892_s27 = smov [#allocation9]  }
  0x24   : > { %7072 = sst [smem:[#allocation27_spill]] %s7071_s25  ;;  %s286_s28 = sshll.u32 %s5892_s27, 4  ;;  %s6045_s28 = int_to_ptr.vmem [resolvable:$true] %s286_s28 }
  0x25   : > { %s7073_s26 = scalar_select %p6041_p11, 1, 0 }
  0x26   : > { %p5283_p12 = pneg %p6041_p11  ;;  %s5893_s12 = smov [#allocation10]  }
  0x27   : > { %s302_s21 = sshll.u32 %s5893_s12, 4  ;;  %s5894_s22 = smov [#allocation12]   ;;  %s6055_s21 = int_to_ptr.vmem [resolvable:$true] %s302_s21 }
  0x28   : > { %p6051_p13 = pnand %p5283_p12, %p7046_p1  ;;  %s6057_s25 = sshll.u32 %s5894_s22, 4  ;;  %s316_s25 = int_to_ptr.vmem [resolvable:$true] %s6057_s25 }
  0x29   : > { %s7075_s2 = sld [smem:[#allocation29_spill]] }
  0x2a   : > { %p6067_p2 = pneg %p6051_p13 }
  0x2f   : > { %s5580_s27 = scalar_lea.hbm %s7075_s2, 1024 }
  0x30   : > { %p5581_p0 = scmp.ne.s32.totalorder %s7075_s2, %s5580_s27  ;;  %p5587_p6 = scmp.lt.u32.totalorder %s5580_s27, %s7075_s2 }
  0x32   : > { %p5583_p4 = pnand %p6067_p2, %p5581_p0 }
  0x34   : > { %p5584_p5 = pneg %p5583_p4 }
  0x36   : > { %p5589_p8 = pnand %p5587_p6, %p5584_p5 }
  0x38   : > { %5592 = shalt.err (!%p5589_p8)
}
  0x39   : > { %s5593_s9 = scalar_lea.vmem %s6045_s28, 1024  ;;  %p5601_p9 = scmp.lt.s32.totalorder %s6045_s28, %s6045_s28 }
  0x3a   : > { %p5594_p10 = scmp.ne.s32.totalorder %s6045_s28, %s5593_s9  ;;  %p5602_p7 = scmp.lt.s32.totalorder %s5593_s9, %s5593_s9 }
  0x3c   : > { %p5596_p12 = pnand %p5594_p10, %p6067_p2  ;;  %p5603_p0 = por %p5602_p7, %p5601_p9 }
  0x3e   : > { %p5597_p1 = pneg %p5596_p12 }
  0x40   : > { %p5604_p4 = pnand %p5603_p0, %p5597_p1 }
  0x42   : > { %5607 = shalt.err (!%p5604_p4)
}
  0x43   : > { %s5895_s30 = smov 64   ;;  %s5896_s16 = smov 4  }
  0x44   : > { %5286 = dma.hbm_to_vmem [thread:$0]  (!%p6051_p13), %s7075_s2, 1024, %s6045_s28, [#allocation8], %s5895_s30, %s5895_s30, %s5896_s16  }
  0x45   : > { %s7077_s4 = sld [smem:[#allocation31_spill]] }
  0x4b   : > { %s5608_s9 = scalar_lea.hbm %s7077_s4, 9216 }
  0x4c   : > { %p5609_p1 = scmp.ne.s32.totalorder %s7077_s4, %s5608_s9  ;;  %p5615_p5 = scmp.lt.u32.totalorder %s5608_s9, %s7077_s4 }
  0x4e   : > { %p5611_p7 = pnand %p5609_p1, %p6067_p2 }
  0x50   : > { %p5612_p9 = pneg %p5611_p7 }
  0x52   : > { %p5617_p6 = pnand %p5615_p5, %p5612_p9 }
  0x54   : > { %5620 = shalt.err (!%p5617_p6)
}
  0x55   : > { %s5621_s28 = scalar_lea.vmem %s6055_s21, 9216  ;;  %p5629_p0 = scmp.lt.s32.totalorder %s6055_s21, %s6055_s21 }
  0x56   : > { %p5622_p8 = scmp.ne.s32.totalorder %s6055_s21, %s5621_s28  ;;  %p5630_p4 = scmp.lt.s32.totalorder %s5621_s28, %s5621_s28 }
  0x58   : > { %p5624_p10 = pnand %p5622_p8, %p6067_p2  ;;  %p5631_p1 = por %p5630_p4, %p5629_p0 }
  0x5a   : > { %p5625_p12 = pneg %p5624_p10 }
  0x5c   : > { %p5632_p7 = pnand %p5631_p1, %p5625_p12 }
  0x5e   : > { %5635 = shalt.err (!%p5632_p7)
}
  0x5f   : > { %5289 = dma.hbm_to_vmem [thread:$0]  (!%p6051_p13), %s7077_s4, 9216, %s6055_s21, [#allocation11], %s5895_s30, %s5895_s30, %s5896_s16  }
  0x60   : > { %s7078_s5 = sld [smem:[#allocation32_spill]] }
  0x66   : > { %s5636_s24 = scalar_lea.hbm %s7078_s5, 9216 }
  0x67   : > { %p5637_p9 = scmp.ne.s32.totalorder %s7078_s5, %s5636_s24  ;;  %p5643_p8 = scmp.lt.u32.totalorder %s5636_s24, %s7078_s5 }
  0x69   : > { %p5639_p5 = pnand %p5637_p9, %p6067_p2 }
  0x6b   : > { %p5640_p6 = pneg %p5639_p5 }
  0x6d   : > { %p5645_p10 = pnand %p5643_p8, %p5640_p6 }
  0x6f   : > { %5648 = shalt.err (!%p5645_p10)
}
  0x70   : > { %s5649_s28 = scalar_lea.vmem %s316_s25, 9216  ;;  %p5657_p1 = scmp.lt.s32.totalorder %s316_s25, %s316_s25 }
  0x71   : > { %p5650_p12 = scmp.ne.s32.totalorder %s316_s25, %s5649_s28  ;;  %p5658_p7 = scmp.lt.s32.totalorder %s5649_s28, %s5649_s28 }
  0x73   : > { %p5652_p0 = pnand %p5650_p12, %p6067_p2  ;;  %p5659_p3 = por %p5658_p7, %p5657_p1 }
  0x75   : > { %p5653_p4 = pneg %p5652_p0 }
  0x77   : > { %p5660_p11 = pnand %p5659_p3, %p5653_p4 }
  0x79   : > { %5663 = shalt.err (!%p5660_p11)
}
  0x7a   : > { %5292 = dma.hbm_to_vmem [thread:$0]  (!%p6051_p13), %s7078_s5, 9216, %s316_s25, [#allocation11], %s5895_s30, %s5895_s30, %s5896_s16  }
  0x7b   : > { %s5897_s6 = smov [#allocation13]   ;;  %s7079_s7 = sld [smem:[#allocation34_spill]] }
  0x7c   : > { %s331_s10 = sshll.u32 %s5897_s6, 4  ;;  %s332_s10 = int_to_ptr.vmem [resolvable:$true] %s331_s10 }
  0x81   : > { %s5664_s27 = scalar_lea.hbm %s7079_s7, 1024 }
  0x82   : > { %p5665_p3 = scmp.ne.s32.totalorder %s7079_s7, %s5664_s27  ;;  %p5671_p5 = scmp.lt.u32.totalorder %s5664_s27, %s7079_s7 }
  0x84   : > { %p5667_p11 = pnand %p5665_p3, %p6067_p2 }
  0x86   : > { %p5668_p9 = pneg %p5667_p11 }
  0x88   : > { %p5673_p6 = pnand %p5671_p5, %p5668_p9 }
  0x8a   : > { %5676 = shalt.err (!%p5673_p6)
}
  0x8b   : > { %s5677_s25 = scalar_lea.vmem %s332_s10, 1024  ;;  %p5685_p0 = scmp.lt.s32.totalorder %s332_s10, %s332_s10 }
  0x8c   : > { %p5678_p8 = scmp.ne.s32.totalorder %s332_s10, %s5677_s25  ;;  %p5686_p4 = scmp.lt.s32.totalorder %s5677_s25, %s5677_s25 }
  0x8e   : > { %p5680_p10 = pnand %p5678_p8, %p6067_p2  ;;  %p5687_p1 = por %p5686_p4, %p5685_p0 }
  0x90   : > { %p5681_p12 = pneg %p5680_p10 }
  0x92   : > { %p5688_p7 = pnand %p5687_p1, %p5681_p12 }
  0x94   : > { %5691 = shalt.err (!%p5688_p7)
}
  0x95   : > { %5295 = dma.hbm_to_vmem [thread:$0]  (!%p6051_p13), %s7079_s7, 1024, %s332_s10, [#allocation14], %s5895_s30, %s5895_s30, %s5896_s16  }
  0x96   : > { %s39_s8 = sadd.s32 1, %s5882_s17  ;;  %s42_s29 = sadd.s32 1, %s5886_s18 }
  0x97   : > { %p40_p2 = scmp.ge.s32.totalorder %s39_s8, 2  ;;  %s49_s6 = sadd.s32 1, %s5870_s14 }
  0x98   : > { %p56_p3 = scmp.ne.s32.totalorder %s5870_s14, %s5866_s13  ;;  %p57_p11 = scmp.eq.s32.totalorder %s5890_s19, 0 }
  0x99   : > { %s7121_s8 = smov (%p40_p2, %s39_s8), 0  ;;  %s7123_s29 = smov (!%p40_p2, %s42_s29), %s5886_s18 }
  0x9a   : > { %p6169_p9 = por %p57_p11, %p56_p3  ;;  %s246_s24 = ssub.s32 %s5882_s17, %s7121_s8 }
  0x9b   : > { %p44_p13 = scmp.ge.s32.totalorder %s7123_s29, 2  ;;  %p5311_p5 = scmp.lt.s32.totalorder %s5890_s19, 4 }
  0x9c   : > { %s6177_s30 = sand.u32 1, %s5870_s14   ;;  %s4236_s16 = sshll.u32 %s5886_s18, 10 }
  0x9d   : > { %s7125_s29 = smov (%p44_p13, %s7123_s29), 0  ;;  %s4033_s10 = sshll.u32 %s6177_s30, 6 }
  0x9e   : > { %s46_s27 = ssub.s32 %s5886_s18, %s7125_s29  ;;  %s7081_s0 = sld [smem:[#allocation28_spill]] }
  0x9f   : > { %p47_p6 = scmp.eq.s32.totalorder %s46_s27, 0  ;;  %s247_s12 = sor.u32 %s246_s24, %s46_s27 }
  0xa0   : > { %p248_p8 = scmp.eq.s32.totalorder %s247_s12, 0  ;;  %s7082_s21 = sadd.s32 1, %s5858_s11 }
  0xa1   : > { %s6191_s25 = scalar_select %p47_p6, %s5870_s14, %s49_s6  }
  0xa2   : > { %s6196_s3 = scalar_select %p248_p8, %s5858_s11, %s7082_s21  }
  0xa3   : > { %s352_s2 = scalar_lea.vmem [#allocation4], %s4033_s10  ;;  %p6202_p10 = pnand %p5311_p5, %p6169_p9 }
  0xa4   : > { %s6188_s28 = scalar_lea.hbm %s7081_s0, %s4236_s16  ;;  %s359_s4 = sshll.u32 %s352_s2, 4  ;;  %s6206_s4 = int_to_ptr.vmem [resolvable:$true] %s359_s4 }
  0xa5   : > { %s349_s16 = scalar_lea.sflag [#allocation5], %s6177_s30  ;;  %s5692_s27 = scalar_lea.hbm %s6188_s28, 1024 }
  0xa6   : > { %p5693_p12 = scmp.ne.s32.totalorder %s6188_s28, %s5692_s27  ;;  %p5694_p0 = pneg %p6202_p10 }
  0xa7   : > { %s5697_s15 = scalar_lea.hbm %s7081_s0, 2048  ;;  %p5698_p7 = scmp.lt.u32.totalorder %s6188_s28, %s7081_s0 }
  0xa8   : > { %p5695_p4 = pnand %p5694_p0, %p5693_p12  ;;  %p5699_p2 = scmp.lt.u32.totalorder %s5697_s15, %s5692_s27 }
  0xa9   : > { %p5701_p11 = scmp.lt.u32.totalorder %s5692_s27, %s6188_s28 }
  0xaa   : > { %p5696_p1 = pneg %p5695_p4  ;;  %p5700_p3 = por %p5699_p2, %p5698_p7 }
  0xac   : > { %p5702_p9 = por %p5701_p11, %p5700_p3 }
  0xae   : > { %p5703_p13 = pnand %p5702_p9, %p5696_p1 }
  0xb0   : > { %5706 = shalt.err (!%p5703_p13)
}
  0xb1   : > { %s5707_s22 = scalar_lea.vmem %s6206_s4, 1024  ;;  %s5898_s9 = smov [#allocation4]  }
  0xb2   : > { %p5708_p5 = scmp.ne.s32.totalorder %s6206_s4, %s5707_s22  ;;  %s5712_s21 = sshll.u32 %s5898_s9, 4  ;;  %s5713_s21 = int_to_ptr.vmem [resolvable:$false] %s5712_s21 }
  0xb3   : > { %s5714_s2 = scalar_lea.vmem %s5713_s21, 2048  ;;  %p5715_p12 = scmp.lt.s32.totalorder %s6206_s4, %s5713_s21 }
  0xb4   : > { %p5710_p6 = pnand %p5708_p5, %p5694_p0  ;;  %p5716_p4 = scmp.lt.s32.totalorder %s5714_s2, %s5707_s22 }
  0xb6   : > { %p5711_p8 = pneg %p5710_p6  ;;  %p5717_p7 = por %p5716_p4, %p5715_p12 }
  0xb8   : > { %p5718_p2 = pnand %p5717_p7, %p5711_p8 }
  0xba   : > { %5721 = shalt.err (!%p5718_p2)
}
  0xbb   : > { %s5899_s27 = smov 128   ;;  %s5900_s6 = smov 8  }
  0xbc   : > { %5299 = dma.hbm_to_vmem [thread:$0]  (!%p6202_p10), %s6188_s28, 1024, %s6206_s4, %s349_s16, %s5899_s27, %s5899_s27, %s5900_s6  }
  0xbd   : > { %s369_s15 = sand.u32 1, %s5890_s19   ;;  %s4036_s10 = sshll.u32 %s6177_s30, 8 }
  0xbe   : > { %s4237_s12 = sshll.u32 %s5886_s18, 12  ;;  %s373_s22 = scalar_lea.vmem [#allocation7], %s4036_s10 }
  0xbf   : > { %s380_s9 = sshll.u32 %s373_s22, 4  ;;  %s6245_s0 = scalar_lea.hbm %s7032_s1, %s4237_s12  ;;  %s6247_s9 = int_to_ptr.vmem [resolvable:$true] %s380_s9 }
  0xc0   : > { %s6249_s5 = scalar_lea.sflag [#allocation8], %s369_s15  ;;  %s5722_s7 = scalar_lea.hbm %s6245_s0, 4096 }
  0xc1   : > { %p5723_p1 = scmp.ne.s32.totalorder %s6245_s0, %s5722_s7  ;;  %s5727_s28 = scalar_lea.hbm %s7032_s1, 8192 }
  0xc2   : > { %p5728_p9 = scmp.lt.u32.totalorder %s6245_s0, %s7032_s1  ;;  %p5729_p13 = scmp.lt.u32.totalorder %s5727_s28, %s5722_s7 }
  0xc3   : > { %p5725_p3 = pnand %p5723_p1, %p5694_p0  ;;  %p5731_p6 = scmp.lt.u32.totalorder %s5722_s7, %s6245_s0 }
  0xc4   : > { %p5730_p5 = por %p5729_p13, %p5728_p9 }
  0xc5   : > { %p5726_p11 = pneg %p5725_p3 }
  0xc6   : > { %p5732_p8 = por %p5731_p6, %p5730_p5 }
  0xc8   : > { %p5733_p12 = pnand %p5732_p8, %p5726_p11 }
  0xca   : > { %5736 = shalt.err (!%p5733_p12)
}
  0xcb   : > { %s5737_s15 = scalar_lea.vmem %s6247_s9, 4096  ;;  %s5901_s12 = smov [#allocation7]  }
  0xcc   : > { %p5738_p4 = scmp.ne.s32.totalorder %s6247_s9, %s5737_s15  ;;  %s5742_s22 = sshll.u32 %s5901_s12, 4  ;;  %s5743_s22 = int_to_ptr.vmem [resolvable:$false] %s5742_s22 }
  0xcd   : > { %s5744_s21 = scalar_lea.vmem %s5743_s22, 8192  ;;  %p5745_p1 = scmp.lt.s32.totalorder %s6247_s9, %s5743_s22 }
  0xce   : > { %p5740_p7 = pnand %p5738_p4, %p5694_p0  ;;  %p5746_p3 = scmp.lt.s32.totalorder %s5744_s21, %s5737_s15 }
  0xd0   : > { %p5741_p2 = pneg %p5740_p7  ;;  %p5747_p9 = por %p5746_p3, %p5745_p1 }
  0xd2   : > { %p5748_p13 = pnand %p5747_p9, %p5741_p2 }
  0xd4   : > { %5751 = shalt.err (!%p5748_p13)
}
  0xd5   : > { %5302 = dma.hbm_to_vmem [thread:$0]  (!%p6202_p10), %s6245_s0, 4096, %s6247_s9, %s6249_s5, %s5899_s27, %s5899_s27, %s5900_s6  }
  0xd6   : > { %p7084_p0 = scmp.ne.s32.totalorder %s7073_s26, 0 }
  0xd7   : > { %s394_s7 = sand.u32 (!%p7084_p0), 1, %s5866_s13   ;;  %p7085_p11 = scmp.ne.s32.totalorder (!%p7084_p0), %s7068_s23, 0 }
  0xd8   : > { %392 = sbr.rel (%p7084_p0) target bundleno = 1854 (0x73e), region = 56  ;;  %s4040_s2 = sshll.u32 (!%p7084_p0), %s394_s7, 6 }
  0xd9   : > { %s395_s4 = scalar_lea.sflag (!%p7084_p0), [#allocation5], %s394_s7  ;;  %s6281_s30 = scalar_lea.vmem (!%p7084_p0), [#allocation4], %s4040_s2 }
  0xdf   : > { %5825 = dma.done.wait (%p7085_p11), %s395_s4, 1024  }
  0xe0   : > { %5827 = vsyncadd (%p7085_p11), %s395_s4, 4294966272  ;;  %s403_s24 = sand.u32 1, %s6014_s20   ;;  %s4041_s28 = sshll.u32 %s394_s7, 8 }
  0xe1   : > { %s404_s0 = scalar_lea.sflag [#allocation8], %s403_s24  ;;  %s6288_s5 = scalar_lea.vmem [#allocation7], %s4041_s28 }
  0xe2   : > { %5829 = dma.done.wait (%p7085_p11), %s404_s0, 4096  }
  0xe3   : > { %5831 = vsyncadd (%p7085_p11), %s404_s0, 4294963200  ;;  %p7086_p10 = scmp.eq.s32.totalorder %s6014_s20, 0 }
  0xe5   : > { %5833 = dma.done.wait (%p7086_p10), [#allocation8], 1024   ;;  %p7087_p5 = pmov %p7086_p10 }
  0xe7   : > { %5835 = vsyncadd (%p7087_p5), [#allocation8], 4294966272  ;;  %p7088_p6 = pmov %p7087_p5 }
  0xe8   : > { %p7089_p8 = pmov %p7087_p5 }
  0xe9   : > { %5837 = dma.done.wait (%p7088_p6), [#allocation11], 18432  }
  0xea   : > { %5839 = vsyncadd (%p7089_p8), [#allocation11], 4294948864  ;;  %p7090_p12 = pmov %p7087_p5 }
  0xeb   : > { %p7091_p4 = pmov %p7087_p5 }
  0xec   : > { %5841 = dma.done.wait (%p7090_p12), [#allocation14], 1024  }
  0xed   : > { %5843 = vsyncadd (%p7091_p4), [#allocation14], 4294966272  ;;  %s7092_s23 = sld [smem:[#allocation23_spill]]  ;;  %s7093_s26 = sld [smem:[#allocation24_spill]]  ;;  %v5902_v0 = vmov 0.0  }
  0xee   : > { %470 = vst [vmem:[#allocation2 + $0x18] sm:$0xff] %v5902_v0  ;;  %467 = vst [vmem:[#allocation2] sm:$0xff] %v5902_v0 }
  0xef   : > { %468 = vst [vmem:[#allocation2 + $0x8] sm:$0xff] %v5902_v0  ;;  %469 = vst [vmem:[#allocation2 + $0x10] sm:$0x3] %v5902_v0 }
  0xf0   : > { %471 = vst [vmem:[#allocation2 + $0x20] sm:$0xff] %v5902_v0  ;;  %472 = vst [vmem:[#allocation2 + $0x28] sm:$0x3] %v5902_v0 }
  0xf1   : > { %473 = vst [vmem:[#allocation2 + $0x30] sm:$0xff] %v5902_v0  ;;  %474 = vst [vmem:[#allocation2 + $0x38] sm:$0xff] %v5902_v0 }
  0xf2   : > { %475 = vst [vmem:[#allocation2 + $0x40] sm:$0x3] %v5902_v0  ;;  %476 = vst [vmem:[#allocation2 + $0x48] sm:$0xff] %v5902_v0 }
  0xf3   : > { %s460_s27 = sand.u32 1, %s7092_s23   ;;  %s4047_s6 = sshll.u32 %s7093_s26, 3  ;;  %477 = vst [vmem:[#allocation2 + $0x50] sm:$0xff] %v5902_v0  ;;  %478 = vst [vmem:[#allocation2 + $0x58] sm:$0x3] %v5902_v0 }
  0xf4   : > { %479 = vst [vmem:[#allocation2 + $0x60] sm:$0xff] %v5902_v0  ;;  %480 = vst [vmem:[#allocation2 + $0x68] sm:$0xff] %v5902_v0  ;;  %s4046_s20 = sshll.u32 %s460_s27, 7  ;;  %s4048_s9 = sshll.u32 %s7093_s26, 2 }
  0xf5   : > { %481 = vst [vmem:[#allocation2 + $0x70] sm:$0x3] %v5902_v0  ;;  %482 = vst [vmem:[#allocation2 + $0x78] sm:$0xff] %v5902_v0  ;;  %s4238_s16 = sshll.u32 %s7093_s26, 5  ;;  %s6319_s15 = scalar_lea.vmem [#allocation15], %s4046_s20 }
  0xf6   : > { %483 = vst [vmem:[#allocation2 + $0x80] sm:$0xff] %v5902_v0  ;;  %484 = vst [vmem:[#allocation2 + $0x88] sm:$0x3] %v5902_v0  ;;  %s6313_s10 = scalar_lea.vmem %s6281_s30, %s4238_s16 [#allocation4]  ;;  %p4050_p7 = scmp.le.s32.totalorder %s7093_s26, 0 }
  0xf7   : > { %485 = vst [vmem:[#allocation2 + $0x90] sm:$0xff] %v5902_v0  ;;  %486 = vst [vmem:[#allocation2 + $0x98] sm:$0xff] %v5902_v0  ;;  %v529_v1 = vld [vmem:[%s6313_s10] sm:$0xff]  ;;  %v530_v2 = vld [vmem:[%s6313_s10 + $0x8] sm:$0xff]  ;;  %s4051_s12 = sadd.s32 (!%p4050_p7), 4294967295, %s4048_s9 }
  0xf8   : > { %487 = vst [vmem:[#allocation2 + $0xa0] sm:$0x3] %v5902_v0  ;;  %488 = vst [vmem:[#allocation2 + $0xa8] sm:$0xff] %v5902_v0  ;;  %v531_v3 = vld [vmem:[%s6313_s10 + $0x10] sm:$0xff]  ;;  %v532_v4 = vld [vmem:[%s6313_s10 + $0x18] sm:$0xff]  ;;  %s4052_s22 = sshll.u32 (!%p4050_p7), %s4051_s12, 3 }
  0xf9   : > { %489 = vst [vmem:[#allocation2 + $0xb0] sm:$0xff] %v5902_v0  ;;  %490 = vst [vmem:[#allocation2 + $0xb8] sm:$0x3] %v5902_v0  ;;  %s572_s21 = scalar_lea.vmem (!%p4050_p7), %s6281_s30, %s4052_s22 [#allocation4] }
  0xfa   : > { %491 = vst [vmem:[#allocation2 + $0xc0] sm:$0xff] %v5902_v0  ;;  %492 = vst [vmem:[#allocation2 + $0xc8] sm:$0xff] %v5902_v0  ;;  %v573_v5 = vld [vmem:[%s572_s21] sm:$0xff] (!%p4050_p7) }
  0xfb   : > { %493 = vst [vmem:[#allocation2 + $0xd0] sm:$0x3] %v5902_v0  ;;  %494 = vst [vmem:[#allocation2 + $0xd8] sm:$0xff] %v5902_v0 }
  0xfc   : > { %495 = vst [vmem:[#allocation2 + $0xe0] sm:$0xff] %v5902_v0  ;;  %496 = vst [vmem:[#allocation2 + $0xe8] sm:$0x3] %v5902_v0 }
  0xfd   : > { %497 = vst [vmem:[#allocation3] sm:$0xff] %v5902_v0  ;;  %498 = vst [vmem:[#allocation3 + $0x8] sm:$0xff] %v5902_v0 }
  0xfe   : > { %499 = vst [vmem:[#allocation3 + $0x10] sm:$0x3] %v5902_v0  ;;  %500 = vst [vmem:[#allocation3 + $0x18] sm:$0xff] %v5902_v0 }
  0xff   : > { %501 = vst [vmem:[#allocation3 + $0x20] sm:$0xff] %v5902_v0  ;;  %502 = vst [vmem:[#allocation3 + $0x28] sm:$0x3] %v5902_v0 }
 0x100   : > { %503 = vst [vmem:[#allocation3 + $0x30] sm:$0xff] %v5902_v0  ;;  %504 = vst [vmem:[#allocation3 + $0x38] sm:$0xff] %v5902_v0 }
 0x101   : > { %505 = vst [vmem:[#allocation3 + $0x40] sm:$0x3] %v5902_v0  ;;  %506 = vst [vmem:[#allocation3 + $0x48] sm:$0xff] %v5902_v0 }
 0x102   : > { %507 = vst [vmem:[#allocation3 + $0x50] sm:$0xff] %v5902_v0  ;;  %508 = vst [vmem:[#allocation3 + $0x58] sm:$0x3] %v5902_v0 }
 0x103   : > { %509 = vst [vmem:[#allocation3 + $0x60] sm:$0xff] %v5902_v0  ;;  %510 = vst [vmem:[#allocation3 + $0x68] sm:$0xff] %v5902_v0 }
 0x104   : > { %511 = vst [vmem:[#allocation3 + $0x70] sm:$0x3] %v5902_v0  ;;  %512 = vst [vmem:[#allocation3 + $0x78] sm:$0xff] %v5902_v0 }
 0x105   : > { %513 = vst [vmem:[#allocation3 + $0x80] sm:$0xff] %v5902_v0  ;;  %514 = vst [vmem:[#allocation3 + $0x88] sm:$0x3] %v5902_v0 }
 0x106   : > { %515 = vst [vmem:[#allocation3 + $0x90] sm:$0xff] %v5902_v0  ;;  %516 = vst [vmem:[#allocation3 + $0x98] sm:$0xff] %v5902_v0 }
 0x107   : > { %517 = vst [vmem:[#allocation3 + $0xa0] sm:$0x3] %v5902_v0  ;;  %518 = vst [vmem:[#allocation3 + $0xa8] sm:$0xff] %v5902_v0 }
 0x108   : > { %519 = vst [vmem:[#allocation3 + $0xb0] sm:$0xff] %v5902_v0  ;;  %520 = vst [vmem:[#allocation3 + $0xb8] sm:$0x3] %v5902_v0 }
 0x109   : > { %521 = vst [vmem:[#allocation3 + $0xc0] sm:$0xff] %v5902_v0  ;;  %522 = vst [vmem:[#allocation3 + $0xc8] sm:$0xff] %v5902_v0 }
 0x10a   : > { %523 = vst [vmem:[#allocation3 + $0xd0] sm:$0x3] %v5902_v0  ;;  %524 = vst [vmem:[#allocation3 + $0xd8] sm:$0xff] %v5902_v0 }
 0x10b   : > { %525 = vst [vmem:[#allocation3 + $0xe0] sm:$0xff] %v5902_v0  ;;  %526 = vst [vmem:[#allocation3 + $0xe8] sm:$0x3] %v5902_v0 }
 0x10c   : > { %535 = vst [vmem:[#allocation2 + $0x19] ss:$2 sm:$0xff] %v529_v1  ;;  %537 = vst [vmem:[#allocation2 + $0x31] ss:$2 sm:$0xff] %v529_v1 }
 0x10d   : > { %551 = vst [vmem:[#allocation2 + $0x1a] ss:$2 sm:$0xff] %v529_v1  ;;  %553 = vst [vmem:[#allocation2 + $0x32] ss:$2 sm:$0xff] %v529_v1  ;;  %569 = sbr.rel (%p4050_p7) target bundleno = 277 (0x115), region = 84 }
 0x10e   : > { %539 = vst [vmem:[#allocation2 + $0x49] ss:$2 sm:$0xff] %v530_v2  ;;  %541 = vst [vmem:[#allocation2 + $0x61] ss:$2 sm:$0xff] %v530_v2 }
 0x10f   : > { %555 = vst [vmem:[#allocation2 + $0x4a] ss:$2 sm:$0xff] %v530_v2  ;;  %557 = vst [vmem:[#allocation2 + $0x62] ss:$2 sm:$0xff] %v530_v2 }
 0x110   : > { %543 = vst [vmem:[#allocation2 + $0x79] ss:$2 sm:$0xff] %v531_v3  ;;  %545 = vst [vmem:[#allocation2 + $0x91] ss:$2 sm:$0xff] %v531_v3 }
 0x111   : > { %559 = vst [vmem:[#allocation2 + $0x7a] ss:$2 sm:$0xff] %v531_v3  ;;  %561 = vst [vmem:[#allocation2 + $0x92] ss:$2 sm:$0xff] %v531_v3 }
 0x112   : > { %547 = vst [vmem:[#allocation2 + $0xa9] ss:$2 sm:$0xff] %v532_v4  ;;  %549 = vst [vmem:[#allocation2 + $0xc1] ss:$2 sm:$0xff] %v532_v4 }
 0x113   : > { %563 = vst [vmem:[#allocation2 + $0xaa] ss:$2 sm:$0xff] %v532_v4  ;;  %565 = vst [vmem:[#allocation2 + $0xc2] ss:$2 sm:$0xff] %v532_v4 }
 0x114   : > { %575 = vst [vmem:[#allocation2 + $0x1] ss:$2 sm:$0xff] %v573_v5  ;;  %577 = vst [vmem:[#allocation2 + $0x2] ss:$2 sm:$0xff] %v573_v5 }
 0x115 PF: > { %s7094_s7 = sld [smem:[#allocation24_spill]] }
 0x11b   : > { %p4053_p2 = scmp.ge.s32.totalorder %s7094_s7, 1 }
 0x11c   : > { %v4056_v6 = vld [vmem:[%s6313_s10 + $0x20] sm:$0xff] (!%p4053_p2) }
 0x11d   : > { %581 = sbr.rel (%p4053_p2) target bundleno = 292 (0x124), region = 88  ;;  %588 = vst [vmem:[#allocation2 + $0xd9] ss:$2 sm:$0xff] (!%p4053_p2), %v4056_v6  ;;  %590 = vst [vmem:[#allocation2 + $0xda] ss:$2 sm:$0xff] (!%p4053_p2), %v4056_v6 }
 0x124 PF: > { %v6329_v7 = vld [vmem:[#allocation9] sm:$0xff]   ;;  %s7095_s2 = sld [smem:[#allocation24_spill]]  ;;  %v6331_v8 = vld [vmem:[#allocation9 + $0x8] sm:$0xff]   ;;  %v6340_v9 = vld [vmem:[#allocation9 + $0x10] sm:$0xff]   ;;  %s7096_s0 = sld [smem:[#allocation30_spill]] }
 0x125   : > { %4773 = vmatprep.subr.bf16.mxu0 %v6329_v7  ;;  %5069 = vmatprep.subr.bf16.mxu1 %v6329_v7  ;;  %v6347_v10 = vld [vmem:[#allocation9 + $0x18] sm:$0xff]   ;;  %v6359_v17 = vld [vmem:[#allocation9 + $0x20] sm:$0xff]   ;;  %v6365_v18 = vld [vmem:[#allocation9 + $0x28] sm:$0xff]   ;;  %s4068_s26 = sadd.s32 (!%p4050_p7), 4294967295, %s4047_s6 }
 0x126   : > { %4774 = vmatpush3.bf16.msra.mxu0 %v6329_v7  ;;  %5077 = vmatpush3.bf16.msra.mxu1 %v6329_v7  ;;  %v6371_v19 = vld [vmem:[#allocation9 + $0x30] sm:$0xff]   ;;  %v6377_v20 = vld [vmem:[#allocation9 + $0x38] sm:$0xff]   ;;  %s4069_s20 = sshll.u32 (!%p4050_p7), %s4068_s26, 4 }
 0x127   : > { %4775 = vmatprep.subr.bf16.mxu0 %v6331_v8  ;;  %5070 = vmatprep.subr.bf16.mxu1 %v6331_v8  ;;  %s855_s9 = scalar_lea.vmem (!%p4050_p7), %s6288_s5, %s4069_s20 [#allocation7] }
 0x12a   : > { %s4240_s4 = sshll.u32 %s7095_s2, 7  ;;  %4776 = vmatpush3.bf16.msra.mxu0 %v6331_v8  ;;  %5078 = vmatpush3.bf16.msra.mxu1 %v6331_v8  ;;  %v6400_v39 = vld [vmem:[%s7096_s0] ss:$0 sm:$0xff] }
 0x12b   : > { %s6343_s30 = scalar_lea.vmem %s6288_s5, %s4240_s4 [#allocation7]  ;;  %4777 = vmatprep.subr.bf16.mxu0 %v6340_v9  ;;  %5071 = vmatprep.subr.bf16.mxu1 %v6340_v9 }
 0x12c   : > { %v610_v11 = vld [vmem:[%s6343_s30] sm:$0xff]  ;;  %v611_v12 = vld [vmem:[%s6343_s30 + $0x8] sm:$0xff]  ;;  %v612_v21 = vld [vmem:[%s6343_s30 + $0x10] sm:$0xff] }
 0x12d   : > { %v618_v13 = vld [vmem:[%s6343_s30 + $0x40] sm:$0xff]  ;;  %v626_v14 = vpack.c.bf16 %v611_v12, %v610_v11  ;;  %v619_v15 = vld [vmem:[%s6343_s30 + $0x48] sm:$0xff]  ;;  %v613_v22 = vld [vmem:[%s6343_s30 + $0x18] sm:$0xff] }
 0x12e   : > { %v630_v16 = vpack.c.bf16 %v619_v15, %v618_v13  ;;  %4778 = vmatpush3.bf16.msra.mxu0 %v6340_v9  ;;  %5079 = vmatpush3.bf16.msra.mxu1 %v6340_v9  ;;  %v620_v23 = vld [vmem:[%s6343_s30 + $0x50] sm:$0xff]  ;;  %v621_v24 = vld [vmem:[%s6343_s30 + $0x58] sm:$0xff]  ;;  %v614_v25 = vld [vmem:[%s6343_s30 + $0x20] sm:$0xff]  ;;  %v627_v29 = vpack.c.bf16 %v613_v22, %v612_v21 }
 0x12f   : > { %4779 = vmatprep.subr.bf16.mxu0 %v6347_v10  ;;  %5072 = vmatprep.subr.bf16.mxu1 %v6347_v10  ;;  %v615_v26 = vld [vmem:[%s6343_s30 + $0x28] sm:$0xff]  ;;  %v622_v27 = vld [vmem:[%s6343_s30 + $0x60] sm:$0xff]  ;;  %v631_v30 = vpack.c.bf16 %v621_v24, %v620_v23  ;;  %v616_v33 = vld [vmem:[%s6343_s30 + $0x30] sm:$0xff] }
 0x130   : > { %4789 = vmatprep.mubr.bf16.mxu0 %v626_v14  ;;  %4797 = vmatprep.mubr.bf16.mxu1 %v630_v16  ;;  %v623_v28 = vld [vmem:[%s6343_s30 + $0x68] sm:$0xff]  ;;  %v628_v31 = vpack.c.bf16 %v615_v26, %v614_v25  ;;  %v617_v34 = vld [vmem:[%s6343_s30 + $0x38] sm:$0xff]  ;;  %v624_v35 = vld [vmem:[%s6343_s30 + $0x70] sm:$0xff] }
 0x131   : > { %v632_v32 = vpack.c.bf16 %v623_v28, %v622_v27  ;;  %v625_v36 = vld [vmem:[%s6343_s30 + $0x78] sm:$0xff]  ;;  %v629_v37 = vpack.c.bf16 %v617_v34, %v616_v33 }
 0x132   : > { %4780 = vmatpush3.bf16.msra.mxu0 %v6347_v10  ;;  %5080 = vmatpush3.bf16.msra.mxu1 %v6347_v10  ;;  %v633_v38 = vpack.c.bf16 %v625_v36, %v624_v35 }
 0x133   : > { %4781 = vmatprep.subr.bf16.mxu0 %v6359_v17  ;;  %5073 = vmatprep.subr.bf16.mxu1 %v6359_v17 }
 0x136   : > { %4782 = vmatpush3.bf16.msra.mxu0 %v6359_v17  ;;  %5081 = vmatpush3.bf16.msra.mxu1 %v6359_v17 }
 0x137   : > { %4783 = vmatprep.subr.bf16.mxu0 %v6365_v18  ;;  %5074 = vmatprep.subr.bf16.mxu1 %v6365_v18 }
 0x13a   : > { %4784 = vmatpush3.bf16.msra.mxu0 %v6365_v18  ;;  %5082 = vmatpush3.bf16.msra.mxu1 %v6365_v18 }
 0x13b   : > { %4785 = vmatprep.subr.bf16.mxu0 %v6371_v19  ;;  %5075 = vmatprep.subr.bf16.mxu1 %v6371_v19 }
 0x13e   : > { %4786 = vmatpush3.bf16.msra.mxu0 %v6371_v19  ;;  %5083 = vmatpush3.bf16.msra.mxu1 %v6371_v19 }
 0x13f   : > { %4787 = vmatprep.subr.bf16.mxu0 %v6377_v20  ;;  %5076 = vmatprep.subr.bf16.mxu1 %v6377_v20 }
 0x142   : > { %4788 = vmatpush3.bf16.msra.mxu0 %v6377_v20  ;;  %5084 = vmatpush3.bf16.msra.mxu1 %v6377_v20 }
 0x145   : > { %4790 = vmatmul.mubr.bf16.vlgmr.msra.gmra.mrb[0].mxu0 %v627_v29  ;;  %4798 = vmatmul.mubr.bf16.vlgmr.msra.gmra.mrb[0].mxu1 %v631_v30 }
 0x146   : > { %4793 = vmatprep.mubr.bf16.mxu0 %v628_v31  ;;  %4801 = vmatprep.mubr.bf16.mxu1 %v632_v32 }
 0x14d   : > { %4794 = vmatmul.mubr.bf16.gmra.mrb[4].mxu0 %v629_v37  ;;  %4802 = vmatmul.mubr.bf16.gmra.mrb[4].mxu1 %v633_v38 }
 0x218   : > { %v4791_v40 = vpop.f32.mrb[0].mxu0  ;;  %v4799_v41 = vpop.f32.mrb[0].mxu1 }
 0x219   : > { %v731_v42 = vadd.f32 %v4791_v40, %v6400_v39  ;;  %v763_v43 = vadd.f32 %v4799_v41, %v6400_v39  ;;  %v722_v44 = vpop.f32.mrb[1].mxu0  ;;  %v754_v45 = vpop.f32.mrb[1].mxu1 }
 0x21a   : > { %v723_v46 = vadd.f32 %v6400_v39, %v722_v44  ;;  %v755_v47 = vadd.f32 %v6400_v39, %v754_v45  ;;  %v4792_v48 = vpop.f32.mrb[2].mxu0  ;;  %v4800_v49 = vpop.f32.mrb[2].mxu1 }
 0x21b   : > { %vm787_vm0 = vcmp.ge.f32.partialorder %v731_v42, 0.0  ;;  %v803_v50 = vmul.f32 0.2, %v731_v42  ;;  %vm795_vm1 = vcmp.ge.f32.partialorder %v763_v43, 0.0  ;;  %v811_v51 = vmul.f32 0.2, %v763_v43 }
 0x21c   : > { %vm785_vm2 = vcmp.ge.f32.partialorder %v723_v46, 0.0  ;;  %v801_v52 = vmul.f32 0.2, %v723_v46  ;;  %vm793_vm3 = vcmp.ge.f32.partialorder %v755_v47, 0.0  ;;  %v809_v53 = vmul.f32 0.2, %v755_v47 }
 0x21d   : > { %v819_v54 = vsel %vm787_vm0, %v731_v42, %v803_v50  ;;  %v827_v55 = vsel %vm795_vm1, %v763_v43, %v811_v51  ;;  %v734_v56 = vadd.f32 %v4792_v48, %v6400_v39  ;;  %v766_v57 = vadd.f32 %v4800_v49, %v6400_v39  ;;  %v725_v58 = vpop.f32.mrb[3].mxu0  ;;  %v757_v59 = vpop.f32.mrb[3].mxu1  ;;  %v856_v50 = vld [vmem:[%s855_s9] sm:$0xff] (!%p4050_p7)  ;;  %v857_v51 = vld [vmem:[%s855_s9 + $0x8] sm:$0xff] (!%p4050_p7) }
 0x21e   : > { %836 = vst [vmem:[#allocation3 + $0x31] sm:$0xff] %v819_v54  ;;  %844 = vst [vmem:[#allocation3 + $0x91] sm:$0xff] %v827_v55  ;;  %v817_v60 = vsel %vm785_vm2, %v723_v46, %v801_v52  ;;  %v825_v61 = vsel %vm793_vm3, %v755_v47, %v809_v53  ;;  %v726_v62 = vadd.f32 %v6400_v39, %v725_v58  ;;  %v5903_v49 = vmov (!%p4050_p7), 0.0  }
 0x21f   : > { %v758_v63 = vadd.f32 %v6400_v39, %v757_v59  ;;  %834 = vst [vmem:[#allocation3 + $0x19] sm:$0xff] %v817_v60  ;;  %842 = vst [vmem:[#allocation3 + $0x79] sm:$0xff] %v825_v61  ;;  %vm788_vm4 = vcmp.ge.f32.partialorder %v734_v56, 0.0  ;;  %v804_v0 = vmul.f32 0.2, %v734_v56  ;;  %vm796_vm5 = vcmp.ge.f32.partialorder %v766_v57, 0.0  ;;  %4805 = vmatprep.subr.bf16.mxu0 (!%p4050_p7), %v5903_v49 }
 0x220   : > { %v812_v1 = vmul.f32 0.2, %v766_v57  ;;  %vm786_vm6 = vcmp.ge.f32.partialorder %v726_v62, 0.0  ;;  %v802_v2 = vmul.f32 0.2, %v726_v62  ;;  %v4795_v6 = vpop.f32.mrb[4].mxu0  ;;  %4806 = vmatpush3.bf16.msra.mxu0 (!%p4050_p7), %v6329_v7  ;;  %v858_v52 = vpack.c.bf16 (!%p4050_p7), %v857_v51, %v856_v50 }
 0x221   : > { %vm794_vm7 = vcmp.ge.f32.partialorder %v758_v63, 0.0  ;;  %v810_v3 = vmul.f32 0.2, %v758_v63  ;;  %v820_v4 = vsel %vm788_vm4, %v734_v56, %v804_v0  ;;  %v4803_v11 = vpop.f32.mrb[4].mxu1  ;;  %v747_v14 = vadd.f32 %v4795_v6, %v6400_v39  ;;  %v738_v16 = vpop.f32.mrb[5].mxu0  ;;  %4807 = vmatprep.subr.bf16.mxu0 (!%p4050_p7), %v5903_v49 }
 0x222   : > { %v828_v5 = vsel %vm796_vm5, %v766_v57, %v812_v1  ;;  %837 = vst [vmem:[#allocation3 + $0x39] sm:$0xff] %v820_v4  ;;  %v818_v12 = vsel %vm786_vm6, %v726_v62, %v802_v2  ;;  %v779_v15 = vadd.f32 %v4803_v11, %v6400_v39  ;;  %v770_v21 = vpop.f32.mrb[5].mxu1  ;;  %v739_v22 = vadd.f32 %v6400_v39, %v738_v16  ;;  %v4796_v24 = vpop.f32.mrb[6].mxu0 }
 0x223   : > { %845 = vst [vmem:[#allocation3 + $0x99] sm:$0xff] %v828_v5  ;;  %v826_v13 = vsel %vm794_vm7, %v758_v63, %v810_v3  ;;  %835 = vst [vmem:[#allocation3 + $0x21] sm:$0xff] %v818_v12  ;;  %v771_v23 = vadd.f32 %v6400_v39, %v770_v21  ;;  %v4804_v25 = vpop.f32.mrb[6].mxu1  ;;  %vm791_vm8 = vcmp.ge.f32.partialorder %v747_v14, 0.0  ;;  %v807_v26 = vmul.f32 0.2, %v747_v14 }
 0x224   : > { %843 = vst [vmem:[#allocation3 + $0x81] sm:$0xff] %v826_v13  ;;  %vm799_vm9 = vcmp.ge.f32.partialorder %v779_v15, 0.0  ;;  %v815_v27 = vmul.f32 0.2, %v779_v15  ;;  %vm789_vm10 = vcmp.ge.f32.partialorder %v739_v22, 0.0  ;;  %v750_v32 = vadd.f32 %v4796_v24, %v6400_v39  ;;  %v741_v34 = vpop.f32.mrb[7].mxu0  ;;  %4808 = vmatpush3.bf16.msra.mxu0 (!%p4050_p7), %v6331_v8 }
 0x225   : > { %v805_v28 = vmul.f32 0.2, %v739_v22  ;;  %vm797_vm11 = vcmp.ge.f32.partialorder %v771_v23, 0.0  ;;  %v813_v29 = vmul.f32 0.2, %v771_v23  ;;  %v823_v30 = vsel %vm791_vm8, %v747_v14, %v807_v26  ;;  %v773_v35 = vpop.f32.mrb[7].mxu1  ;;  %4809 = vmatprep.subr.bf16.mxu0 (!%p4050_p7), %v5903_v49 }
 0x226   : > { %v831_v31 = vsel %vm799_vm9, %v779_v15, %v815_v27  ;;  %v782_v33 = vadd.f32 %v4804_v25, %v6400_v39  ;;  %840 = vst [vmem:[#allocation3 + $0x61] sm:$0xff] %v823_v30  ;;  %v742_v38 = vadd.f32 %v6400_v39, %v741_v34  ;;  %v774_v40 = vadd.f32 %v6400_v39, %v773_v35  ;;  %852 = sbr.rel (%p4050_p7) target bundleno = 795 (0x31b), region = 92 }
 0x227   : > { %848 = vst [vmem:[#allocation3 + $0xc1] sm:$0xff] %v831_v31  ;;  %v821_v36 = vsel %vm789_vm10, %v739_v22, %v805_v28  ;;  %v829_v37 = vsel %vm797_vm11, %v771_v23, %v813_v29  ;;  %vm792_vm12 = vcmp.ge.f32.partialorder %v750_v32, 0.0  ;;  %v808_v41 = vmul.f32 0.2, %v750_v32 }
 0x228   : > { %838 = vst [vmem:[#allocation3 + $0x49] sm:$0xff] %v821_v36  ;;  %846 = vst [vmem:[#allocation3 + $0xa9] sm:$0xff] %v829_v37  ;;  %vm800_vm13 = vcmp.ge.f32.partialorder %v782_v33, 0.0  ;;  %v816_v42 = vmul.f32 0.2, %v782_v33  ;;  %vm790_vm14 = vcmp.ge.f32.partialorder %v742_v38, 0.0  ;;  %4810 = vmatpush3.bf16.msra.mxu0 (!%p4050_p7), %v6340_v9 }
 0x229   : > { %v806_v43 = vmul.f32 0.2, %v742_v38  ;;  %vm798_vm15 = vcmp.ge.f32.partialorder %v774_v40, 0.0  ;;  %v814_v44 = vmul.f32 0.2, %v774_v40  ;;  %v824_v45 = vsel %vm792_vm12, %v750_v32, %v808_v41  ;;  %4811 = vmatprep.subr.bf16.mxu0 (!%p4050_p7), %v5903_v49 }
 0x22a   : > { %v832_v46 = vsel %vm800_vm13, %v782_v33, %v816_v42  ;;  %841 = vst [vmem:[#allocation3 + $0x69] sm:$0xff] %v824_v45  ;;  %vm5904_vm0 = vmmov (!%p4050_p7), 0  }
 0x22b   : > { %849 = vst [vmem:[#allocation3 + $0xc9] sm:$0xff] %v832_v46  ;;  %v822_v47 = vsel %vm790_vm14, %v742_v38, %v806_v43  ;;  %v830_v48 = vsel %vm798_vm15, %v774_v40, %v814_v44  ;;  %4821 = vmatprep.mubr.msk.bf16.mxu0 (!%p4050_p7), %vm5904_vm0, %v5903_v49 }
 0x22c   : > { %839 = vst [vmem:[#allocation3 + $0x51] sm:$0xff] %v822_v47  ;;  %847 = vst [vmem:[#allocation3 + $0xb1] sm:$0xff] %v830_v48  ;;  %4812 = vmatpush3.bf16.msra.mxu0 (!%p4050_p7), %v6347_v10 }
 0x22d   : > { %4813 = vmatprep.subr.bf16.mxu0 %v5903_v49 }
 0x230   : > { %4814 = vmatpush3.bf16.msra.mxu0 %v6359_v17 }
 0x231   : > { %4815 = vmatprep.subr.bf16.mxu0 %v5903_v49 }
 0x234   : > { %4816 = vmatpush3.bf16.msra.mxu0 %v6365_v18 }
 0x235   : > { %4817 = vmatprep.subr.bf16.mxu0 %v5903_v49 }
 0x238   : > { %4818 = vmatpush3.bf16.msra.mxu0 %v6371_v19 }
 0x239   : > { %4819 = vmatprep.subr.bf16.mxu0 %v5903_v49 }
 0x23c   : > { %4820 = vmatpush3.bf16.msra.mxu0 %v6377_v20 }
 0x23f   : > { %4822 = vmatmul.mubr.bf16.vlgmr.msra.gmra.mrb[0].mxu0 %v858_v52 }
 0x312   : > { %v893_v53 = vpop.f32.mrb[0].mxu0 }
 0x313   : > { %v894_v54 = vadd.f32 %v6400_v39, %v893_v53  ;;  %v4823_v55 = vpop.f32.mrb[1].mxu0 }
 0x314   : > { %v896_v56 = vpop.f32.mrb[2].mxu0 }
 0x315   : > { %vm900_vm1 = vcmp.ge.f32.partialorder %v894_v54, 0.0  ;;  %v902_v57 = vmul.f32 0.2, %v894_v54  ;;  %v897_v58 = vadd.f32 %v6400_v39, %v896_v56  ;;  %v4824_v59 = vpop.f32.mrb[3].mxu0 }
 0x317   : > { %v904_v60 = vsel %vm900_vm1, %v894_v54, %v902_v57  ;;  %vm901_vm2 = vcmp.ge.f32.partialorder %v897_v58, 0.0  ;;  %v903_v61 = vmul.f32 0.2, %v897_v58 }
 0x318   : > { %906 = vst [vmem:[#allocation3 + $0x1] sm:$0xff] %v904_v60 }
 0x319   : > { %v905_v62 = vsel %vm901_vm2, %v897_v58, %v903_v61 }
 0x31a   : > { %907 = vst [vmem:[#allocation3 + $0x9] sm:$0xff] %v905_v62 }
 0x31b PF: > { %910 = sbr.rel (%p4053_p2) target bundleno = 1048 (0x418), region = 96  ;;  %v5905_v63 = vmov (!%p4053_p2), 0.0   ;;  %vm5906_vm3 = vmmov (!%p4053_p2), 0   ;;  %v4073_v0 = vld [vmem:[%s6343_s30 + $0x80] sm:$0xff] (!%p4053_p2) }
 0x31c   : > { %4825 = vmatprep.subr.bf16.mxu0 (!%p4053_p2), %v5905_v63  ;;  %4841 = vmatprep.mubr.msk.bf16.mxu0 (!%p4053_p2), %vm5906_vm3, %v5905_v63 }
 0x31d   : > { %4826 = vmatpush3.bf16.msra.mxu0 (!%p4053_p2), %v6329_v7  ;;  %v4074_v7 = vld [vmem:[%s6343_s30 + $0x88] sm:$0xff] (!%p4053_p2) }
 0x31e   : > { %4827 = vmatprep.subr.bf16.mxu0 (!%p4053_p2), %v5905_v63  ;;  %v916_v1 = vpack.c.bf16 (!%p4053_p2), %v4074_v7, %v4073_v0 }
 0x321   : > { %4828 = vmatpush3.bf16.msra.mxu0 (!%p4053_p2), %v6331_v8 }
 0x322   : > { %4829 = vmatprep.subr.bf16.mxu0 %v5905_v63 }
 0x325   : > { %4830 = vmatpush3.bf16.msra.mxu0 %v6340_v9 }
 0x326   : > { %4831 = vmatprep.subr.bf16.mxu0 %v5905_v63 }
 0x329   : > { %4832 = vmatpush3.bf16.msra.mxu0 %v6347_v10 }
 0x32a   : > { %4833 = vmatprep.subr.bf16.mxu0 %v5905_v63 }
 0x32d   : > { %4834 = vmatpush3.bf16.msra.mxu0 %v6359_v17 }
 0x32e   : > { %4835 = vmatprep.subr.bf16.mxu0 %v5905_v63 }
 0x331   : > { %4836 = vmatpush3.bf16.msra.mxu0 %v6365_v18 }
 0x332   : > { %4837 = vmatprep.subr.bf16.mxu0 %v5905_v63 }
 0x335   : > { %4838 = vmatpush3.bf16.msra.mxu0 %v6371_v19 }
 0x336   : > { %4839 = vmatprep.subr.bf16.mxu0 %v5905_v63 }
 0x339   : > { %4840 = vmatpush3.bf16.msra.mxu0 %v6377_v20 }
 0x33c   : > { %4842 = vmatmul.mubr.bf16.vlgmr.msra.gmra.mrb[0].mxu0 %v916_v1 }
 0x40f   : > { %v951_v8 = vpop.f32.mrb[0].mxu0 }
 0x410   : > { %v952_v9 = vadd.f32 %v6400_v39, %v951_v8  ;;  %v4843_v10 = vpop.f32.mrb[1].mxu0 }
 0x411   : > { %v954_v2 = vpop.f32.mrb[2].mxu0 }
 0x412   : > { %vm958_vm4 = vcmp.ge.f32.partialorder %v952_v9, 0.0  ;;  %v960_v17 = vmul.f32 0.2, %v952_v9  ;;  %v955_v3 = vadd.f32 %v6400_v39, %v954_v2  ;;  %v4844_v18 = vpop.f32.mrb[3].mxu0 }
 0x414   : > { %v962_v4 = vsel %vm958_vm4, %v952_v9, %v960_v17  ;;  %vm959_vm5 = vcmp.ge.f32.partialorder %v955_v3, 0.0  ;;  %v961_v19 = vmul.f32 0.2, %v955_v3 }
 0x415   : > { %965 = vst [vmem:[#allocation3 + $0xd9] sm:$0xff] %v962_v4 }
 0x416   : > { %v963_v5 = vsel %vm959_vm5, %v955_v3, %v961_v19 }
 0x417   : > { %966 = vst [vmem:[#allocation3 + $0xe1] sm:$0xff] %v963_v5 }
 0x418 PF: > { %v5428_v6 = vld [vmem:[#allocation10 + $0x100] sm:$0xff]   ;;  %v5431_v12 = vld [vmem:[#allocation10 + $0x108] sm:$0xff]   ;;  %v5434_v39 = vld [vmem:[#allocation10 + $0x110] sm:$0xff]   ;;  %s7099_s10 = sld [smem:[#allocation33_spill]]  ;;  %s7100_s21 = sld [smem:[#allocation35_spill]] }
 0x419   : > { %v5429_v20 = vld [vmem:[#allocation10 + $0x140] sm:$0xff]   ;;  %4277 = vmatprep.subr.bf16.mxu0 %v5428_v6  ;;  %v5432_v13 = vld [vmem:[#allocation10 + $0x148] sm:$0xff]   ;;  %v5435_v15 = vld [vmem:[#allocation10 + $0x150] sm:$0xff]   ;;  %s7101_s7 = sld [smem:[#allocation24_spill]]  ;;  %s7102_s2 = sld [smem:[#allocation25_spill]] }
 0x41a   : > { %v5430_v11 = vld [vmem:[#allocation10 + $0xc0] sm:$0xff]   ;;  %4845 = vmatprep.subr.bf16.mxu1 %v5429_v20  ;;  %v5433_v14 = vld [vmem:[#allocation10 + $0xc8] sm:$0xff]   ;;  %v5436_v16 = vld [vmem:[#allocation10 + $0xd0] sm:$0xff]   ;;  %s3843_s0 = sshll.u32 %s6319_s15, 4  ;;  %s7104_s26 = sld [smem:[#allocation26_spill]]  ;;  %s6963_s0 = int_to_ptr.vmem [resolvable:$true] %s3843_s0 }
 0x41b   : > { %4278 = vmatpush3.bf16.msra.mxu0 %v5430_v11  ;;  %4846 = vmatpush3.bf16.msra.mxu1 %v5429_v20  ;;  %v5437_v21 = vld [vmem:[#allocation10 + $0x118] sm:$0xff]   ;;  %v5440_v24 = vld [vmem:[#allocation10 + $0x120] sm:$0xff]   ;;  %v5443_v27 = vld [vmem:[#allocation10 + $0x128] sm:$0xff]   ;;  %s7105_s5 = sld [smem:[#allocation36_spill]]  ;;  %s6970_s16 = scalar_lea.sflag [#allocation6], %s460_s27 }
 0x41c   : > { %4279 = vmatprep.subr.bf16.mxu0 %v5431_v12  ;;  %4847 = vmatprep.subr.bf16.mxu1 %v5432_v13  ;;  %v5438_v22 = vld [vmem:[#allocation10 + $0x158] sm:$0xff]   ;;  %v5441_v25 = vld [vmem:[#allocation10 + $0x160] sm:$0xff]   ;;  %v5444_v28 = vld [vmem:[#allocation10 + $0x168] sm:$0xff]   ;;  %s5907_s12 = smov [#allocation15]  }
 0x41d   : > { %v5439_v23 = vld [vmem:[#allocation10 + $0xd8] sm:$0xff]   ;;  %v5442_v26 = vld [vmem:[#allocation10 + $0xe0] sm:$0xff]   ;;  %v5445_v29 = vld [vmem:[#allocation10 + $0xe8] sm:$0xff]   ;;  %s5756_s22 = sshll.u32 %s5907_s12, 4  ;;  %s5757_s22 = int_to_ptr.vmem [resolvable:$false] %s5756_s22 }
 0x41e   : > { %v5446_v30 = vld [vmem:[#allocation10 + $0x130] sm:$0xff]   ;;  %v989_v33 = vld [vmem:[#allocation2 + $0x19] sm:$0xff]  ;;  %v990_v34 = vld [vmem:[#allocation2 + $0x21] sm:$0xff]  ;;  %p5759_p0 = scmp.lt.s32.totalorder %s6963_s0, %s5757_s22 }
 0x41f   : > { %4280 = vmatpush3.bf16.msra.mxu0 %v5433_v14  ;;  %4848 = vmatpush3.bf16.msra.mxu1 %v5432_v13  ;;  %v5447_v31 = vld [vmem:[#allocation10 + $0x170] sm:$0xff]   ;;  %v1009_v35 = vld [vmem:[#allocation2 + $0x1a] sm:$0xff]  ;;  %v6447_v38 = vpack.c.bf16 %v990_v34, %v989_v33  ;;  %v1010_v40 = vld [vmem:[#allocation2 + $0x22] sm:$0xff]  ;;  %s4242_s4 = sshll.u32 %s7101_s7, 4  ;;  %s4232_s30 = sshll.u32 %s7102_s2, 5 }
 0x420   : > { %4281 = vmatprep.subr.bf16.mxu0 %v5434_v39  ;;  %4849 = vmatprep.subr.bf16.mxu1 %v5435_v15  ;;  %v5448_v32 = vld [vmem:[#allocation10 + $0xf0] sm:$0xff]   ;;  %v5449_v36 = vld [vmem:[#allocation10 + $0x138] sm:$0xff]   ;;  %v6449_v42 = vpack.c.bf16 %v1010_v40, %v1009_v35  ;;  %v970_v44 = vld [vmem:[#allocation2 + $0x20] sm:$0xff]  ;;  %s3840_s24 = sadd.s32 %s4242_s4, %s4232_s30  ;;  %p7106_p3 = scmp.ne.s32.totalorder %s7104_s26, 0 }
 0x421   : > { %v5450_v37 = vld [vmem:[#allocation10 + $0x178] sm:$0xff]   ;;  %1330 = vmatprep.mubr.bf16.mxu0 %v6447_v38  ;;  %v5452_v47 = vld [vmem:[#allocation10 + $0x40] sm:$0xff]   ;;  %v1013_v52 = vld [vmem:[#allocation2 + $0x4a] sm:$0xff]  ;;  %s4233_s28 = sshll.u32 %s3840_s24, 7 }
 0x422   : > { %v5451_v41 = vld [vmem:[#allocation10 + $0xf8] sm:$0xff]   ;;  %4861 = vmatprep.mubr.bf16.mxu1 %v6449_v42  ;;  %v5453_v54 = vld [vmem:[#allocation10] sm:$0xff]   ;;  %v5454_v56 = vld [vmem:[#allocation10 + $0x48] sm:$0xff]   ;;  %s6961_s6 = scalar_lea.hbm %s7105_s5, %s4233_s28 }
 0x423   : > { %4282 = vmatpush3.bf16.msra.mxu0 %v5436_v16  ;;  %4850 = vmatpush3.bf16.msra.mxu1 %v5435_v15  ;;  %v969_v43 = vld [vmem:[#allocation2 + $0x18] sm:$0xff]  ;;  %v5455_v58 = vld [vmem:[#allocation10 + $0x8] sm:$0xff]   ;;  %v971_v59 = vld [vmem:[#allocation2 + $0x30] sm:$0xff] }
 0x424   : > { %4283 = vmatprep.subr.bf16.mxu0 %v5437_v21  ;;  %4851 = vmatprep.subr.bf16.mxu1 %v5438_v22  ;;  %v1011_v45 = vld [vmem:[#allocation2 + $0x32] sm:$0xff]  ;;  %v1012_v46 = vld [vmem:[#allocation2 + $0x3a] sm:$0xff]  ;;  %v6453_v49 = vpack.c.bf16 %v970_v44, %v969_v43  ;;  %v1015_v61 = vld [vmem:[#allocation2 + $0x62] sm:$0xff] }
 0x425   : > { %v991_v48 = vld [vmem:[#allocation2 + $0x31] sm:$0xff]  ;;  %v6455_v50 = vpack.c.bf16 %v1012_v46, %v1011_v45  ;;  %v992_v51 = vld [vmem:[#allocation2 + $0x39] sm:$0xff]  ;;  %v993_v0 = vld [vmem:[#allocation2 + $0x49] sm:$0xff] }
 0x426   : > { %v1014_v53 = vld [vmem:[#allocation2 + $0x52] sm:$0xff]  ;;  %v6457_v55 = vpack.c.bf16 %v992_v51, %v991_v48  ;;  %v1016_v62 = vld [vmem:[#allocation2 + $0x6a] sm:$0xff]  ;;  %v1017_v1 = vld [vmem:[#allocation2 + $0x7a] sm:$0xff] }
 0x427   : > { %4284 = vmatpush3.bf16.msra.mxu0 %v5439_v23  ;;  %4852 = vmatpush3.bf16.msra.mxu1 %v5438_v22  ;;  %v6459_v57 = vpack.c.bf16 %v1014_v53, %v1013_v52  ;;  %v972_v60 = vld [vmem:[#allocation2 + $0x38] sm:$0xff]  ;;  %v5456_v63 = vld [vmem:[#allocation10 + $0x50] sm:$0xff]   ;;  %v1018_v8 = vld [vmem:[#allocation2 + $0x82] sm:$0xff]  ;;  %v6467_v10 = vpack.c.bf16 %v1016_v62, %v1015_v61 }
 0x428   : > { %4285 = vmatprep.subr.bf16.mxu0 %v5440_v24  ;;  %4853 = vmatprep.subr.bf16.mxu1 %v5441_v25  ;;  %v994_v7 = vld [vmem:[#allocation2 + $0x51] sm:$0xff]  ;;  %v6465_v9 = vpack.c.bf16 %v972_v60, %v971_v59  ;;  %v6471_v18 = vpack.c.bf16 %v1018_v8, %v1017_v1  ;;  %v973_v19 = vld [vmem:[#allocation2 + $0x48] sm:$0xff]  ;;  %v1020_v20 = vld [vmem:[#allocation2 + $0x9a] sm:$0xff] }
 0x429   : > { %v5457_v2 = vld [vmem:[#allocation10 + $0x10] sm:$0xff]   ;;  %v6469_v17 = vpack.c.bf16 %v994_v7, %v993_v0  ;;  %v5458_v3 = vld [vmem:[#allocation10 + $0x58] sm:$0xff]   ;;  %v5460_v11 = vld [vmem:[#allocation10 + $0x60] sm:$0xff]  }
 0x42a   : > { %v5459_v4 = vld [vmem:[#allocation10 + $0x18] sm:$0xff]   ;;  %v974_v5 = vld [vmem:[#allocation2 + $0x50] sm:$0xff]  ;;  %v995_v12 = vld [vmem:[#allocation2 + $0x61] sm:$0xff] }
 0x42b   : > { %4286 = vmatpush3.bf16.msra.mxu0 %v5442_v26  ;;  %4854 = vmatpush3.bf16.msra.mxu1 %v5441_v25  ;;  %v1019_v6 = vld [vmem:[#allocation2 + $0x92] sm:$0xff]  ;;  %v996_v13 = vld [vmem:[#allocation2 + $0x69] sm:$0xff]  ;;  %v6477_v15 = vpack.c.bf16 %v974_v5, %v973_v19  ;;  %v5461_v21 = vld [vmem:[#allocation10 + $0x20] sm:$0xff]  }
 0x42c   : > { %4287 = vmatprep.subr.bf16.mxu0 %v5443_v27  ;;  %4855 = vmatprep.subr.bf16.mxu1 %v5444_v28  ;;  %v1021_v14 = vld [vmem:[#allocation2 + $0xaa] sm:$0xff]  ;;  %v1022_v39 = vld [vmem:[#allocation2 + $0xb2] sm:$0xff]  ;;  %v6479_v16 = vpack.c.bf16 %v1020_v20, %v1019_v6  ;;  %v6481_v22 = vpack.c.bf16 %v996_v13, %v995_v12  ;;  %v975_v26 = vld [vmem:[#allocation2 + $0x60] sm:$0xff] }
 0x42d   : > { %v5462_v23 = vld [vmem:[#allocation10 + $0x68] sm:$0xff]   ;;  %v6483_v24 = vpack.c.bf16 %v1022_v39, %v1021_v14  ;;  %v5465_v34 = vld [vmem:[#allocation10 + $0x30] sm:$0xff]   ;;  %v5469_v40 = vld [vmem:[#allocation10 + $0x1c0] sm:$0xff]  }
 0x42e   : > { %v5463_v25 = vld [vmem:[#allocation10 + $0x28] sm:$0xff]   ;;  %v5470_v43 = vld [vmem:[#allocation10 + $0x180] sm:$0xff]   ;;  %v5466_v44 = vld [vmem:[#allocation10 + $0x78] sm:$0xff]  }
 0x42f   : > { %4288 = vmatpush3.bf16.msra.mxu0 %v5445_v29  ;;  %4856 = vmatpush3.bf16.msra.mxu1 %v5444_v28  ;;  %v976_v27 = vld [vmem:[#allocation2 + $0x68] sm:$0xff]  ;;  %v5467_v46 = vld [vmem:[#allocation10 + $0x38] sm:$0xff]   ;;  %v978_v48 = vld [vmem:[#allocation2 + $0x80] sm:$0xff] }
 0x430   : > { %4289 = vmatprep.subr.bf16.mxu0 %v5446_v30  ;;  %4857 = vmatprep.subr.bf16.mxu1 %v5447_v31  ;;  %v1023_v28 = vld [vmem:[#allocation2 + $0xc2] sm:$0xff]  ;;  %v1024_v29 = vld [vmem:[#allocation2 + $0xca] sm:$0xff]  ;;  %v1000_v59 = vld [vmem:[#allocation2 + $0x99] sm:$0xff] }
 0x431   : > { %v5464_v30 = vld [vmem:[#allocation10 + $0x70] sm:$0xff]   ;;  %v987_v33 = vld [vmem:[#allocation2 + $0x1] sm:$0xff]  ;;  %v980_v8 = vld [vmem:[#allocation2 + $0x98] sm:$0xff] }
 0x432   : > { %v988_v35 = vld [vmem:[#allocation2 + $0x9] sm:$0xff]  ;;  %v967_v51 = vld [vmem:[#allocation2] sm:$0xff]  ;;  %v5477_v5 = vld [vmem:[#allocation10 + $0x198] sm:$0xff]  }
 0x433   : > { %4290 = vmatpush3.bf16.msra.mxu0 %v5448_v32  ;;  %4858 = vmatpush3.bf16.msra.mxu1 %v5447_v31  ;;  %v997_v31 = vld [vmem:[#allocation2 + $0x79] sm:$0xff]  ;;  %v998_v32 = vld [vmem:[#allocation2 + $0x81] sm:$0xff]  ;;  %v1028_v45 = vpack.c.bf16 %v988_v35, %v987_v33  ;;  %v5474_v60 = vld [vmem:[#allocation10 + $0x1d0] sm:$0xff]  }
 0x434   : > { %4291 = vmatprep.subr.bf16.mxu0 %v5449_v36  ;;  %4859 = vmatprep.subr.bf16.mxu1 %v5450_v37  ;;  %v6489_v36 = vpack.c.bf16 %v976_v27, %v975_v26  ;;  %v968_v52 = vld [vmem:[#allocation2 + $0x8] sm:$0xff]  ;;  %v5475_v7 = vld [vmem:[#allocation10 + $0x190] sm:$0xff]   ;;  %v5480_v12 = vld [vmem:[#allocation10 + $0x1a0] sm:$0xff]  }
 0x435   : > { %v5471_v53 = vld [vmem:[#allocation10 + $0x1c8] sm:$0xff]   ;;  %v1027_v62 = vpack.c.bf16 %v968_v52, %v967_v51  ;;  %v979_v1 = vld [vmem:[#allocation2 + $0x90] sm:$0xff]  ;;  %v5483_v39 = vld [vmem:[#allocation10 + $0x98] sm:$0xff]  }
 0x436   : > { %v5473_v0 = vld [vmem:[#allocation10 + $0x88] sm:$0xff]   ;;  %v5478_v19 = vld [vmem:[#allocation10 + $0x90] sm:$0xff]   ;;  %v6505_v6 = vpack.c.bf16 %v980_v8, %v979_v1  ;;  %v5488_v26 = vld [vmem:[#allocation10 + $0xa0] sm:$0xff]  }
 0x437   : > { %4292 = vmatpush3.bf16.msra.mxu0 %v5451_v41  ;;  %4860 = vmatpush3.bf16.msra.mxu1 %v5450_v37  ;;  %v6491_v37 = vpack.c.bf16 %v1024_v29, %v1023_v28  ;;  %v6493_v41 = vpack.c.bf16 %v998_v32, %v997_v31  ;;  %v981_v13 = vld [vmem:[#allocation2 + $0xa8] sm:$0xff]  ;;  %v982_v14 = vld [vmem:[#allocation2 + $0xb0] sm:$0xff]  ;;  %v5486_v32 = vld [vmem:[#allocation10 + $0x1f8] sm:$0xff]  }
 0x438   : > { %4357 = vmatprep.subr.bf16.mxu1 %v5452_v47  ;;  %4437 = vmatprep.subr.bf16.mxu0 %v5469_v40  ;;  %v977_v47 = vld [vmem:[#allocation2 + $0x78] sm:$0xff]  ;;  %v6513_v27 = vpack.c.bf16 %v982_v14, %v981_v13  ;;  %v5484_v29 = vld [vmem:[#allocation10 + $0x1f0] sm:$0xff]   ;;  %v5489_v31 = vld [vmem:[#allocation10 + $0xa8] sm:$0xff]  }
 0x439   : > { %v6498_v61 = vpack.c.bf16 %v978_v48, %v977_v47  ;;  %v984_v33 = vld [vmem:[#allocation2 + $0xc8] sm:$0xff]  ;;  %v5490_v35 = vld [vmem:[#allocation10 + $0xb0] sm:$0xff]   ;;  %v5502_v52 = vld [vmem:[#allocation12 + $0x118] sm:$0xff]  }
 0x43a   : > { %1331 = vmatmul.mubr.bf16.vlgmr.msra.gmra.mrb[0].mxu0 %v6453_v49  ;;  %4862 = vmatmul.mubr.bf16.vlgmr.msra.gmra.mrb[0].mxu1 %v6455_v50  ;;  %v5496_v47 = vld [vmem:[#allocation12 + $0x108] sm:$0xff]   ;;  %v5500_v51 = vld [vmem:[#allocation12 + $0xd0] sm:$0xff]  }
 0x43b   : > { %4358 = vmatpush3.bf16.msra.mxu1 %v5453_v54  ;;  %1338 = vmatprep.mubr.bf16.mxu0 %v6457_v55  ;;  %v5468_v54 = vld [vmem:[#allocation10 + $0x80] sm:$0xff]   ;;  %v5497_v48 = vld [vmem:[#allocation12 + $0xc8] sm:$0xff]   ;;  %v2236_v14 = vld [vmem:[#allocation3 + $0x20] sm:$0xff] }
 0x43c   : > { %4359 = vmatprep.subr.bf16.mxu1 %v5454_v56  ;;  %4865 = vmatprep.mubr.bf16.mxu1 %v6459_v57  ;;  %v5472_v56 = vld [vmem:[#allocation10 + $0x188] sm:$0xff]  }
 0x43d   : > { %4438 = vmatpush3.bf16.msra.mxu0 %v5470_v43  ;;  %v5493_v43 = vld [vmem:[#allocation12 + $0x100] sm:$0xff]   ;;  %v5507_v8 = vld [vmem:[#allocation10 + $0x228] sm:$0xff]  }
 0x43e   : > { %4439 = vmatprep.subr.bf16.mxu0 %v5471_v53  ;;  %v5506_v53 = vld [vmem:[#allocation12 + $0xe0] sm:$0xff]   ;;  %v2235_v13 = vld [vmem:[#allocation3 + $0x18] sm:$0xff] }
 0x43f   : > { %4360 = vmatpush3.bf16.msra.mxu1 %v5455_v58  ;;  %v999_v58 = vld [vmem:[#allocation2 + $0x91] sm:$0xff]  ;;  %v1006_v1 = vld [vmem:[#allocation2 + $0xe1] sm:$0xff] }
 0x440   : > { %4361 = vmatprep.subr.bf16.mxu1 %v5456_v63  ;;  %v6500_v63 = vpack.c.bf16 %v1000_v59, %v999_v58  ;;  %v5511_v58 = vld [vmem:[#allocation12 + $0x130] sm:$0xff]  }
 0x441   : > { %4440 = vmatpush3.bf16.msra.mxu0 %v5472_v56  ;;  %v1008_v56 = vld [vmem:[#allocation2 + $0xa] sm:$0xff] }
 0x442   : > { %1339 = vmatmul.mubr.bf16.gmra.mrb[4].mxu0 %v6465_v9  ;;  %4866 = vmatmul.mubr.bf16.gmra.mrb[4].mxu1 %v6467_v10 }
 0x443   : > { %4362 = vmatpush3.bf16.msra.mxu1 %v5457_v2  ;;  %1346 = vmatprep.mubr.bf16.mxu0 %v6469_v17  ;;  %v5476_v2 = vld [vmem:[#allocation10 + $0x1d8] sm:$0xff]  }
 0x444   : > { %4363 = vmatprep.subr.bf16.mxu1 %v5458_v3  ;;  %4869 = vmatprep.mubr.bf16.mxu1 %v6471_v18  ;;  %v1001_v3 = vld [vmem:[#allocation2 + $0xa9] sm:$0xff] }
 0x445   : > { %4441 = vmatprep.subr.bf16.mxu0 %v5474_v60  ;;  %v5512_v60 = vld [vmem:[#allocation12 + $0xf0] sm:$0xff]  }
 0x446   : > { %4442 = vmatpush3.bf16.msra.mxu0 %v5475_v7  ;;  %v1005_v7 = vld [vmem:[#allocation2 + $0xd9] sm:$0xff] }
 0x447   : > { %4364 = vmatpush3.bf16.msra.mxu1 %v5459_v4  ;;  %v1002_v4 = vld [vmem:[#allocation2 + $0xb1] sm:$0xff]  ;;  %4443 = vmatprep.subr.bf16.mxu0 %v5476_v2  ;;  %v1055_v2 = vpack.c.bf16 %v1006_v1, %v1005_v7 }
 0x448   : > { %4365 = vmatprep.subr.bf16.mxu1 %v5460_v11  ;;  %v6507_v20 = vpack.c.bf16 %v1002_v4, %v1001_v3  ;;  %v5479_v11 = vld [vmem:[#allocation10 + $0x1e0] sm:$0xff]   ;;  %v985_v3 = vld [vmem:[#allocation2 + $0xd8] sm:$0xff]  ;;  %v2278_v7 = vld [vmem:[#allocation3 + $0x3a] sm:$0xff] }
 0x449   : > { %v986_v4 = vld [vmem:[#allocation2 + $0xe0] sm:$0xff]  ;;  %v5542_v1 = vld [vmem:[#allocation12 + $0x70] sm:$0xff]  }
 0x44a   : > { %1347 = vmatmul.mubr.bf16.gmra.mrb[8].mxu0 %v6477_v15  ;;  %4870 = vmatmul.mubr.bf16.gmra.mrb[8].mxu1 %v6479_v16 }
 0x44b   : > { %4366 = vmatpush3.bf16.msra.mxu1 %v5461_v21  ;;  %1354 = vmatprep.mubr.bf16.mxu0 %v6481_v22  ;;  %v5482_v21 = vld [vmem:[#allocation10 + $0x1a8] sm:$0xff]  }
 0x44c   : > { %4367 = vmatprep.subr.bf16.mxu1 %v5462_v23  ;;  %4873 = vmatprep.mubr.bf16.mxu1 %v6483_v24  ;;  %v1003_v23 = vld [vmem:[#allocation2 + $0xc1] sm:$0xff] }
 0x44d   : > { %4444 = vmatpush3.bf16.msra.mxu0 %v5477_v5  ;;  %v2255_v5 = vld [vmem:[#allocation3 + $0x19] sm:$0xff] }
 0x44e   : > { %4445 = vmatprep.subr.bf16.mxu0 %v5479_v11  ;;  %v5513_v11 = vld [vmem:[#allocation10 + $0x238] sm:$0xff]  }
 0x44f   : > { %4368 = vmatpush3.bf16.msra.mxu1 %v5463_v25  ;;  %v1004_v25 = vld [vmem:[#allocation2 + $0xc9] sm:$0xff] }
 0x450   : > { %4369 = vmatprep.subr.bf16.mxu1 %v5464_v30  ;;  %v6515_v28 = vpack.c.bf16 %v1004_v25, %v1003_v23  ;;  %v983_v30 = vld [vmem:[#allocation2 + $0xc0] sm:$0xff]  ;;  %v6558_v23 = vpack.c.bf16 %v2236_v14, %v2235_v13  ;;  %v5517_v25 = vld [vmem:[#allocation12 + $0x148] sm:$0xff]   ;;  %v5544_v14 = vld [vmem:[#allocation12 + $0x30] sm:$0xff]  }
 0x451   : > { %4446 = vmatpush3.bf16.msra.mxu0 %v5480_v12  ;;  %v6521_v40 = vpack.c.bf16 %v984_v33, %v983_v30  ;;  %v2259_v30 = vld [vmem:[#allocation3 + $0x49] sm:$0xff] }
 0x452   : > { %1355 = vmatmul.mubr.bf16.gmra.mrb[12].mxu0 %v6489_v36  ;;  %4874 = vmatmul.mubr.bf16.gmra.mrb[12].mxu1 %v6491_v37 }
 0x453   : > { %4370 = vmatpush3.bf16.msra.mxu1 %v5465_v34  ;;  %1362 = vmatprep.mubr.bf16.mxu0 %v6493_v41  ;;  %v5487_v34 = vld [vmem:[#allocation10 + $0x1b8] sm:$0xff]  }
 0x454   : > { %4371 = vmatprep.subr.bf16.mxu1 %v5466_v44  ;;  %1668 = vmatprep.mubr.bf16.mxu1 %v1028_v45  ;;  %v5491_v44 = vld [vmem:[#allocation10 + $0xb8] sm:$0xff]   ;;  %v5492_v45 = vld [vmem:[#allocation10 + $0x200] sm:$0xff]  }
 0x457   : > { %4372 = vmatpush3.bf16.msra.mxu1 %v5467_v46  ;;  %v5494_v46 = vld [vmem:[#allocation12 + $0xc0] sm:$0xff]  }
 0x458   : > { %4877 = vmatprep.subr.bf16.mxu1 %v5468_v54 }
 0x45a   : > { %1363 = vmatmul.mubr.bf16.gmra.mrb[16].mxu0 %v6498_v61  ;;  %1669 = vmatmul.mubr.bf16.vlgmr.msra.gmra.mrb[16].mxu1 %v1027_v62  ;;  %v5514_v62 = vld [vmem:[#allocation12 + $0x138] sm:$0xff]  }
 0x45b   : > { %4878 = vmatpush3.bf16.msra.mxu1 %v5468_v54  ;;  %1370 = vmatprep.mubr.bf16.mxu0 %v6500_v63  ;;  %v5508_v54 = vld [vmem:[#allocation12 + $0x128] sm:$0xff]  }
 0x45c   : > { %1676 = vmatprep.mubr.bf16.mxu1 %v6447_v38  ;;  %4879 = vmatprep.subr.bf16.mxu1 %v5473_v0  ;;  %v5481_v38 = vld [vmem:[#allocation10 + $0x1e8] sm:$0xff]  }
 0x45d   : > { %4447 = vmatprep.subr.bf16.mxu0 %v5481_v38  ;;  %v2257_v38 = vld [vmem:[#allocation3 + $0x31] sm:$0xff] }
 0x45e   : > { %4448 = vmatpush3.bf16.msra.mxu0 %v5482_v21  ;;  %v2258_v21 = vld [vmem:[#allocation3 + $0x39] sm:$0xff] }
 0x45f   : > { %4880 = vmatpush3.bf16.msra.mxu1 %v5473_v0  ;;  %4449 = vmatprep.subr.bf16.mxu0 %v5484_v29  ;;  %v5495_v0 = vld [vmem:[#allocation10 + $0x208] sm:$0xff]   ;;  %v5526_v29 = vld [vmem:[#allocation12] sm:$0xff]  }
 0x460   : > { %4881 = vmatprep.subr.bf16.mxu1 %v5478_v19 }
 0x462   : > { %1371 = vmatmul.mubr.bf16.gmra.mrb[20].mxu0 %v6505_v6  ;;  %1677 = vmatmul.mubr.bf16.gmra.mrb[20].mxu1 %v6453_v49  ;;  %v5485_v49 = vld [vmem:[#allocation10 + $0x1b0] sm:$0xff]  }
 0x463   : > { %1378 = vmatprep.mubr.bf16.mxu0 %v6507_v20  ;;  %1684 = vmatprep.mubr.bf16.mxu1 %v6457_v55 }
 0x464   : > { %4882 = vmatpush3.bf16.msra.mxu1 %v5478_v19  ;;  %4450 = vmatpush3.bf16.msra.mxu0 %v5485_v49  ;;  %v5510_v19 = vld [vmem:[#allocation10 + $0x230] sm:$0xff]   ;;  %v5527_v49 = vld [vmem:[#allocation12 + $0x48] sm:$0xff]  }
 0x465   : > { %4883 = vmatprep.subr.bf16.mxu1 %v5483_v39  ;;  %4451 = vmatprep.subr.bf16.mxu0 %v5486_v32  ;;  %v5529_v32 = vld [vmem:[#allocation12 + $0x8] sm:$0xff]  }
 0x468   : > { %4884 = vmatpush3.bf16.msra.mxu1 %v5483_v39  ;;  %4452 = vmatpush3.bf16.msra.mxu0 %v5487_v34  ;;  %v5516_v39 = vld [vmem:[#allocation12 + $0x140] sm:$0xff]  }
 0x469   : > { %4885 = vmatprep.subr.bf16.mxu1 %v5488_v26  ;;  %4517 = vmatprep.subr.bf16.mxu0 %v5493_v43  ;;  %v5530_v43 = vld [vmem:[#allocation12 + $0x50] sm:$0xff]  }
 0x46a   : > { %1379 = vmatmul.mubr.bf16.gmra.mrb[24].mxu0 %v6513_v27  ;;  %1685 = vmatmul.mubr.bf16.gmra.mrb[24].mxu1 %v6465_v9 }
 0x46b   : > { %1386 = vmatprep.mubr.bf16.mxu0 %v6515_v28  ;;  %1692 = vmatprep.mubr.bf16.mxu1 %v6469_v17 }
 0x46c   : > { %4886 = vmatpush3.bf16.msra.mxu1 %v5488_v26  ;;  %v6560_v26 = vpack.c.bf16 %v2258_v21, %v2257_v38  ;;  %v5545_v38 = vld [vmem:[#allocation12 + $0x78] sm:$0xff]   ;;  %v2246_v21 = vld [vmem:[#allocation3 + $0x98] sm:$0xff] }
 0x46d   : > { %4887 = vmatprep.subr.bf16.mxu1 %v5489_v31 }
 0x470   : > { %4888 = vmatpush3.bf16.msra.mxu1 %v5489_v31  ;;  %v2260_v31 = vld [vmem:[#allocation3 + $0x51] sm:$0xff] }
 0x471   : > { %4889 = vmatprep.subr.bf16.mxu1 %v5490_v35  ;;  %v6568_v34 = vpack.c.bf16 %v2260_v31, %v2259_v30  ;;  %v2284_v30 = vld [vmem:[#allocation3 + $0x82] sm:$0xff] }
 0x472   : > { %1387 = vmatmul.mubr.bf16.gmra.mrb[28].mxu0 %v6521_v40  ;;  %1693 = vmatmul.mubr.bf16.gmra.mrb[28].mxu1 %v6477_v15  ;;  %v5547_v31 = vld [vmem:[#allocation12 + $0x38] sm:$0xff]  }
 0x473   : > { %1700 = vmatprep.mubr.bf16.mxu1 %v6481_v22  ;;  %2055 = vmatprep.mubr.bf16.mxu0 %v6457_v55  ;;  %v5499_v55 = vld [vmem:[#allocation12 + $0x110] sm:$0xff]  }
 0x474   : > { %4890 = vmatpush3.bf16.msra.mxu1 %v5490_v35  ;;  %v2239_v35 = vld [vmem:[#allocation3 + $0x48] sm:$0xff] }
 0x475   : > { %4891 = vmatprep.subr.bf16.mxu1 %v5491_v44 }
 0x478   : > { %4892 = vmatpush3.bf16.msra.mxu1 %v5491_v44  ;;  %v5532_v44 = vld [vmem:[#allocation12 + $0x10] sm:$0xff]  }
 0x479   : > { %4909 = vmatprep.subr.bf16.mxu1 %v5492_v45 }
 0x47a   : > { %1701 = vmatmul.mubr.bf16.gmra.mrb[32].mxu1 %v6489_v36  ;;  %2056 = vmatmul.mubr.bf16.vlgmr.msra.gmra.mrb[32].mxu0 %v6465_v9  ;;  %v5503_v9 = vld [vmem:[#allocation12 + $0xd8] sm:$0xff]  }
 0x47b   : > { %1708 = vmatprep.mubr.bf16.mxu1 %v6493_v41  ;;  %2063 = vmatprep.mubr.bf16.mxu0 %v6469_v17  ;;  %v5505_v17 = vld [vmem:[#allocation12 + $0x120] sm:$0xff]  }
 0x47c   : > { %4518 = vmatpush3.bf16.msra.mxu0 %v5494_v46  ;;  %v2261_v46 = vld [vmem:[#allocation3 + $0x61] sm:$0xff] }
 0x47d   : > { %4519 = vmatprep.subr.bf16.mxu0 %v5496_v47  ;;  %v2262_v47 = vld [vmem:[#allocation3 + $0x69] sm:$0xff] }
 0x480   : > { %4520 = vmatpush3.bf16.msra.mxu0 %v5497_v48 }
 0x481   : > { %4521 = vmatprep.subr.bf16.mxu0 %v5499_v55  ;;  %v6576_v55 = vpack.c.bf16 %v2262_v47, %v2261_v46  ;;  %v2286_v46 = vld [vmem:[#allocation3 + $0x9a] sm:$0xff]  ;;  %v5537_v47 = vld [vmem:[#allocation12 + $0xa0] sm:$0xff]  }
 0x482   : > { %1709 = vmatmul.mubr.bf16.gmra.mrb[36].mxu1 %v6498_v61  ;;  %2064 = vmatmul.mubr.bf16.gmra.mrb[36].mxu0 %v6477_v15  ;;  %v1007_v15 = vld [vmem:[#allocation2 + $0x2] sm:$0xff] }
 0x483   : > { %1716 = vmatprep.mubr.bf16.mxu1 %v6500_v63  ;;  %2071 = vmatprep.mubr.bf16.mxu0 %v6481_v22  ;;  %v5509_v22 = vld [vmem:[#allocation12 + $0xe8] sm:$0xff]   ;;  %v1029_v59 = vpack.c.bf16 %v1008_v56, %v1007_v15  ;;  %v2264_v15 = vld [vmem:[#allocation3 + $0x81] sm:$0xff]  ;;  %v5536_v56 = vld [vmem:[#allocation12 + $0x60] sm:$0xff]  }
 0x484   : > { %4522 = vmatpush3.bf16.msra.mxu0 %v5500_v51  ;;  %v1025_v51 = vld [vmem:[#allocation2 + $0xda] sm:$0xff] }
 0x485   : > { %4523 = vmatprep.subr.bf16.mxu0 %v5502_v52  ;;  %v1026_v52 = vld [vmem:[#allocation2 + $0xe2] sm:$0xff] }
 0x488   : > { %4524 = vmatpush3.bf16.msra.mxu0 %v5503_v9  ;;  %v2241_v9 = vld [vmem:[#allocation3 + $0x60] sm:$0xff] }
 0x489   : > { %4525 = vmatprep.subr.bf16.mxu0 %v5505_v17  ;;  %v5535_v17 = vld [vmem:[#allocation12 + $0x18] sm:$0xff]  }
 0x48a   : > { %1717 = vmatmul.mubr.bf16.gmra.mrb[40].mxu1 %v6505_v6  ;;  %2072 = vmatmul.mubr.bf16.gmra.mrb[40].mxu0 %v6489_v36  ;;  %v5515_v36 = vld [vmem:[#allocation12 + $0xf8] sm:$0xff]  }
 0x48b   : > { %1724 = vmatprep.mubr.bf16.mxu1 %v6507_v20  ;;  %2079 = vmatprep.mubr.bf16.mxu0 %v6493_v41  ;;  %v5524_v41 = vld [vmem:[#allocation12 + $0x40] sm:$0xff]  }
 0x48c   : > { %4526 = vmatpush3.bf16.msra.mxu0 %v5506_v53  ;;  %v5522_v53 = vld [vmem:[#allocation12 + $0x170] sm:$0xff]  }
 0x48d   : > { %4527 = vmatprep.subr.bf16.mxu0 %v5508_v54  ;;  %v2263_v54 = vld [vmem:[#allocation3 + $0x79] sm:$0xff] }
 0x490   : > { %4528 = vmatpush3.bf16.msra.mxu0 %v5509_v22  ;;  %v2275_v22 = vld [vmem:[#allocation3 + $0x1a] sm:$0xff] }
 0x491   : > { %4529 = vmatprep.subr.bf16.mxu0 %v5511_v58  ;;  %v2276_v58 = vld [vmem:[#allocation3 + $0x22] sm:$0xff] }
 0x492   : > { %1725 = vmatmul.mubr.bf16.gmra.mrb[44].mxu1 %v6513_v27  ;;  %2080 = vmatmul.mubr.bf16.gmra.mrb[44].mxu0 %v6498_v61  ;;  %v5498_v61 = vld [vmem:[#allocation10 + $0x210] sm:$0xff]  }
 0x493   : > { %4893 = vmatprep.mubr.bf16.mxu1 %v1029_v59  ;;  %2087 = vmatprep.mubr.bf16.mxu0 %v6500_v63  ;;  %v5501_v63 = vld [vmem:[#allocation10 + $0x218] sm:$0xff]   ;;  %v5538_v59 = vld [vmem:[#allocation12 + $0x20] sm:$0xff]  }
 0x494   : > { %4530 = vmatpush3.bf16.msra.mxu0 %v5512_v60  ;;  %v1056_v60 = vpack.c.bf16 %v1026_v52, %v1025_v51  ;;  %v2270_v51 = vld [vmem:[#allocation3 + $0xc9] sm:$0xff] }
 0x495   : > { %4531 = vmatprep.subr.bf16.mxu0 %v5514_v62  ;;  %v2287_v52 = vld [vmem:[#allocation3 + $0xaa] sm:$0xff] }
 0x498   : > { %4532 = vmatpush3.bf16.msra.mxu0 %v5515_v36  ;;  %v6584_v36 = vpack.c.bf16 %v2264_v15, %v2263_v54  ;;  %v5540_v54 = vld [vmem:[#allocation12 + $0xa8] sm:$0xff]  }
 0x499   : > { %4597 = vmatprep.subr.bf16.mxu0 %v5524_v41  ;;  %v5539_v41 = vld [vmem:[#allocation12 + $0x68] sm:$0xff]  }
 0x49a   : > { %4894 = vmatmul.mubr.bf16.vlgmr.msra.gmra.mrb[0].mxu1 %v6449_v42  ;;  %2088 = vmatmul.mubr.bf16.gmra.mrb[48].mxu0 %v6505_v6  ;;  %v5504_v42 = vld [vmem:[#allocation10 + $0x220] sm:$0xff]   ;;  %v2256_v6 = vld [vmem:[#allocation3 + $0x21] sm:$0xff] }
 0x49b   : > { %4910 = vmatpush3.bf16.msra.mxu1 %v5492_v45  ;;  %4897 = vmatprep.mubr.bf16.mxu1 %v6455_v50  ;;  %v6553_v12 = vpack.c.bf16 %v2256_v6, %v2255_v5  ;;  %v5533_v45 = vld [vmem:[#allocation12 + $0x58] sm:$0xff]  }
 0x49c   : > { %4911 = vmatprep.subr.bf16.mxu1 %v5495_v0  ;;  %2095 = vmatprep.mubr.bf16.mxu0 %v6507_v20  ;;  %v1054_v20 = vpack.c.bf16 %v986_v4, %v985_v3  ;;  %v2266_v3 = vld [vmem:[#allocation3 + $0x99] sm:$0xff]  ;;  %v2279_v4 = vld [vmem:[#allocation3 + $0x4a] sm:$0xff] }
 0x49f   : > { %4912 = vmatpush3.bf16.msra.mxu1 %v5495_v0  ;;  %v6586_v0 = vpack.c.bf16 %v2276_v58, %v2275_v22  ;;  %v2250_v22 = vld [vmem:[#allocation3 + $0xc8] sm:$0xff] }
 0x4a0   : > { %4913 = vmatprep.subr.bf16.mxu1 %v5498_v61  ;;  %v2289_v58 = vld [vmem:[#allocation3 + $0xc2] sm:$0xff] }
 0x4a2   : > { %4898 = vmatmul.mubr.bf16.gmra.mrb[4].mxu1 %v6459_v57  ;;  %2096 = vmatmul.mubr.bf16.gmra.mrb[52].mxu0 %v6513_v27  ;;  %v2237_v27 = vld [vmem:[#allocation3 + $0x30] sm:$0xff] }
 0x4a3   : > { %4914 = vmatpush3.bf16.msra.mxu1 %v5498_v61  ;;  %4901 = vmatprep.mubr.bf16.mxu1 %v6467_v10  ;;  %v2243_v61 = vld [vmem:[#allocation3 + $0x78] sm:$0xff] }
 0x4a4   : > { %4915 = vmatprep.subr.bf16.mxu1 %v5501_v63  ;;  %2103 = vmatprep.mubr.bf16.mxu0 %v6515_v28  ;;  %v2238_v28 = vld [vmem:[#allocation3 + $0x38] sm:$0xff] }
 0x4a5   : > { %v6566_v33 = vpack.c.bf16 %v2238_v28, %v2237_v27  ;;  %v2282_v27 = vld [vmem:[#allocation3 + $0x6a] sm:$0xff]  ;;  %v5531_v28 = vld [vmem:[#allocation12 + $0x90] sm:$0xff]  }
 0x4a7   : > { %4916 = vmatpush3.bf16.msra.mxu1 %v5501_v63  ;;  %v2244_v63 = vld [vmem:[#allocation3 + $0x80] sm:$0xff] }
 0x4a8   : > { %4917 = vmatprep.subr.bf16.mxu1 %v5504_v42  ;;  %v6591_v5 = vpack.c.bf16 %v2244_v63, %v2243_v61  ;;  %v2274_v61 = vld [vmem:[#allocation3 + $0xa] sm:$0xff] }
 0x4aa   : > { %4902 = vmatmul.mubr.bf16.gmra.mrb[8].mxu1 %v6471_v18  ;;  %2104 = vmatmul.mubr.bf16.gmra.mrb[56].mxu0 %v6521_v40  ;;  %v2240_v40 = vld [vmem:[#allocation3 + $0x50] sm:$0xff] }
 0x4ab   : > { %4918 = vmatpush3.bf16.msra.mxu1 %v5504_v42  ;;  %4905 = vmatprep.mubr.bf16.mxu1 %v6479_v16  ;;  %v6574_v48 = vpack.c.bf16 %v2240_v40, %v2239_v35  ;;  %v2277_v42 = vld [vmem:[#allocation3 + $0x32] sm:$0xff]  ;;  %v5534_v40 = vld [vmem:[#allocation12 + $0x98] sm:$0xff]  }
 0x4ac   : > { %4919 = vmatprep.subr.bf16.mxu1 %v5507_v8  ;;  %2111 = vmatprep.mubr.bf16.mxu0 %v1055_v2  ;;  %v2265_v2 = vld [vmem:[#allocation3 + $0x91] sm:$0xff]  ;;  %v6593_v6 = vpack.c.bf16 %v2278_v7, %v2277_v42 }
 0x4af   : > { %4920 = vmatpush3.bf16.msra.mxu1 %v5507_v8  ;;  %v5525_v8 = vld [vmem:[#allocation12 + $0x80] sm:$0xff]  }
 0x4b0   : > { %4921 = vmatprep.subr.bf16.mxu1 %v5510_v19 }
 0x4b2   : > { %4906 = vmatmul.mubr.bf16.gmra.mrb[12].mxu1 %v6483_v24  ;;  %2112 = vmatmul.mubr.bf16.gmra.mrb[60].mxu0 %v1054_v20  ;;  %v6595_v20 = vpack.c.bf16 %v2266_v3, %v2265_v2  ;;  %v2233_v2 = vld [vmem:[#allocation3] sm:$0xff]  ;;  %v2234_v3 = vld [vmem:[#allocation3 + $0x8] sm:$0xff] }
 0x4b3   : > { %4922 = vmatpush3.bf16.msra.mxu1 %v5510_v19  ;;  %4925 = vmatprep.mubr.bf16.mxu1 %v6455_v50  ;;  %v5518_v50 = vld [vmem:[#allocation12 + $0x150] sm:$0xff]   ;;  %v2280_v19 = vld [vmem:[#allocation3 + $0x52] sm:$0xff] }
 0x4b4   : > { %4923 = vmatprep.subr.bf16.mxu1 %v5513_v11  ;;  %2596 = vmatprep.mubr.bf16.mxu0 %v6553_v12  ;;  %v6597_v13 = vpack.c.bf16 %v2280_v19, %v2279_v4  ;;  %v5548_v4 = vld [vmem:[#allocation12 + $0x1c0] sm:$0xff]   ;;  %v2293_v19 = vpack.c.bf16 %v2234_v3, %v2233_v2 }
 0x4b7   : > { %4924 = vmatpush3.bf16.msra.mxu1 %v5513_v11  ;;  %v5528_v11 = vld [vmem:[#allocation12 + $0x88] sm:$0xff]  }
 0x4b8   : > { %4941 = vmatprep.subr.bf16.mxu1 %v5516_v39 }
 0x4ba   : > { %4926 = vmatmul.mubr.bf16.vlgmr.msra.gmra.mrb[0].mxu1 %v6459_v57  ;;  %2597 = vmatmul.mubr.bf16.vlgmr.msra.gmra.mrb[64].mxu0 %v6558_v23  ;;  %v5519_v57 = vld [vmem:[#allocation12 + $0x158] sm:$0xff]  }
 0x4bb   : > { %4942 = vmatpush3.bf16.msra.mxu1 %v5516_v39  ;;  %4929 = vmatprep.mubr.bf16.mxu1 %v6467_v10  ;;  %v5520_v10 = vld [vmem:[#allocation12 + $0x160] sm:$0xff]  }
 0x4bc   : > { %4943 = vmatprep.subr.bf16.mxu1 %v5517_v25  ;;  %2604 = vmatprep.mubr.bf16.mxu0 %v6560_v26  ;;  %v2245_v39 = vld [vmem:[#allocation3 + $0x90] sm:$0xff] }
 0x4bd   : > { %4598 = vmatpush3.bf16.msra.mxu0 %v5526_v29  ;;  %v2267_v29 = vld [vmem:[#allocation3 + $0xa9] sm:$0xff] }
 0x4be   : > { %4599 = vmatprep.subr.bf16.mxu0 %v5527_v49  ;;  %v2283_v49 = vld [vmem:[#allocation3 + $0x7a] sm:$0xff] }
 0x4bf   : > { %4944 = vmatpush3.bf16.msra.mxu1 %v5517_v25  ;;  %v2281_v25 = vld [vmem:[#allocation3 + $0x62] sm:$0xff] }
 0x4c0   : > { %4945 = vmatprep.subr.bf16.mxu1 %v5518_v50 }
 0x4c1   : > { %4600 = vmatpush3.bf16.msra.mxu0 %v5529_v32  ;;  %v6603_v32 = vpack.c.bf16 %v2246_v21, %v2245_v39  ;;  %v5551_v39 = vld [vmem:[#allocation12 + $0x188] sm:$0xff]   ;;  %v5553_v21 = vld [vmem:[#allocation12 + $0x190] sm:$0xff]  }
 0x4c2   : > { %4930 = vmatmul.mubr.bf16.gmra.mrb[4].mxu1 %v6471_v18  ;;  %2605 = vmatmul.mubr.bf16.gmra.mrb[68].mxu0 %v6566_v33  ;;  %v5521_v18 = vld [vmem:[#allocation12 + $0x168] sm:$0xff]  }
 0x4c3   : > { %4946 = vmatpush3.bf16.msra.mxu1 %v5518_v50  ;;  %4933 = vmatprep.mubr.bf16.mxu1 %v6479_v16  ;;  %v2242_v16 = vld [vmem:[#allocation3 + $0x68] sm:$0xff]  ;;  %v2268_v50 = vld [vmem:[#allocation3 + $0xb1] sm:$0xff] }
 0x4c4   : > { %4947 = vmatprep.subr.bf16.mxu1 %v5519_v57  ;;  %2612 = vmatprep.mubr.bf16.mxu0 %v6568_v34  ;;  %v6582_v62 = vpack.c.bf16 %v2242_v16, %v2241_v9  ;;  %v6607_v35 = vpack.c.bf16 %v2268_v50, %v2267_v29  ;;  %v2288_v9 = vld [vmem:[#allocation3 + $0xb2] sm:$0xff]  ;;  %v5560_v29 = vld [vmem:[#allocation12 + $0x1f0] sm:$0xff]  }
 0x4c5   : > { %4601 = vmatprep.subr.bf16.mxu0 %v5530_v43  ;;  %v6609_v43 = vpack.c.bf16 %v2284_v30, %v2283_v49  ;;  %v6621_v15 = vpack.c.bf16 %v2288_v9, %v2287_v52  ;;  %v5561_v30 = vld [vmem:[#allocation12 + $0x1b0] sm:$0xff]  }
 0x4c6   : > { %4602 = vmatpush3.bf16.msra.mxu0 %v5532_v44  ;;  %v2248_v44 = vld [vmem:[#allocation3 + $0xb0] sm:$0xff] }
 0x4c7   : > { %4948 = vmatpush3.bf16.msra.mxu1 %v5519_v57  ;;  %4603 = vmatprep.subr.bf16.mxu0 %v5533_v45  ;;  %v6605_v57 = vpack.c.bf16 %v2282_v27, %v2281_v25  ;;  %v2285_v45 = vld [vmem:[#allocation3 + $0x92] sm:$0xff]  ;;  %v5554_v25 = vld [vmem:[#allocation12 + $0x1d8] sm:$0xff]  }
 0x4c8   : > { %4949 = vmatprep.subr.bf16.mxu1 %v5520_v10  ;;  %v5555_v27 = vld [vmem:[#allocation12 + $0x198] sm:$0xff]  }
 0x4ca   : > { %4934 = vmatmul.mubr.bf16.gmra.mrb[8].mxu1 %v6483_v24  ;;  %2613 = vmatmul.mubr.bf16.gmra.mrb[72].mxu0 %v6574_v48  ;;  %v5523_v24 = vld [vmem:[#allocation12 + $0x178] sm:$0xff]  }
 0x4cb   : > { %4950 = vmatpush3.bf16.msra.mxu1 %v5520_v10  ;;  %4937 = vmatprep.mubr.bf16.mxu1 %v6491_v37  ;;  %v5541_v37 = vld [vmem:[#allocation12 + $0x28] sm:$0xff]   ;;  %v2247_v10 = vld [vmem:[#allocation3 + $0xa8] sm:$0xff] }
 0x4cc   : > { %4951 = vmatprep.subr.bf16.mxu1 %v5521_v18  ;;  %2620 = vmatprep.mubr.bf16.mxu0 %v6576_v55  ;;  %v6615_v16 = vpack.c.bf16 %v2248_v44, %v2247_v10  ;;  %v5562_v10 = vld [vmem:[#allocation12 + $0x1f8] sm:$0xff]  }
 0x4cd   : > { %4604 = vmatpush3.bf16.msra.mxu0 %v5535_v17  ;;  %v6617_v17 = vpack.c.bf16 %v2286_v46, %v2285_v45  ;;  %v5563_v46 = vld [vmem:[#allocation12 + $0x1b8] sm:$0xff]  }
 0x4ce   : > { %4605 = vmatprep.subr.bf16.mxu0 %v5536_v56  ;;  %v2249_v56 = vld [vmem:[#allocation3 + $0xc0] sm:$0xff] }
 0x4cf   : > { %4952 = vmatpush3.bf16.msra.mxu1 %v5521_v18  ;;  %v2269_v18 = vld [vmem:[#allocation3 + $0xc1] sm:$0xff]  ;;  %v6627_v63 = vpack.c.bf16 %v2250_v22, %v2249_v56 }
 0x4d0   : > { %4953 = vmatprep.subr.bf16.mxu1 %v5522_v53 }
 0x4d1   : > { %4606 = vmatpush3.bf16.msra.mxu0 %v5538_v59  ;;  %v2290_v59 = vld [vmem:[#allocation3 + $0xca] sm:$0xff] }
 0x4d2   : > { %4938 = vmatmul.mubr.bf16.gmra.mrb[12].mxu1 %v1056_v60  ;;  %2621 = vmatmul.mubr.bf16.gmra.mrb[76].mxu0 %v6582_v62  ;;  %v5543_v60 = vld [vmem:[#allocation12 + $0xb0] sm:$0xff]   ;;  %v6629_v42 = vpack.c.bf16 %v2290_v59, %v2289_v58 }
 0x4d3   : > { %4954 = vmatpush3.bf16.msra.mxu1 %v5522_v53  ;;  %2628 = vmatprep.mubr.bf16.mxu0 %v6584_v36  ;;  %v6619_v53 = vpack.c.bf16 %v2270_v51, %v2269_v18 }
 0x4d4   : > { %4955 = vmatprep.subr.bf16.mxu1 %v5523_v24  ;;  %4957 = vmatprep.mubr.bf16.mxu1 %v6586_v0 }
 0x4d5   : > { %4607 = vmatprep.subr.bf16.mxu0 %v5539_v41  ;;  %v2254_v41 = vld [vmem:[#allocation3 + $0x9] sm:$0xff] }
 0x4d6   : > { %4608 = vmatpush3.bf16.msra.mxu0 %v5541_v37  ;;  %v2273_v37 = vld [vmem:[#allocation3 + $0x2] sm:$0xff] }
 0x4d7   : > { %4956 = vmatpush3.bf16.msra.mxu1 %v5523_v24  ;;  %4609 = vmatprep.subr.bf16.mxu0 %v5542_v1  ;;  %v2253_v24 = vld [vmem:[#allocation3 + $0x1] sm:$0xff] }
 0x4d8   : > { %4973 = vmatprep.subr.bf16.mxu1 %v5525_v8  ;;  %v2294_v7 = vpack.c.bf16 %v2254_v41, %v2253_v24  ;;  %v5546_v1 = vld [vmem:[#allocation12 + $0xb8] sm:$0xff]  }
 0x4da   : > { %2629 = vmatmul.mubr.bf16.gmra.mrb[80].mxu0 %v6591_v5  ;;  %4958 = vmatmul.mubr.bf16.vlgmr.msra.gmra.mrb[0].mxu1 %v6593_v6 }
 0x4db   : > { %4974 = vmatpush3.bf16.msra.mxu1 %v5525_v8  ;;  %2636 = vmatprep.mubr.bf16.mxu0 %v6595_v20  ;;  %v2295_v8 = vpack.c.bf16 %v2274_v61, %v2273_v37  ;;  %v5567_v37 = vld [vmem:[#allocation12 + $0x218] sm:$0xff]  }
 0x4dc   : > { %4975 = vmatprep.subr.bf16.mxu1 %v5528_v11  ;;  %4961 = vmatprep.mubr.bf16.mxu1 %v6597_v13 }
 0x4dd   : > { %4610 = vmatpush3.bf16.msra.mxu0 %v5544_v14  ;;  %v5550_v14 = vld [vmem:[#allocation12 + $0x1c8] sm:$0xff]  }
 0x4de   : > { %4611 = vmatprep.subr.bf16.mxu0 %v5545_v38  ;;  %v5552_v38 = vld [vmem:[#allocation12 + $0x1d0] sm:$0xff]  }
 0x4df   : > { %4976 = vmatpush3.bf16.msra.mxu1 %v5528_v11  ;;  %v5549_v11 = vld [vmem:[#allocation12 + $0x180] sm:$0xff]  }
 0x4e0   : > { %4977 = vmatprep.subr.bf16.mxu1 %v5531_v28 }
 0x4e1   : > { %4612 = vmatpush3.bf16.msra.mxu0 %v5547_v31 }
 0x4e2   : > { %2637 = vmatmul.mubr.bf16.gmra.mrb[84].mxu0 %v6603_v32  ;;  %4962 = vmatmul.mubr.bf16.gmra.mrb[4].mxu1 %v6605_v57 }
 0x4e3   : > { %4978 = vmatpush3.bf16.msra.mxu1 %v5531_v28  ;;  %2644 = vmatprep.mubr.bf16.mxu0 %v6607_v35  ;;  %v5558_v28 = vld [vmem:[#allocation12 + $0x1e8] sm:$0xff]  }
 0x4e4   : > { %4979 = vmatprep.subr.bf16.mxu1 %v5534_v40  ;;  %4965 = vmatprep.mubr.bf16.mxu1 %v6609_v43 }
 0x4e7   : > { %4980 = vmatpush3.bf16.msra.mxu1 %v5534_v40 }
 0x4e8   : > { %4981 = vmatprep.subr.bf16.mxu1 %v5537_v47 }
 0x4ea   : > { %2645 = vmatmul.mubr.bf16.gmra.mrb[88].mxu0 %v6615_v16  ;;  %4966 = vmatmul.mubr.bf16.gmra.mrb[8].mxu1 %v6617_v17 }
 0x4eb   : > { %4982 = vmatpush3.bf16.msra.mxu1 %v5537_v47  ;;  %2652 = vmatprep.mubr.bf16.mxu0 %v6619_v53  ;;  %v5564_v47 = vld [vmem:[#allocation12 + $0x200] sm:$0xff]  }
 0x4ec   : > { %4983 = vmatprep.subr.bf16.mxu1 %v5540_v54  ;;  %4969 = vmatprep.mubr.bf16.mxu1 %v6621_v15 }
 0x4ef   : > { %4984 = vmatpush3.bf16.msra.mxu1 %v5540_v54  ;;  %v5565_v54 = vld [vmem:[#allocation12 + $0x208] sm:$0xff]  }
 0x4f0   : > { %4985 = vmatprep.subr.bf16.mxu1 %v5543_v60 }
 0x4f2   : > { %2653 = vmatmul.mubr.bf16.gmra.mrb[92].mxu0 %v6627_v63  ;;  %4970 = vmatmul.mubr.bf16.gmra.mrb[12].mxu1 %v6629_v42 }
 0x4f3   : > { %4986 = vmatpush3.bf16.msra.mxu1 %v5543_v60  ;;  %2934 = vmatprep.mubr.bf16.mxu0 %v2294_v7 }
 0x4f4   : > { %4987 = vmatprep.subr.bf16.mxu1 %v5546_v1  ;;  %4989 = vmatprep.mubr.bf16.mxu1 %v2295_v8 }
 0x4f7   : > { %4988 = vmatpush3.bf16.msra.mxu1 %v5546_v1 }
 0x4f8   : > { %4677 = vmatprep.subr.bf16.mxu1 %v5548_v4  ;;  %v5569_v4 = vld [vmem:[#allocation12 + $0x228] sm:$0xff]  }
 0x4fa   : > { %2935 = vmatmul.mubr.bf16.vlgmr.msra.gmra.mrb[96].mxu0 %v2293_v19  ;;  %4990 = vmatmul.mubr.bf16.vlgmr.msra.gmra.mrb[0].mxu1 %v6586_v0  ;;  %v5557_v0 = vld [vmem:[#allocation12 + $0x1a0] sm:$0xff]   ;;  %v5570_v19 = vld [vmem:[#allocation12 + $0x230] sm:$0xff]  }
 0x4fb   : > { %4678 = vmatpush3.bf16.msra.mxu1 %v5549_v11  ;;  %2942 = vmatprep.mubr.bf16.mxu0 %v6553_v12  ;;  %v5556_v12 = vld [vmem:[#allocation12 + $0x1e0] sm:$0xff]  }
 0x4fc   : > { %4679 = vmatprep.subr.bf16.mxu1 %v5550_v14  ;;  %4993 = vmatprep.mubr.bf16.mxu1 %v6593_v6 }
 0x4ff   : > { %4680 = vmatpush3.bf16.msra.mxu1 %v5551_v39 }
 0x500   : > { %4681 = vmatprep.subr.bf16.mxu1 %v5552_v38 }
 0x502   : > { %2943 = vmatmul.mubr.bf16.gmra.mrb[100].mxu0 %v6558_v23  ;;  %4994 = vmatmul.mubr.bf16.gmra.mrb[4].mxu1 %v6597_v13  ;;  %v5559_v23 = vld [vmem:[#allocation12 + $0x1a8] sm:$0xff]  }
 0x503   : > { %4682 = vmatpush3.bf16.msra.mxu1 %v5553_v21  ;;  %2950 = vmatprep.mubr.bf16.mxu0 %v6560_v26 }
 0x504   : > { %4683 = vmatprep.subr.bf16.mxu1 %v5554_v25  ;;  %4997 = vmatprep.mubr.bf16.mxu1 %v6605_v57 }
 0x507   : > { %4684 = vmatpush3.bf16.msra.mxu1 %v5555_v27 }
 0x508   : > { %4685 = vmatprep.subr.bf16.mxu1 %v5556_v12 }
 0x50a   : > { %2951 = vmatmul.mubr.bf16.gmra.mrb[104].mxu0 %v6566_v33  ;;  %4998 = vmatmul.mubr.bf16.gmra.mrb[8].mxu1 %v6609_v43 }
 0x50b   : > { %4686 = vmatpush3.bf16.msra.mxu1 %v5557_v0  ;;  %2958 = vmatprep.mubr.bf16.mxu0 %v6568_v34 }
 0x50c   : > { %4687 = vmatprep.subr.bf16.mxu1 %v5558_v28  ;;  %5001 = vmatprep.mubr.bf16.mxu1 %v6617_v17  ;;  %v5571_v28 = vld [vmem:[#allocation12 + $0x238] sm:$0xff]  }
 0x50d   : > { %v4293_v50 = vpop.f32.mrb[0].mxu0 }
 0x50e   : > { %v4294_v49 = vpop.f32.mrb[1].mxu0 }
 0x50f   : > { %4688 = vmatpush3.bf16.msra.mxu1 %v5559_v23  ;;  %v6644_v31 = vadd.f32 %v4294_v49, %v4293_v50  ;;  %v4296_v40 = vpop.f32.mrb[2].mxu0 }
 0x510   : > { %4689 = vmatprep.subr.bf16.mxu1 %v5560_v29  ;;  %v4297_v44 = vpop.f32.mrb[3].mxu0 }
 0x511   : > { %v6646_v45 = vadd.f32 %v4297_v44, %v4296_v40 }
 0x512   : > { %2959 = vmatmul.mubr.bf16.gmra.mrb[108].mxu0 %v6574_v48  ;;  %5002 = vmatmul.mubr.bf16.gmra.mrb[12].mxu1 %v6621_v15 }
 0x513   : > { %4690 = vmatpush3.bf16.msra.mxu1 %v5561_v30  ;;  %2966 = vmatprep.mubr.bf16.mxu0 %v6576_v55 }
 0x514   : > { %4691 = vmatprep.subr.bf16.mxu1 %v5562_v10  ;;  %3321 = vmatprep.mubr.bf16.mxu1 %v6560_v26  ;;  %v5566_v26 = vld [vmem:[#allocation12 + $0x210] sm:$0xff]  }
 0x515   : > { %v4299_v18 = vpop.f32.mrb[4].mxu0 }
 0x516   : > { %v4300_v51 = vpop.f32.mrb[5].mxu0 }
 0x517   : > { %4692 = vmatpush3.bf16.msra.mxu1 %v5563_v46  ;;  %v6652_v52 = vadd.f32 %v4300_v51, %v4299_v18  ;;  %v4302_v9 = vpop.f32.mrb[6].mxu0 }
 0x518   : > { %5005 = vmatprep.subr.bf16.mxu1 %v5564_v47  ;;  %v4303_v56 = vpop.f32.mrb[7].mxu0 }
 0x519   : > { %v6654_v22 = vadd.f32 %v4303_v56, %v4302_v9 }
 0x51a   : > { %2967 = vmatmul.mubr.bf16.gmra.mrb[112].mxu0 %v6582_v62  ;;  %3322 = vmatmul.mubr.bf16.vlgmr.msra.gmra.mrb[48].mxu1 %v6566_v33 }
 0x51b   : > { %5006 = vmatpush3.bf16.msra.mxu1 %v5564_v47  ;;  %2974 = vmatprep.mubr.bf16.mxu0 %v6584_v36 }
 0x51c   : > { %3329 = vmatprep.mubr.bf16.mxu1 %v6568_v34  ;;  %5007 = vmatprep.subr.bf16.mxu1 %v5565_v54  ;;  %v5568_v34 = vld [vmem:[#allocation12 + $0x220] sm:$0xff]  }
 0x51d   : > { %v4305_v58 = vpop.f32.mrb[8].mxu0 }
 0x51e   : > { %v4306_v59 = vpop.f32.mrb[9].mxu0 }
 0x51f   : > { %5008 = vmatpush3.bf16.msra.mxu1 %v5565_v54  ;;  %v6660_v60 = vadd.f32 %v4306_v59, %v4305_v58  ;;  %v4308_v24 = vpop.f32.mrb[10].mxu0 }
 0x520   : > { %5009 = vmatprep.subr.bf16.mxu1 %v5566_v26  ;;  %v4309_v41 = vpop.f32.mrb[11].mxu0 }
 0x521   : > { %v6662_v61 = vadd.f32 %v4309_v41, %v4308_v24 }
 0x522   : > { %2975 = vmatmul.mubr.bf16.gmra.mrb[116].mxu0 %v6591_v5  ;;  %3330 = vmatmul.mubr.bf16.gmra.mrb[52].mxu1 %v6574_v48 }
 0x523   : > { %2982 = vmatprep.mubr.bf16.mxu0 %v6595_v20  ;;  %3337 = vmatprep.mubr.bf16.mxu1 %v6576_v55 }
 0x524   : > { %5010 = vmatpush3.bf16.msra.mxu1 %v5566_v26 }
 0x525   : > { %5011 = vmatprep.subr.bf16.mxu1 %v5567_v37  ;;  %v4311_v33 = vpop.f32.mrb[12].mxu0 }
 0x526   : > { %v4312_v7 = vpop.f32.mrb[13].mxu0 }
 0x527   : > { %v6668_v1 = vadd.f32 %v4312_v7, %v4311_v33  ;;  %v4314_v8 = vpop.f32.mrb[14].mxu0 }
 0x528   : > { %5012 = vmatpush3.bf16.msra.mxu1 %v5567_v37  ;;  %v4315_v2 = vpop.f32.mrb[15].mxu0 }
 0x529   : > { %5013 = vmatprep.subr.bf16.mxu1 %v5568_v34  ;;  %v6670_v3 = vadd.f32 %v4315_v2, %v4314_v8 }
 0x52a   : > { %2983 = vmatmul.mubr.bf16.gmra.mrb[120].mxu0 %v6603_v32  ;;  %3338 = vmatmul.mubr.bf16.gmra.mrb[56].mxu1 %v6582_v62 }
 0x52b   : > { %2990 = vmatprep.mubr.bf16.mxu0 %v6607_v35  ;;  %3345 = vmatprep.mubr.bf16.mxu1 %v6584_v36 }
 0x52c   : > { %5014 = vmatpush3.bf16.msra.mxu1 %v5568_v34  ;;  %v2272_v34 = vld [vmem:[#allocation3 + $0xe1] sm:$0xff] }
 0x52d   : > { %v4373_v48 = vpop.f32.mrb[16].mxu1  ;;  %v4317_v55 = vpop.f32.mrb[16].mxu0  ;;  %5015 = vmatprep.subr.bf16.mxu1 %v5569_v4 }
 0x52e   : > { %v4374_v11 = vpop.f32.mrb[17].mxu1  ;;  %v4318_v14 = vpop.f32.mrb[17].mxu0 }
 0x52f   : > { %v4375_v39 = vadd.f32 %v4374_v11, %v4373_v48  ;;  %v4376_v38 = vpop.f32.mrb[18].mxu1  ;;  %v6676_v21 = vadd.f32 %v4318_v14, %v4317_v55  ;;  %v4320_v25 = vpop.f32.mrb[18].mxu0 }
 0x530   : > { %v4377_v27 = vpop.f32.mrb[19].mxu1  ;;  %v4321_v12 = vpop.f32.mrb[19].mxu0  ;;  %5016 = vmatpush3.bf16.msra.mxu1 %v5569_v4 }
 0x531   : > { %v6679_v62 = vadd.f32 %v4375_v39, %v6644_v31  ;;  %v4378_v0 = vadd.f32 %v4377_v27, %v4376_v38  ;;  %v6681_v36 = vadd.f32 %v4321_v12, %v4320_v25  ;;  %5017 = vmatprep.subr.bf16.mxu1 %v5570_v19  ;;  %v2251_v25 = vld [vmem:[#allocation3 + $0xd8] sm:$0xff]  ;;  %v2252_v27 = vld [vmem:[#allocation3 + $0xe0] sm:$0xff] }
 0x532   : > { %2991 = vmatmul.mubr.bf16.gmra.mrb[124].mxu0 %v6615_v16  ;;  %3346 = vmatmul.mubr.bf16.gmra.mrb[60].mxu1 %v6591_v5 }
 0x533   : > { %v6686_v23 = vadd.f32 %v4378_v0, %v6646_v45  ;;  %3353 = vmatprep.mubr.bf16.mxu1 %v6595_v20 }
 0x534   : > { %5018 = vmatpush3.bf16.msra.mxu1 %v5570_v19 }
 0x535   : > { %v4379_v29 = vpop.f32.mrb[20].mxu1  ;;  %v4323_v50 = vpop.f32.mrb[20].mxu0  ;;  %5019 = vmatprep.subr.bf16.mxu1 %v5571_v28 }
 0x536   : > { %v4380_v49 = vpop.f32.mrb[21].mxu1  ;;  %v4324_v30 = vpop.f32.mrb[21].mxu0 }
 0x537   : > { %v4381_v31 = vadd.f32 %v4380_v49, %v4379_v29  ;;  %v4382_v40 = vpop.f32.mrb[22].mxu1  ;;  %v6689_v10 = vadd.f32 %v4324_v30, %v4323_v50  ;;  %v4326_v44 = vpop.f32.mrb[22].mxu0  ;;  %v2320_v50 = vpack.c.bf16 %v2252_v27, %v2251_v25 }
 0x538   : > { %v4383_v46 = vpop.f32.mrb[23].mxu1  ;;  %v4327_v47 = vpop.f32.mrb[23].mxu0  ;;  %5020 = vmatpush3.bf16.msra.mxu1 %v5571_v28 }
 0x539   : > { %v6692_v5 = vadd.f32 %v4381_v31, %v6652_v52  ;;  %v4384_v45 = vadd.f32 %v4383_v46, %v4382_v40  ;;  %v6694_v18 = vadd.f32 %v4327_v47, %v4326_v44 }
 0x53a   : > { %3354 = vmatmul.mubr.bf16.gmra.mrb[64].mxu1 %v6603_v32 }
 0x53b   : > { %v6698_v20 = vadd.f32 %v4384_v45, %v6654_v22  ;;  %3361 = vmatprep.mubr.bf16.mxu1 %v6607_v35  ;;  %v2271_v22 = vld [vmem:[#allocation3 + $0xd9] sm:$0xff] }
 0x53c   : > { %v2321_v11 = vpack.c.bf16 %v2272_v34, %v2271_v22 }
 0x53d   : > { %v4385_v51 = vpop.f32.mrb[24].mxu1  ;;  %v4329_v9 = vpop.f32.mrb[24].mxu0 }
 0x53e   : > { %v4386_v54 = vpop.f32.mrb[25].mxu1  ;;  %v4330_v56 = vpop.f32.mrb[25].mxu0 }
 0x53f   : > { %v4387_v26 = vadd.f32 %v4386_v54, %v4385_v51  ;;  %v4388_v58 = vpop.f32.mrb[26].mxu1  ;;  %v6701_v59 = vadd.f32 %v4330_v56, %v4329_v9  ;;  %v4332_v52 = vpop.f32.mrb[26].mxu0 }
 0x540   : > { %v4389_v24 = vpop.f32.mrb[27].mxu1  ;;  %v4333_v41 = vpop.f32.mrb[27].mxu0 }
 0x541   : > { %v6704_v37 = vadd.f32 %v4387_v26, %v6660_v60  ;;  %v4390_v32 = vadd.f32 %v4389_v24, %v4388_v58  ;;  %v6706_v33 = vadd.f32 %v4333_v41, %v4332_v52 }
 0x542   : > { %3362 = vmatmul.mubr.bf16.gmra.mrb[68].mxu1 %v6615_v16 }
 0x543   : > { %v6710_v35 = vadd.f32 %v4390_v32, %v6662_v61  ;;  %3369 = vmatprep.mubr.bf16.mxu1 %v6619_v53 }
 0x545   : > { %v4391_v7 = vpop.f32.mrb[28].mxu1  ;;  %v4335_v8 = vpop.f32.mrb[28].mxu0 }
 0x546   : > { %v4392_v2 = vpop.f32.mrb[29].mxu1  ;;  %v4336_v4 = vpop.f32.mrb[29].mxu0 }
 0x547   : > { %v4393_v48 = vadd.f32 %v4392_v2, %v4391_v7  ;;  %v4394_v55 = vpop.f32.mrb[30].mxu1  ;;  %v6713_v60 = vadd.f32 %v4336_v4, %v4335_v8  ;;  %v4338_v19 = vpop.f32.mrb[30].mxu0 }
 0x548   : > { %v4395_v14 = vpop.f32.mrb[31].mxu1  ;;  %v4339_v39 = vpop.f32.mrb[31].mxu0 }
 0x549   : > { %v6716_v16 = vadd.f32 %v4393_v48, %v6668_v1  ;;  %v4396_v61 = vadd.f32 %v4395_v14, %v4394_v55  ;;  %v6718_v38 = vadd.f32 %v4339_v39, %v4338_v19 }
 0x54a   : > { %3370 = vmatmul.mubr.bf16.gmra.mrb[72].mxu1 %v6627_v63 }
 0x54b   : > { %v6722_v53 = vadd.f32 %v4396_v61, %v6670_v3  ;;  %3377 = vmatprep.mubr.bf16.mxu1 %v2321_v11 }
 0x54d   : > { %v4397_v12 = vpop.f32.mrb[32].mxu1  ;;  %v4453_v0 = vpop.f32.mrb[32].mxu0 }
 0x54e   : > { %v4398_v28 = vpop.f32.mrb[33].mxu1  ;;  %v4454_v29 = vpop.f32.mrb[33].mxu0 }
 0x54f   : > { %v4399_v49 = vadd.f32 %v4398_v28, %v4397_v12  ;;  %v4455_v30 = vadd.f32 %v4454_v29, %v4453_v0  ;;  %v4400_v1 = vpop.f32.mrb[34].mxu1  ;;  %v4456_v31 = vpop.f32.mrb[34].mxu0 }
 0x550   : > { %v4401_v40 = vpop.f32.mrb[35].mxu1  ;;  %v4457_v44 = vpop.f32.mrb[35].mxu0 }
 0x551   : > { %v6725_v46 = vadd.f32 %v4399_v49, %v6676_v21  ;;  %v6728_v63 = vadd.f32 %v6679_v62, %v4455_v30  ;;  %v4402_v3 = vadd.f32 %v4401_v40, %v4400_v1  ;;  %v4458_v47 = vadd.f32 %v4457_v44, %v4456_v31  ;;  %v2291_v1 = vld [vmem:[#allocation3 + $0xda] sm:$0xff]  ;;  %v2292_v31 = vld [vmem:[#allocation3 + $0xe2] sm:$0xff] }
 0x552   : > { %3378 = vmatmul.mubr.bf16.gmra.mrb[76].mxu1 %v2320_v50 }
 0x553   : > { %v6731_v45 = vadd.f32 %v4402_v3, %v6681_v36  ;;  %v6734_v51 = vadd.f32 %v6686_v23, %v4458_v47  ;;  %5021 = vmatprep.mubr.bf16.mxu1 %v6593_v6  ;;  %v2322_v3 = vpack.c.bf16 %v2292_v31, %v2291_v1 }
 0x555   : > { %v4403_v9 = vpop.f32.mrb[36].mxu1  ;;  %v4459_v54 = vpop.f32.mrb[36].mxu0 }
 0x556   : > { %v4404_v56 = vpop.f32.mrb[37].mxu1  ;;  %v4460_v26 = vpop.f32.mrb[37].mxu0 }
 0x557   : > { %v4405_v21 = vadd.f32 %v4404_v56, %v4403_v9  ;;  %v4461_v58 = vadd.f32 %v4460_v26, %v4459_v54  ;;  %v4406_v52 = vpop.f32.mrb[38].mxu1  ;;  %v4462_v62 = vpop.f32.mrb[38].mxu0 }
 0x558   : > { %v4407_v24 = vpop.f32.mrb[39].mxu1  ;;  %v4463_v41 = vpop.f32.mrb[39].mxu0 }
 0x559   : > { %v5133_v32 = vadd.f32 %v4405_v21, %v6689_v10  ;;  %v6739_v36 = vadd.f32 %v6692_v5, %v4461_v58  ;;  %v4408_v22 = vadd.f32 %v4407_v24, %v4406_v52  ;;  %v4464_v23 = vadd.f32 %v4463_v41, %v4462_v62  ;;  %v5572_v62 = vld [vmem:[#allocation13] sm:$0xff]  }
 0x55a   : > { %5022 = vmatmul.mubr.bf16.vlgmr.msra.gmra.mrb[0].mxu1 %v6597_v13  ;;  %5037 = vmatprep.subr.bf16.mxu0 %v5572_v62 }
 0x55b   : > { %v5145_v6 = vadd.f32 %v4408_v22, %v6694_v18  ;;  %v6744_v34 = vadd.f32 %v6698_v20, %v4464_v23  ;;  %5025 = vmatprep.mubr.bf16.mxu1 %v6605_v57  ;;  %5038 = vmatpush3.bf16.msra.mxu0 %v5572_v62 }
 0x55d   : > { %v4409_v7 = vpop.f32.mrb[40].mxu1  ;;  %v4465_v8 = vpop.f32.mrb[40].mxu0 }
 0x55e   : > { %v4410_v2 = vpop.f32.mrb[41].mxu1  ;;  %v4466_v4 = vpop.f32.mrb[41].mxu0 }
 0x55f   : > { %v4411_v48 = vadd.f32 %v4410_v2, %v4409_v7  ;;  %v4467_v10 = vadd.f32 %v4466_v4, %v4465_v8  ;;  %v4412_v55 = vpop.f32.mrb[42].mxu1  ;;  %v4468_v5 = vpop.f32.mrb[42].mxu0  ;;  %v5573_v2 = vld [vmem:[#allocation13 + $0x8] sm:$0xff]  }
 0x560   : > { %v4413_v19 = vpop.f32.mrb[43].mxu1  ;;  %v4469_v11 = vpop.f32.mrb[43].mxu0  ;;  %5039 = vmatprep.subr.bf16.mxu0 %v5573_v2 }
 0x561   : > { %v5163_v14 = vadd.f32 %v4411_v48, %v6701_v59  ;;  %v6749_v13 = vadd.f32 %v6704_v37, %v4467_v10  ;;  %v4414_v18 = vadd.f32 %v4413_v19, %v4412_v55  ;;  %v4470_v20 = vadd.f32 %v4469_v11, %v4468_v5  ;;  %5040 = vmatpush3.bf16.msra.mxu0 %v5573_v2  ;;  %v5574_v11 = vld [vmem:[#allocation13 + $0x10] sm:$0xff]  }
 0x562   : > { %5026 = vmatmul.mubr.bf16.gmra.mrb[4].mxu1 %v6609_v43  ;;  %5041 = vmatprep.subr.bf16.mxu0 %v5574_v11 }
 0x563   : > { %v5175_v57 = vadd.f32 %v4414_v18, %v6706_v33  ;;  %v6754_v39 = vadd.f32 %v6710_v35, %v4470_v20  ;;  %5029 = vmatprep.mubr.bf16.mxu1 %v6617_v17 }
 0x565   : > { %v4415_v61 = vpop.f32.mrb[44].mxu1  ;;  %v4471_v25 = vpop.f32.mrb[44].mxu0  ;;  %5042 = vmatpush3.bf16.msra.mxu0 %v5574_v11 }
 0x566   : > { %v4416_v27 = vpop.f32.mrb[45].mxu1  ;;  %v4472_v12 = vpop.f32.mrb[45].mxu0 }
 0x567   : > { %v4417_v0 = vadd.f32 %v4416_v27, %v4415_v61  ;;  %v4473_v59 = vadd.f32 %v4472_v12, %v4471_v25  ;;  %v4418_v28 = vpop.f32.mrb[46].mxu1  ;;  %v4474_v37 = vpop.f32.mrb[46].mxu0  ;;  %v5575_v12 = vld [vmem:[#allocation13 + $0x18] sm:$0xff]  }
 0x568   : > { %v4419_v29 = vpop.f32.mrb[47].mxu1  ;;  %v4475_v50 = vpop.f32.mrb[47].mxu0  ;;  %5043 = vmatprep.subr.bf16.mxu0 %v5575_v12 }
 0x569   : > { %v5157_v49 = vadd.f32 %v4417_v0, %v6713_v60  ;;  %v6759_v43 = vadd.f32 %v6716_v16, %v4473_v59  ;;  %v4420_v33 = vadd.f32 %v4419_v29, %v4418_v28  ;;  %v4476_v35 = vadd.f32 %v4475_v50, %v4474_v37  ;;  %5044 = vmatpush3.bf16.msra.mxu0 %v5575_v12 }
 0x56a   : > { %5030 = vmatmul.mubr.bf16.gmra.mrb[8].mxu1 %v6621_v15 }
 0x56b   : > { %v5169_v17 = vadd.f32 %v4420_v33, %v6718_v38  ;;  %v6764_v30 = vadd.f32 %v6722_v53, %v4476_v35  ;;  %5033 = vmatprep.mubr.bf16.mxu1 %v6629_v42  ;;  %v5576_v35 = vld [vmem:[#allocation13 + $0x20] sm:$0xff]  }
 0x56c   : > { %5045 = vmatprep.subr.bf16.mxu0 %v5576_v35 }
 0x56d   : > { %v4477_v40 = vpop.f32.mrb[48].mxu0  ;;  %5046 = vmatpush3.bf16.msra.mxu0 %v5576_v35 }
 0x56e   : > { %v4478_v44 = vpop.f32.mrb[49].mxu0 }
 0x56f   : > { %v4479_v60 = vadd.f32 %v4478_v44, %v4477_v40  ;;  %v4480_v47 = vpop.f32.mrb[50].mxu0 }
 0x570   : > { %v4481_v16 = vpop.f32.mrb[51].mxu0 }
 0x571   : > { %v6768_v9 = vadd.f32 %v6725_v46, %v4479_v60  ;;  %v4482_v54 = vadd.f32 %v4481_v16, %v4480_v47  ;;  %v5577_v60 = vld [vmem:[#allocation13 + $0x28] sm:$0xff]  }
 0x572   : > { %5034 = vmatmul.mubr.bf16.gmra.mrb[12].mxu1 %v2322_v3  ;;  %5047 = vmatprep.subr.bf16.mxu0 %v5577_v60 }
 0x573   : > { %v6771_v15 = vadd.f32 %v6731_v45, %v4482_v54  ;;  %5048 = vmatpush3.bf16.msra.mxu0 %v5577_v60 }
 0x575   : > { %v4483_v38 = vpop.f32.mrb[52].mxu0 }
 0x576   : > { %v4484_v53 = vpop.f32.mrb[53].mxu0 }
 0x577   : > { %v4485_v56 = vadd.f32 %v4484_v53, %v4483_v38  ;;  %v4486_v42 = vpop.f32.mrb[54].mxu0 }
 0x578   : > { %v4487_v26 = vpop.f32.mrb[55].mxu0 }
 0x579   : > { %v6773_v21 = vadd.f32 %v5133_v32, %v4485_v56  ;;  %v4488_v58 = vadd.f32 %v4487_v26, %v4486_v42  ;;  %v5578_v42 = vld [vmem:[#allocation13 + $0x30] sm:$0xff]  }
 0x57a   : > { %5049 = vmatprep.subr.bf16.mxu0 %v5578_v42 }
 0x57b   : > { %v6775_v52 = vadd.f32 %v5145_v6, %v4488_v58  ;;  %5050 = vmatpush3.bf16.msra.mxu0 %v5578_v42 }
 0x57d   : > { %v4489_v24 = vpop.f32.mrb[56].mxu0 }
 0x57e   : > { %v4490_v46 = vpop.f32.mrb[57].mxu0 }
 0x57f   : > { %v4491_v41 = vadd.f32 %v4490_v46, %v4489_v24  ;;  %v4492_v22 = vpop.f32.mrb[58].mxu0 }
 0x580   : > { %v4493_v23 = vpop.f32.mrb[59].mxu0 }
 0x581   : > { %v6777_v45 = vadd.f32 %v5163_v14, %v4491_v41  ;;  %v4494_v7 = vadd.f32 %v4493_v23, %v4492_v22  ;;  %v5579_v23 = vld [vmem:[#allocation13 + $0x38] sm:$0xff]  }
 0x582   : > { %5051 = vmatprep.subr.bf16.mxu0 %v5579_v23 }
 0x583   : > { %v6779_v8 = vadd.f32 %v5175_v57, %v4494_v7  ;;  %5052 = vmatpush3.bf16.msra.mxu0 %v5579_v23 }
 0x585   : > { %v4495_v4 = vpop.f32.mrb[60].mxu0 }
 0x586   : > { %v4496_v32 = vpop.f32.mrb[61].mxu0 }
 0x587   : > { %v4497_v6 = vadd.f32 %v4496_v32, %v4495_v4  ;;  %v4498_v48 = vpop.f32.mrb[62].mxu0 }
 0x588   : > { %v4499_v10 = vpop.f32.mrb[63].mxu0 }
 0x589   : > { %v6781_v55 = vadd.f32 %v5157_v49, %v4497_v6  ;;  %v4500_v5 = vadd.f32 %v4499_v10, %v4498_v48 }
 0x58b   : > { %v6783_v19 = vadd.f32 %v5169_v17, %v4500_v5 }
 0x58d   : > { %v4533_v18 = vpop.f32.mrb[64].mxu0 }
 0x58e   : > { %v4534_v14 = vpop.f32.mrb[65].mxu0 }
 0x58f   : > { %v4535_v20 = vadd.f32 %v4534_v14, %v4533_v18  ;;  %v4536_v57 = vpop.f32.mrb[66].mxu0 }
 0x590   : > { %v4537_v61 = vpop.f32.mrb[67].mxu0 }
 0x591   : > { %v6786_v25 = vadd.f32 %v6728_v63, %v4535_v20  ;;  %v4538_v27 = vadd.f32 %v4537_v61, %v4536_v57 }
 0x593   : > { %v6789_v0 = vadd.f32 %v6734_v51, %v4538_v27 }
 0x595   : > { %v4539_v59 = vpop.f32.mrb[68].mxu0 }
 0x596   : > { %v4540_v28 = vpop.f32.mrb[69].mxu0 }
 0x597   : > { %v4541_v37 = vadd.f32 %v4540_v28, %v4539_v59  ;;  %v4542_v29 = vpop.f32.mrb[70].mxu0 }
 0x598   : > { %v4543_v50 = vpop.f32.mrb[71].mxu0 }
 0x599   : > { %v6792_v49 = vadd.f32 %v6739_v36, %v4541_v37  ;;  %v4544_v33 = vadd.f32 %v4543_v50, %v4542_v29 }
 0x59b   : > { %v6795_v63 = vadd.f32 %v6744_v34, %v4544_v33 }
 0x59d   : > { %v4545_v17 = vpop.f32.mrb[72].mxu0 }
 0x59e   : > { %v4546_v51 = vpop.f32.mrb[73].mxu0 }
 0x59f   : > { %v4547_v1 = vadd.f32 %v4546_v51, %v4545_v17  ;;  %v4548_v31 = vpop.f32.mrb[74].mxu0 }
 0x5a0   : > { %v4549_v40 = vpop.f32.mrb[75].mxu0 }
 0x5a1   : > { %v6798_v44 = vadd.f32 %v6749_v13, %v4547_v1  ;;  %v4550_v3 = vadd.f32 %v4549_v40, %v4548_v31 }
 0x5a3   : > { %v6801_v36 = vadd.f32 %v6754_v39, %v4550_v3 }
 0x5a5   : > { %v4551_v47 = vpop.f32.mrb[76].mxu0 }
 0x5a6   : > { %v4552_v34 = vpop.f32.mrb[77].mxu0 }
 0x5a7   : > { %v4553_v16 = vadd.f32 %v4552_v34, %v4551_v47  ;;  %v4554_v54 = vpop.f32.mrb[78].mxu0 }
 0x5a8   : > { %v4555_v38 = vpop.f32.mrb[79].mxu0 }
 0x5a9   : > { %v6804_v53 = vadd.f32 %v6759_v43, %v4553_v16  ;;  %v4556_v56 = vadd.f32 %v4555_v38, %v4554_v54 }
 0x5ab   : > { %v6807_v13 = vadd.f32 %v6764_v30, %v4556_v56 }
 0x5ad   : > { %v4557_v26 = vpop.f32.mrb[80].mxu0 }
 0x5ae   : > { %v4558_v39 = vpop.f32.mrb[81].mxu0 }
 0x5af   : > { %v4559_v58 = vadd.f32 %v4558_v39, %v4557_v26  ;;  %v4560_v62 = vpop.f32.mrb[82].mxu0 }
 0x5b0   : > { %v4561_v24 = vpop.f32.mrb[83].mxu0 }
 0x5b1   : > { %v6810_v46 = vadd.f32 %v6768_v9, %v4559_v58  ;;  %v4562_v41 = vadd.f32 %v4561_v24, %v4560_v62 }
 0x5b3   : > { %v6813_v22 = vadd.f32 %v6771_v15, %v4562_v41 }
 0x5b5   : > { %v4563_v43 = vpop.f32.mrb[84].mxu0 }
 0x5b6   : > { %v4564_v7 = vpop.f32.mrb[85].mxu0 }
 0x5b7   : > { %v4565_v2 = vadd.f32 %v4564_v7, %v4563_v43  ;;  %v4566_v30 = vpop.f32.mrb[86].mxu0 }
 0x5b8   : > { %v4567_v4 = vpop.f32.mrb[87].mxu0 }
 0x5b9   : > { %v6816_v32 = vadd.f32 %v6773_v21, %v4565_v2  ;;  %v4568_v6 = vadd.f32 %v4567_v4, %v4566_v30 }
 0x5bb   : > { %v6819_v48 = vadd.f32 %v6775_v52, %v4568_v6 }
 0x5bd   : > { %v4569_v9 = vpop.f32.mrb[88].mxu0 }
 0x5be   : > { %v4570_v10 = vpop.f32.mrb[89].mxu0 }
 0x5bf   : > { %v4571_v5 = vadd.f32 %v4570_v10, %v4569_v9  ;;  %v4572_v15 = vpop.f32.mrb[90].mxu0 }
 0x5c0   : > { %v4573_v11 = vpop.f32.mrb[91].mxu0 }
 0x5c1   : > { %v6822_v18 = vadd.f32 %v6777_v45, %v4571_v5  ;;  %v4574_v14 = vadd.f32 %v4573_v11, %v4572_v15 }
 0x5c3   : > { %v6825_v20 = vadd.f32 %v6779_v8, %v4574_v14 }
 0x5c5   : > { %v4575_v57 = vpop.f32.mrb[92].mxu0 }
 0x5c6   : > { %v4576_v61 = vpop.f32.mrb[93].mxu0 }
 0x5c7   : > { %v4577_v21 = vadd.f32 %v4576_v61, %v4575_v57  ;;  %v4578_v27 = vpop.f32.mrb[94].mxu0 }
 0x5c8   : > { %v4579_v12 = vpop.f32.mrb[95].mxu0 }
 0x5c9   : > { %v6828_v52 = vadd.f32 %v6781_v55, %v4577_v21  ;;  %v4580_v59 = vadd.f32 %v4579_v12, %v4578_v27 }
 0x5cb   : > { %v6831_v28 = vadd.f32 %v6783_v19, %v4580_v59 }
 0x5cd   : > { %v4613_v37 = vpop.f32.mrb[96].mxu0 }
 0x5ce   : > { %v4614_v29 = vpop.f32.mrb[97].mxu0 }
 0x5cf   : > { %v4615_v45 = vadd.f32 %v4614_v29, %v4613_v37  ;;  %v4616_v50 = vpop.f32.mrb[98].mxu0 }
 0x5d0   : > { %v4617_v33 = vpop.f32.mrb[99].mxu0 }
 0x5d1   : > { %v5094_v8 = vadd.f32 %v6786_v25, %v4615_v45  ;;  %v4618_v35 = vadd.f32 %v4617_v33, %v4616_v50 }
 0x5d3   : > { %v5106_v17 = vadd.f32 %v6789_v0, %v4618_v35 }
 0x5d5   : > { %v4619_v51 = vpop.f32.mrb[100].mxu0 }
 0x5d6   : > { %v4620_v1 = vpop.f32.mrb[101].mxu0 }
 0x5d7   : > { %v4621_v31 = vadd.f32 %v4620_v1, %v4619_v51  ;;  %v4622_v40 = vpop.f32.mrb[102].mxu0 }
 0x5d8   : > { %v4623_v55 = vpop.f32.mrb[103].mxu0 }
 0x5d9   : > { %v5088_v3 = vadd.f32 %v6792_v49, %v4621_v31  ;;  %v4624_v60 = vadd.f32 %v4623_v55, %v4622_v40 }
 0x5db   : > { %v5100_v19 = vadd.f32 %v6795_v63, %v4624_v60 }
 0x5dd   : > { %v4625_v47 = vpop.f32.mrb[104].mxu0 }
 0x5de   : > { %v4626_v34 = vpop.f32.mrb[105].mxu0 }
 0x5df   : > { %v4627_v16 = vadd.f32 %v4626_v34, %v4625_v47  ;;  %v4628_v54 = vpop.f32.mrb[106].mxu0 }
 0x5e0   : > { %v4629_v38 = vpop.f32.mrb[107].mxu0 }
 0x5e1   : > { %v5118_v25 = vadd.f32 %v6798_v44, %v4627_v16  ;;  %v4630_v56 = vadd.f32 %v4629_v38, %v4628_v54 }
 0x5e3   : > { %v5130_v0 = vadd.f32 %v6801_v36, %v4630_v56 }
 0x5e5   : > { %v4631_v42 = vpop.f32.mrb[108].mxu0 }
 0x5e6   : > { %v4632_v26 = vpop.f32.mrb[109].mxu0 }
 0x5e7   : > { %v4633_v39 = vadd.f32 %v4632_v26, %v4631_v42  ;;  %v4634_v58 = vpop.f32.mrb[110].mxu0 }
 0x5e8   : > { %v4635_v62 = vpop.f32.mrb[111].mxu0 }
 0x5e9   : > { %v6840_v49 = vadd.f32 %v6804_v53, %v4633_v39  ;;  %v4636_v24 = vadd.f32 %v4635_v62, %v4634_v58 }
 0x5eb   : > { %v6843_v63 = vadd.f32 %v6807_v13, %v4636_v24 }
 0x5ed   : > { %v4637_v41 = vpop.f32.mrb[112].mxu0  ;;  %v4693_v43 = vpop.f32.mrb[48].mxu1 }
 0x5ee   : > { %v4638_v23 = vpop.f32.mrb[113].mxu0  ;;  %v4694_v7 = vpop.f32.mrb[49].mxu1 }
 0x5ef   : > { %v4639_v44 = vadd.f32 %v4638_v23, %v4637_v41  ;;  %v4695_v2 = vadd.f32 %v4694_v7, %v4693_v43  ;;  %v4640_v30 = vpop.f32.mrb[114].mxu0  ;;  %v4696_v36 = vpop.f32.mrb[50].mxu1 }
 0x5f0   : > { %v4641_v4 = vpop.f32.mrb[115].mxu0  ;;  %v4697_v6 = vpop.f32.mrb[51].mxu1 }
 0x5f1   : > { %v5142_v9 = vadd.f32 %v6810_v46, %v4639_v44  ;;  %v4642_v10 = vadd.f32 %v4641_v4, %v4640_v30  ;;  %v4698_v5 = vadd.f32 %v4697_v6, %v4696_v36  ;;  %v6846_v53 = vadd.f32 %v5094_v8, %v4695_v2 }
 0x5f3   : > { %v5154_v15 = vadd.f32 %v6813_v22, %v4642_v10  ;;  %v6849_v13 = vadd.f32 %v5106_v17, %v4698_v5 }
 0x5f5   : > { %v4643_v11 = vpop.f32.mrb[116].mxu0  ;;  %v4699_v14 = vpop.f32.mrb[52].mxu1 }
 0x5f6   : > { %v4644_v57 = vpop.f32.mrb[117].mxu0  ;;  %v4700_v61 = vpop.f32.mrb[53].mxu1 }
 0x5f7   : > { %v4645_v21 = vadd.f32 %v4644_v57, %v4643_v11  ;;  %v4701_v27 = vadd.f32 %v4700_v61, %v4699_v14  ;;  %v4646_v12 = vpop.f32.mrb[118].mxu0  ;;  %v4702_v59 = vpop.f32.mrb[54].mxu1 }
 0x5f8   : > { %v4647_v37 = vpop.f32.mrb[119].mxu0  ;;  %v4703_v29 = vpop.f32.mrb[55].mxu1 }
 0x5f9   : > { %v5136_v46 = vadd.f32 %v6816_v32, %v4645_v21  ;;  %v4648_v45 = vadd.f32 %v4647_v37, %v4646_v12  ;;  %v4704_v50 = vadd.f32 %v4703_v29, %v4702_v59  ;;  %v6852_v33 = vadd.f32 %v5088_v3, %v4701_v27 }
 0x5fb   : > { %v5148_v22 = vadd.f32 %v6819_v48, %v4648_v45  ;;  %v6855_v8 = vadd.f32 %v5100_v19, %v4704_v50 }
 0x5fd   : > { %v4649_v35 = vpop.f32.mrb[120].mxu0  ;;  %v4705_v17 = vpop.f32.mrb[56].mxu1 }
 0x5fe   : > { %v4650_v51 = vpop.f32.mrb[121].mxu0  ;;  %v4706_v1 = vpop.f32.mrb[57].mxu1 }
 0x5ff   : > { %v4651_v31 = vadd.f32 %v4650_v51, %v4649_v35  ;;  %v4707_v40 = vadd.f32 %v4706_v1, %v4705_v17  ;;  %v4652_v55 = vpop.f32.mrb[122].mxu0  ;;  %v4708_v60 = vpop.f32.mrb[58].mxu1 }
 0x600   : > { %v4653_v47 = vpop.f32.mrb[123].mxu0  ;;  %v4709_v34 = vpop.f32.mrb[59].mxu1 }
 0x601   : > { %v5166_v32 = vadd.f32 %v6822_v18, %v4651_v31  ;;  %v4654_v16 = vadd.f32 %v4653_v47, %v4652_v55  ;;  %v4710_v54 = vadd.f32 %v4709_v34, %v4708_v60  ;;  %v6858_v3 = vadd.f32 %v5118_v25, %v4707_v40  ;;  %v6888_v40 = vld [vmem:[%s7099_s10] ss:$0 sm:$0xff]  ;;  %s5752_s10 = scalar_lea.vmem %s6963_s0, 2048 }
 0x602   : > { %p5753_p1 = scmp.ne.s32.totalorder %s6963_s0, %s5752_s10 }
 0x603   : > { %v5178_v48 = vadd.f32 %v6825_v20, %v4654_v16  ;;  %v6861_v19 = vadd.f32 %v5130_v0, %v4710_v54 }
 0x604   : > { %p5754_p9 = pnand %p5753_p1, %p7106_p3 }
 0x605   : > { %v4655_v38 = vpop.f32.mrb[124].mxu0  ;;  %v4711_v56 = vpop.f32.mrb[60].mxu1 }
 0x606   : > { %v4656_v42 = vpop.f32.mrb[125].mxu0  ;;  %v4712_v26 = vpop.f32.mrb[61].mxu1  ;;  %p5755_p13 = pneg %p5754_p9 }
 0x607   : > { %v4657_v39 = vadd.f32 %v4656_v42, %v4655_v38  ;;  %v4713_v58 = vadd.f32 %v4712_v26, %v4711_v56  ;;  %v4658_v62 = vpop.f32.mrb[126].mxu0  ;;  %v4714_v24 = vpop.f32.mrb[62].mxu1 }
 0x608   : > { %v4659_v41 = vpop.f32.mrb[127].mxu0  ;;  %v4715_v43 = vpop.f32.mrb[63].mxu1 }
 0x609   : > { %v5160_v18 = vadd.f32 %v6828_v52, %v4657_v39  ;;  %v4660_v23 = vadd.f32 %v4659_v41, %v4658_v62  ;;  %v4716_v7 = vadd.f32 %v4715_v43, %v4714_v24  ;;  %v5113_v25 = vadd.f32 %v6840_v49, %v4713_v58 }
 0x60b   : > { %v5172_v20 = vadd.f32 %v6831_v28, %v4660_v23  ;;  %v6867_v0 = vadd.f32 %v6843_v63, %v4716_v7 }
 0x60d   : > { %v4717_v44 = vpop.f32.mrb[64].mxu1 }
 0x60e   : > { %v4718_v2 = vpop.f32.mrb[65].mxu1 }
 0x60f   : > { %v4719_v30 = vadd.f32 %v4718_v2, %v4717_v44  ;;  %v4720_v36 = vpop.f32.mrb[66].mxu1 }
 0x610   : > { %v4721_v4 = vpop.f32.mrb[67].mxu1 }
 0x611   : > { %v4722_v6 = vadd.f32 %v4721_v4, %v4720_v36  ;;  %v6869_v10 = vadd.f32 %v5142_v9, %v4719_v30 }
 0x613   : > { %v6871_v5 = vadd.f32 %v5154_v15, %v4722_v6 }
 0x615   : > { %v4723_v52 = vpop.f32.mrb[68].mxu1 }
 0x616   : > { %v4724_v11 = vpop.f32.mrb[69].mxu1 }
 0x617   : > { %v4725_v14 = vadd.f32 %v4724_v11, %v4723_v52  ;;  %v4726_v57 = vpop.f32.mrb[70].mxu1 }
 0x618   : > { %v4727_v49 = vpop.f32.mrb[71].mxu1 }
 0x619   : > { %v4728_v61 = vadd.f32 %v4727_v49, %v4726_v57  ;;  %v6873_v28 = vadd.f32 %v5136_v46, %v4725_v14 }
 0x61b   : > { %v6875_v63 = vadd.f32 %v5148_v22, %v4728_v61 }
 0x61d   : > { %v4729_v21 = vpop.f32.mrb[72].mxu1 }
 0x61e   : > { %v4730_v27 = vpop.f32.mrb[73].mxu1 }
 0x61f   : > { %v4731_v12 = vadd.f32 %v4730_v27, %v4729_v21  ;;  %v4732_v59 = vpop.f32.mrb[74].mxu1 }
 0x620   : > { %v4733_v37 = vpop.f32.mrb[75].mxu1 }
 0x621   : > { %v4734_v29 = vadd.f32 %v4733_v37, %v4732_v59  ;;  %v6877_v9 = vadd.f32 %v5166_v32, %v4731_v12 }
 0x623   : > { %v6879_v15 = vadd.f32 %v5178_v48, %v4734_v29 }
 0x625   : > { %v4735_v45 = vpop.f32.mrb[76].mxu1 }
 0x626   : > { %v4736_v50 = vpop.f32.mrb[77].mxu1 }
 0x627   : > { %v4737_v35 = vadd.f32 %v4736_v50, %v4735_v45  ;;  %v4738_v17 = vpop.f32.mrb[78].mxu1 }
 0x628   : > { %v4739_v51 = vpop.f32.mrb[79].mxu1 }
 0x629   : > { %v4740_v1 = vadd.f32 %v4739_v51, %v4738_v17  ;;  %v6881_v46 = vadd.f32 %v5160_v18, %v4737_v35 }
 0x62b   : > { %v6883_v22 = vadd.f32 %v5172_v20, %v4740_v1 }
 0x62d   : > { %v5023_v31 = vpop.f32.mrb[0].mxu1 }
 0x62e   : > { %v5090_v55 = vadd.f32 %v6852_v33, %v5023_v31  ;;  %v3420_v60 = vpop.f32.mrb[1].mxu1 }
 0x62f   : > { %v5096_v47 = vadd.f32 %v6846_v53, %v3420_v60  ;;  %v5024_v34 = vpop.f32.mrb[2].mxu1 }
 0x630   : > { %v3524_v32 = vadd.f32 %v5090_v55, %v6888_v40  ;;  %v5102_v16 = vadd.f32 %v6855_v8, %v5024_v34  ;;  %v3423_v54 = vpop.f32.mrb[3].mxu1 }
 0x631   : > { %v3522_v48 = vadd.f32 %v5096_v47, %v6888_v40  ;;  %v5108_v38 = vadd.f32 %v6849_v13, %v3423_v54 }
 0x632   : > { %v3556_v56 = vmul.f32 0.2, %v3524_v32  ;;  %v3525_v42 = vadd.f32 %v5102_v16, %v6888_v40  ;;  %vm3540_vm6 = vcmp.ge.f32.partialorder %v3524_v32, 0.0 }
 0x633   : > { %v3554_v26 = vmul.f32 0.2, %v3522_v48  ;;  %v3523_v33 = vadd.f32 %v5108_v38, %v6888_v40  ;;  %vm3538_vm7 = vcmp.ge.f32.partialorder %v3522_v48, 0.0 }
 0x634   : > { %vm3541_vm8 = vcmp.ge.f32.partialorder %v3525_v42, 0.0  ;;  %v3557_v53 = vmul.f32 0.2, %v3525_v42  ;;  %v3572_v62 = vsel %vm3540_vm6, %v3524_v32, %v3556_v56 }
 0x635   : > { %vm3539_vm9 = vcmp.ge.f32.partialorder %v3523_v33, 0.0  ;;  %v3555_v39 = vmul.f32 0.2, %v3523_v33  ;;  %v5027_v58 = vpop.f32.mrb[4].mxu1  ;;  %v3570_v23 = vsel %vm3538_vm7, %v3522_v48, %v3554_v26 }
 0x636   : > { %v3573_v8 = vsel %vm3541_vm8, %v3525_v42, %v3557_v53  ;;  %v5114_v24 = vadd.f32 %v5113_v25, %v5027_v58  ;;  %v3436_v41 = vpop.f32.mrb[5].mxu1 }
 0x637   : > { %v3587_v43 = vpack.c.bf16 %v3573_v8, %v3572_v62  ;;  %v5120_v13 = vadd.f32 %v6858_v3, %v3436_v41  ;;  %v5028_v18 = vpop.f32.mrb[6].mxu1  ;;  %v3571_v7 = vsel %vm3539_vm9, %v3523_v33, %v3555_v39 }
 0x638   : > { %v3528_v20 = vadd.f32 %v5114_v24, %v6888_v40  ;;  %v5126_v44 = vadd.f32 %v6867_v0, %v5028_v18  ;;  %v3439_v2 = vpop.f32.mrb[7].mxu1  ;;  %v3586_v30 = vpack.c.bf16 %v3571_v7, %v3570_v23  ;;  %v6924_v7 = vld [vmem:[%s7100_s21] ss:$0 sm:$0xff]  ;;  %s5758_s21 = scalar_lea.vmem %s5757_s22, 4096 }
 0x639   : > { %v3526_v36 = vadd.f32 %v5120_v13, %v6888_v40  ;;  %v5132_v4 = vadd.f32 %v6861_v19, %v3439_v2  ;;  %p5760_p11 = scmp.lt.s32.totalorder %s5758_s21, %s5752_s10 }
 0x63a   : > { %v3560_v6 = vmul.f32 0.2, %v3528_v20  ;;  %v3529_v25 = vadd.f32 %v5126_v44, %v6888_v40  ;;  %5053 = vmatprep.mubr.bf16.mxu0 %v3586_v30  ;;  %vm3544_vm10 = vcmp.ge.f32.partialorder %v3528_v20, 0.0 }
 0x63b   : > { %v3558_v52 = vmul.f32 0.2, %v3526_v36  ;;  %v3527_v3 = vadd.f32 %v5132_v4, %v6888_v40  ;;  %5054 = vmatmul.mubr.bf16.vlgmr.msra.gmra.mrb[128].mxu0 %v3587_v43  ;;  %vm3542_vm11 = vcmp.ge.f32.partialorder %v3526_v36, 0.0  ;;  %p5761_p10 = por %p5760_p11, %p5759_p0 }
 0x63c   : > { %vm3545_vm12 = vcmp.ge.f32.partialorder %v3529_v25, 0.0  ;;  %v3561_v11 = vmul.f32 0.2, %v3529_v25  ;;  %v3576_v61 = vsel %vm3544_vm10, %v3528_v20, %v3560_v6 }
 0x63d   : > { %vm3543_vm13 = vcmp.ge.f32.partialorder %v3527_v3, 0.0  ;;  %v3559_v0 = vmul.f32 0.2, %v3527_v3  ;;  %v5031_v14 = vpop.f32.mrb[8].mxu1  ;;  %v3574_v12 = vsel %vm3542_vm11, %v3526_v36, %v3558_v52  ;;  %p5762_p5 = pnand %p5761_p10, %p5755_p13 }
 0x63e   : > { %v5138_v57 = vadd.f32 %v6873_v28, %v5031_v14  ;;  %v3452_v49 = vpop.f32.mrb[9].mxu1  ;;  %v3577_v19 = vsel %vm3545_vm12, %v3529_v25, %v3561_v11 }
 0x63f   : > { %v5144_v21 = vadd.f32 %v6869_v10, %v3452_v49  ;;  %v5032_v27 = vpop.f32.mrb[10].mxu1  ;;  %v3575_v59 = vsel %vm3543_vm13, %v3527_v3, %v3559_v0  ;;  %v3589_v37 = vpack.c.bf16 %v3577_v19, %v3576_v61 }
 0x640   : > { %v3532_v29 = vadd.f32 %v5138_v57, %v6888_v40  ;;  %v5150_v45 = vadd.f32 %v6875_v63, %v5032_v27  ;;  %v3455_v50 = vpop.f32.mrb[11].mxu1  ;;  %v3588_v35 = vpack.c.bf16 %v3575_v59, %v3574_v12 }
 0x641   : > { %v3530_v17 = vadd.f32 %v5144_v21, %v6888_v40  ;;  %v5156_v51 = vadd.f32 %v6871_v5, %v3455_v50 }
 0x642   : > { %v3564_v28 = vmul.f32 0.2, %v3532_v29  ;;  %v3533_v1 = vadd.f32 %v5150_v45, %v6888_v40  ;;  %5057 = vmatprep.mubr.bf16.mxu0 %v3588_v35  ;;  %vm3548_vm14 = vcmp.ge.f32.partialorder %v3532_v29, 0.0 }
 0x643   : > { %v3562_v10 = vmul.f32 0.2, %v3530_v17  ;;  %v3531_v31 = vadd.f32 %v5156_v51, %v6888_v40  ;;  %5058 = vmatmul.mubr.bf16.gmra.mrb[132].mxu0 %v3589_v37  ;;  %vm3546_vm15 = vcmp.ge.f32.partialorder %v3530_v17, 0.0 }
 0x644   : > { %vm3549_vm0 = vcmp.ge.f32.partialorder %v3533_v1, 0.0  ;;  %v3565_v55 = vmul.f32 0.2, %v3533_v1  ;;  %v3580_v32 = vsel %vm3548_vm14, %v3532_v29, %v3564_v28 }
 0x645   : > { %vm3547_vm1 = vcmp.ge.f32.partialorder %v3531_v31, 0.0  ;;  %v3563_v63 = vmul.f32 0.2, %v3531_v31  ;;  %v5035_v60 = vpop.f32.mrb[12].mxu1  ;;  %v3578_v48 = vsel %vm3546_vm15, %v3530_v17, %v3562_v10 }
 0x646   : > { %v5162_v47 = vadd.f32 %v6881_v46, %v5035_v60  ;;  %v3468_v34 = vpop.f32.mrb[13].mxu1  ;;  %v3581_v5 = vsel %vm3549_vm0, %v3533_v1, %v3565_v55 }
 0x647   : > { %v5168_v16 = vadd.f32 %v6877_v9, %v3468_v34  ;;  %v5036_v54 = vpop.f32.mrb[14].mxu1  ;;  %v3579_v38 = vsel %vm3547_vm1, %v3531_v31, %v3563_v63  ;;  %v3591_v56 = vpack.c.bf16 %v3581_v5, %v3580_v32 }
 0x648   : > { %v3536_v42 = vadd.f32 %v5162_v47, %v6888_v40  ;;  %v5174_v26 = vadd.f32 %v6883_v22, %v5036_v54  ;;  %v3471_v33 = vpop.f32.mrb[15].mxu1  ;;  %v3590_v53 = vpack.c.bf16 %v3579_v38, %v3578_v48 }
 0x649   : > { %v3534_v39 = vadd.f32 %v5168_v16, %v6888_v40  ;;  %v5180_v58 = vadd.f32 %v6879_v15, %v3471_v33 }
 0x64a   : > { %v3568_v46 = vmul.f32 0.2, %v3536_v42  ;;  %v3537_v62 = vadd.f32 %v5174_v26, %v6888_v40  ;;  %5061 = vmatprep.mubr.bf16.mxu0 %v3590_v53  ;;  %vm3552_vm2 = vcmp.ge.f32.partialorder %v3536_v42, 0.0 }
 0x64b   : > { %v3566_v9 = vmul.f32 0.2, %v3534_v39  ;;  %v3535_v8 = vadd.f32 %v5180_v58, %v6888_v40  ;;  %5062 = vmatmul.mubr.bf16.gmra.mrb[136].mxu0 %v3591_v56  ;;  %vm3550_vm3 = vcmp.ge.f32.partialorder %v3534_v39, 0.0 }
 0x64c   : > { %vm3553_vm4 = vcmp.ge.f32.partialorder %v3537_v62, 0.0  ;;  %v3569_v24 = vmul.f32 0.2, %v3537_v62  ;;  %v3584_v41 = vsel %vm3552_vm2, %v3536_v42, %v3568_v46 }
 0x64d   : > { %vm3551_vm5 = vcmp.ge.f32.partialorder %v3535_v8, 0.0  ;;  %v3567_v22 = vmul.f32 0.2, %v3535_v8  ;;  %v3582_v13 = vsel %vm3550_vm3, %v3534_v39, %v3566_v9 }
 0x64e   : > { %v3585_v43 = vsel %vm3553_vm4, %v3537_v62, %v3569_v24 }
 0x64f   : > { %v3583_v18 = vsel %vm3551_vm5, %v3535_v8, %v3567_v22  ;;  %v3593_v23 = vpack.c.bf16 %v3585_v43, %v3584_v41 }
 0x650   : > { %v3592_v15 = vpack.c.bf16 %v3583_v18, %v3582_v13 }
 0x652   : > { %5065 = vmatprep.mubr.bf16.mxu0 %v3592_v15 }
 0x653   : > { %5066 = vmatmul.mubr.bf16.gmra.mrb[140].mxu0 %v3593_v23 }
 0x70e   : > { %v5055_v40 = vpop.f32.mrb[128].mxu0 }
 0x70f   : > { %v3708_v20 = vadd.f32 %v5055_v40, %v6924_v7  ;;  %v3699_v44 = vpop.f32.mrb[129].mxu0 }
 0x710   : > { %v3700_v2 = vadd.f32 %v6924_v7, %v3699_v44  ;;  %v5056_v30 = vpop.f32.mrb[130].mxu0 }
 0x711   : > { %vm3764_vm6 = vcmp.ge.f32.partialorder %v3708_v20, 0.0  ;;  %v3780_v36 = vmul.f32 0.2, %v3708_v20  ;;  %v3711_v4 = vadd.f32 %v5056_v30, %v6924_v7  ;;  %v3702_v6 = vpop.f32.mrb[131].mxu0 }
 0x712   : > { %vm3762_vm7 = vcmp.ge.f32.partialorder %v3700_v2, 0.0  ;;  %v3778_v25 = vmul.f32 0.2, %v3700_v2  ;;  %v3703_v52 = vadd.f32 %v6924_v7, %v3702_v6 }
 0x713   : > { %v3796_v3 = vsel %vm3764_vm6, %v3708_v20, %v3780_v36  ;;  %vm3765_vm8 = vcmp.ge.f32.partialorder %v3711_v4, 0.0  ;;  %v3781_v11 = vmul.f32 0.2, %v3711_v4 }
 0x714   : > { %3812 = vst [vmem:[%s6319_s15 + $0x10] sm:$0xff] %v3796_v3  ;;  %v3794_v0 = vsel %vm3762_vm7, %v3700_v2, %v3778_v25  ;;  %vm3763_vm9 = vcmp.ge.f32.partialorder %v3703_v52, 0.0  ;;  %v3779_v14 = vmul.f32 0.2, %v3703_v52 }
 0x715   : > { %3810 = vst [vmem:[%s6319_s15] sm:$0xff] %v3794_v0  ;;  %v3797_v57 = vsel %vm3765_vm8, %v3711_v4, %v3781_v11 }
 0x716   : > { %3813 = vst [vmem:[%s6319_s15 + $0x18] sm:$0xff] %v3797_v57  ;;  %v3795_v49 = vsel %vm3763_vm9, %v3703_v52, %v3779_v14  ;;  %v5059_v61 = vpop.f32.mrb[132].mxu0 }
 0x717   : > { %3811 = vst [vmem:[%s6319_s15 + $0x8] sm:$0xff] %v3795_v49  ;;  %v3724_v19 = vadd.f32 %v5059_v61, %v6924_v7  ;;  %v3715_v21 = vpop.f32.mrb[133].mxu0 }
 0x718   : > { %v3716_v27 = vadd.f32 %v6924_v7, %v3715_v21  ;;  %v5060_v12 = vpop.f32.mrb[134].mxu0 }
 0x719   : > { %vm3768_vm10 = vcmp.ge.f32.partialorder %v3724_v19, 0.0  ;;  %v3784_v59 = vmul.f32 0.2, %v3724_v19  ;;  %v3727_v37 = vadd.f32 %v5060_v12, %v6924_v7  ;;  %v3718_v29 = vpop.f32.mrb[135].mxu0 }
 0x71a   : > { %vm3766_vm11 = vcmp.ge.f32.partialorder %v3716_v27, 0.0  ;;  %v3782_v45 = vmul.f32 0.2, %v3716_v27  ;;  %v3719_v50 = vadd.f32 %v6924_v7, %v3718_v29 }
 0x71b   : > { %v3800_v35 = vsel %vm3768_vm10, %v3724_v19, %v3784_v59  ;;  %vm3769_vm12 = vcmp.ge.f32.partialorder %v3727_v37, 0.0  ;;  %v3785_v17 = vmul.f32 0.2, %v3727_v37 }
 0x71c   : > { %3816 = vst [vmem:[%s6319_s15 + $0x30] sm:$0xff] %v3800_v35  ;;  %v3798_v51 = vsel %vm3766_vm11, %v3716_v27, %v3782_v45  ;;  %vm3767_vm13 = vcmp.ge.f32.partialorder %v3719_v50, 0.0  ;;  %v3783_v28 = vmul.f32 0.2, %v3719_v50 }
 0x71d   : > { %3814 = vst [vmem:[%s6319_s15 + $0x20] sm:$0xff] %v3798_v51  ;;  %v3801_v1 = vsel %vm3769_vm12, %v3727_v37, %v3785_v17 }
 0x71e   : > { %3817 = vst [vmem:[%s6319_s15 + $0x38] sm:$0xff] %v3801_v1  ;;  %v3799_v10 = vsel %vm3767_vm13, %v3719_v50, %v3783_v28  ;;  %v5063_v31 = vpop.f32.mrb[136].mxu0 }
 0x71f   : > { %3815 = vst [vmem:[%s6319_s15 + $0x28] sm:$0xff] %v3799_v10  ;;  %v3740_v55 = vadd.f32 %v5063_v31, %v6924_v7  ;;  %v3731_v63 = vpop.f32.mrb[137].mxu0 }
 0x720   : > { %v3732_v60 = vadd.f32 %v6924_v7, %v3731_v63  ;;  %v5064_v47 = vpop.f32.mrb[138].mxu0 }
 0x721   : > { %vm3772_vm14 = vcmp.ge.f32.partialorder %v3740_v55, 0.0  ;;  %v3788_v34 = vmul.f32 0.2, %v3740_v55  ;;  %v3743_v32 = vadd.f32 %v5064_v47, %v6924_v7  ;;  %v3734_v5 = vpop.f32.mrb[139].mxu0 }
 0x722   : > { %vm3770_vm15 = vcmp.ge.f32.partialorder %v3732_v60, 0.0  ;;  %v3786_v16 = vmul.f32 0.2, %v3732_v60  ;;  %v3735_v54 = vadd.f32 %v6924_v7, %v3734_v5 }
 0x723   : > { %v3804_v48 = vsel %vm3772_vm14, %v3740_v55, %v3788_v34  ;;  %vm3773_vm0 = vcmp.ge.f32.partialorder %v3743_v32, 0.0  ;;  %v3789_v38 = vmul.f32 0.2, %v3743_v32 }
 0x724   : > { %3820 = vst [vmem:[%s6319_s15 + $0x50] sm:$0xff] %v3804_v48  ;;  %v3802_v56 = vsel %vm3770_vm15, %v3732_v60, %v3786_v16  ;;  %vm3771_vm1 = vcmp.ge.f32.partialorder %v3735_v54, 0.0  ;;  %v3787_v42 = vmul.f32 0.2, %v3735_v54 }
 0x725   : > { %3818 = vst [vmem:[%s6319_s15 + $0x40] sm:$0xff] %v3802_v56  ;;  %v3805_v26 = vsel %vm3773_vm0, %v3743_v32, %v3789_v38 }
 0x726   : > { %3821 = vst [vmem:[%s6319_s15 + $0x58] sm:$0xff] %v3805_v26  ;;  %v3803_v33 = vsel %vm3771_vm1, %v3735_v54, %v3787_v42  ;;  %v5067_v53 = vpop.f32.mrb[140].mxu0 }
 0x727   : > { %3819 = vst [vmem:[%s6319_s15 + $0x48] sm:$0xff] %v3803_v33  ;;  %v3756_v39 = vadd.f32 %v5067_v53, %v6924_v7  ;;  %v3747_v58 = vpop.f32.mrb[141].mxu0 }
 0x728   : > { %v3748_v46 = vadd.f32 %v6924_v7, %v3747_v58  ;;  %v5068_v62 = vpop.f32.mrb[142].mxu0 }
 0x729   : > { %vm3776_vm2 = vcmp.ge.f32.partialorder %v3756_v39, 0.0  ;;  %v3792_v9 = vmul.f32 0.2, %v3756_v39  ;;  %v3759_v8 = vadd.f32 %v5068_v62, %v6924_v7  ;;  %v3750_v24 = vpop.f32.mrb[143].mxu0 }
 0x72a   : > { %vm3774_vm3 = vcmp.ge.f32.partialorder %v3748_v46, 0.0  ;;  %v3790_v22 = vmul.f32 0.2, %v3748_v46  ;;  %v3751_v41 = vadd.f32 %v6924_v7, %v3750_v24 }
 0x72b   : > { %v3808_v43 = vsel %vm3776_vm2, %v3756_v39, %v3792_v9  ;;  %vm3777_vm4 = vcmp.ge.f32.partialorder %v3759_v8, 0.0  ;;  %v3793_v13 = vmul.f32 0.2, %v3759_v8 }
 0x72c   : > { %3824 = vst [vmem:[%s6319_s15 + $0x70] sm:$0xff] %v3808_v43  ;;  %v3806_v18 = vsel %vm3774_vm3, %v3748_v46, %v3790_v22  ;;  %vm3775_vm5 = vcmp.ge.f32.partialorder %v3751_v41, 0.0  ;;  %v3791_v23 = vmul.f32 0.2, %v3751_v41 }
 0x72d   : > { %3822 = vst [vmem:[%s6319_s15 + $0x60] sm:$0xff] %v3806_v18  ;;  %v3809_v15 = vsel %vm3777_vm4, %v3759_v8, %v3793_v13 }
 0x72e   : > { %3825 = vst [vmem:[%s6319_s15 + $0x78] sm:$0xff] %v3809_v15  ;;  %v3807_v7 = vsel %vm3775_vm5, %v3751_v41, %v3791_v23 }
 0x72f   : > { %3823 = vst [vmem:[%s6319_s15 + $0x68] sm:$0xff] %v3807_v7 }
 0x730   : > { %5765 = shalt.err (!%p5762_p5)
}
 0x731   : > { %s5766_s27 = scalar_lea.hbm %s6961_s6, 2048  ;;  %s5770_s2 = scalar_lea.hbm %s7105_s5, 8192 }
 0x732   : > { %p5767_p6 = scmp.ne.s32.totalorder %s6961_s6, %s5766_s27  ;;  %p5771_p4 = scmp.lt.u32.totalorder %s6961_s6, %s7105_s5 }
 0x733   : > { %p5772_p7 = scmp.lt.u32.totalorder %s5770_s2, %s5766_s27  ;;  %p5774_p1 = scmp.lt.u32.totalorder %s5766_s27, %s6961_s6 }
 0x734   : > { %p5768_p8 = pnand %p5767_p6, %p7106_p3 }
 0x735   : > { %p5773_p2 = por %p5772_p7, %p5771_p4 }
 0x736   : > { %p5769_p12 = pneg %p5768_p8 }
 0x737   : > { %p5775_p9 = por %p5774_p1, %p5773_p2 }
 0x739   : > { %p5776_p13 = pnand %p5775_p9, %p5769_p12 }
 0x73b   : > { %5779 = shalt.err (!%p5776_p13)
}
 0x73c   : > { %s5908_s24 = smov 128   ;;  %s5909_s28 = smov 8  }
 0x73d   : > { %5281 = dma.vmem_to_hbm [thread:$0]  (%p7106_p3), %s6963_s0, 2048, %s6961_s6, %s6970_s16, %s5908_s24, %s5908_s24, %s5909_s28  }
 0x73e PF: > { %s7107_s23 = sld [smem:[#allocation22_spill]]  ;;  %s7108_s20 = sld [smem:[#allocation27_spill]] }
 0x73f   : > { %p5316_p0 = scmp.ge.s32.totalorder %s5890_s19, 2 }
 0x744   : > { %s3858_s9 = sand.u32 1, %s7107_s23   ;;  %p7109_p11 = scmp.ne.s32.totalorder %s7108_s20, 0 }
 0x745   : > { %s3859_s10 = scalar_lea.sflag [#allocation6], %s3858_s9 }
 0x746   : > { %p5304_p10 = pnand %p5316_p0, %p7109_p11 }
 0x748   : > { %5845 = dma.done.wait (!%p5304_p10), %s3859_s10, 2048  }
 0x749   : > { %5847 = vsyncadd (!%p5304_p10), %s3859_s10, 4294965248  ;;  %s30_s19 = sadd.s32 1, %s5890_s19   ;;  %s7110_s30 = sld [smem:[#allocation23_spill]] }
 0x74a   : > { %p27_p5 = scmp.ge.s32.totalorder %s30_s19, 6   ;;  %s7111_s10 = smov %s5858_s11 }
 0x74b   : > { %s7112_s11 = smov %s6196_s3  ;;  %s7113_s12 = smov %s5866_s13 }
 0x74c   : > { %s7114_s13 = smov %s5870_s14  ;;  %s7115_s14 = smov %s6191_s25 }
 0x74d   : > { %s7116_s15 = smov %s5882_s17  ;;  %s7117_s16 = smov %s5886_s18 }
 0x74e   : > { %s7118_s17 = smov %s7121_s8  ;;  %s7119_s18 = smov %s7125_s29 }
 0x74f   :  { %29 = sbr.rel (!%p27_p5) target bundleno = 23 (0x17), region = 180 }
 0x756   :  { %3864 = vsyncpa [#allocation5], 1 }
 0x757   :  { %3866 = vsyncpa [#allocation5 + $0x1], 1 }
 0x758   :  { %3867 = vsyncpa [#allocation8], 1 }
 0x759   :  { %3869 = vsyncpa [#allocation8 + $0x1], 1 }
 0x75a   :  { %3870 = vsyncpa [#allocation11], 1 }
 0x75b   :  { %3871 = vsyncpa [#allocation14], 1 }
 0x75c   :  { %3872 = vsyncpa [#allocation6], 1 }
 0x75d   :  { %3874 = vsyncpa [#allocation6 + $0x1], 1 }

</bundles_post_ra>
